<compile_context>
chip_gen: v7x
topology: tpu7x:2x2x1
jax: 0.10.0
libtpu: 0.0.40
codegen_flags: <defaults>
</compile_context>

<pallas_src>
import functools
import math

import jax
import jax.numpy as jnp
from jax import lax
from jax.experimental import pallas as pl
from jax.experimental.pallas import tpu as pltpu


def _sigmoid(x):
    # sigmoid(x) == 0.5 * (tanh(x/2) + 1): one transcendental per element.
    return 0.5 * (jnp.tanh(0.5 * x) + 1.0)


# ----------------------------------------------------------------------------
# Feature probe: single-buffered (grid-invariant) weight blocks
# ----------------------------------------------------------------------------
def _single_buffer_mode():
    """pl.Buffered(1) keeps constant-index weight blocks single-buffered,
    reclaiming VMEM at production sizes.  Probe it once so an unsupported
    JAX/libtpu combo silently falls back to default double buffering."""
    try:
        mode = {"pipeline_mode": pl.Buffered(1)}

        def k(x_ref, w_ref, o_ref):
            o_ref[...] = x_ref[...] + w_ref[...]

        f = pl.pallas_call(
            k,
            out_shape=jax.ShapeDtypeStruct((16, 128), jnp.float32),
            grid=(2,),
            in_specs=[
                pl.BlockSpec((8, 128), lambda i: (i, 0)),
                pl.BlockSpec((8, 128), lambda i: (0, 0), **mode),
            ],
            out_specs=pl.BlockSpec((8, 128), lambda i: (i, 0)),
        )
        x = jnp.ones((16, 128), jnp.float32)
        w = jnp.ones((8, 128), jnp.float32)
        if bool(jnp.allclose(f(x, w), 2.0)):
            return mode
    except Exception:
        pass
    return {}


_WEIGHT_BUFFERING = _single_buffer_mode()


# ----------------------------------------------------------------------------
# Tiling heuristics (generation-aware VMEM sizing)
# ----------------------------------------------------------------------------
def _vmem_budget_bytes():
    """~55% of physical VMEM for the buffers we account (v5e/v6e: 128 MiB,
    v7x: 64 MiB), plus a scoped-vmem limit above the 16/32 MiB defaults but
    with headroom below physical capacity."""
    try:
        cap = int(pltpu.get_tpu_info().vmem_capacity_bytes)
    except Exception:
        cap = 64 * 1024 * 1024          # conservative (v7x-sized) fallback
    budget = int(cap * 0.55)
    limit = int(min(cap * 0.75, 100 * 1024 * 1024))
    return budget, limit


def _pick_batch_block(B, cap=256):
    """Largest multiple-of-8 divisor of B (<= cap) that still leaves >= 2 batch
    blocks, so the 'parallel' grid axis can shard across v7x's two TensorCores
    while keeping the per-step MXU matmul tall.  Tiny batches fall back to the
    full batch (block == full array dim keeps the (8,128) rule satisfied)."""
    best = None
    for tb in range(8, min(B, cap) + 1, 8):
        if B % tb == 0 and 2 * tb <= B:
            best = tb
    if best is not None:
        return best
    for tb in range(min(B, cap), 7, -1):
        if B % tb == 0 and tb % 8 == 0:
            return tb
    return B


def _pick_time_block(T, tb, d_in, hidden, in_bytes, out_bytes, budget_bytes,
                     cap=32):
    """Largest time chunk (<= cap) whose double-buffered input/output blocks,
    xw scratch, resident weights and f32 carries fit the VMEM budget."""
    w_bufs = 1 if _WEIGHT_BUFFERING else 2
    fixed = w_bufs * (d_in + hidden) * 4 * hidden * 2        # bf16 W_ih + W_hh
    fixed += w_bufs * 4 * hidden * 4                         # f32 bias
    fixed += 2 * tb * hidden * 4                             # f32 h/c carries
    per_tt = tb * (2 * d_in * in_bytes                       # x double buffer
                   + 2 * hidden * out_bytes                  # h_seq double buffer
                   + 4 * hidden * 2)                         # bf16 xw scratch
    tt = max(8, min(cap, (budget_bytes - fixed) // max(per_tt, 1)))
    # Never chunk far past T (T is padded up to a multiple of tt).
    return int(min(tt, -(-T // 8) * 8))


# ----------------------------------------------------------------------------
# Pallas kernel: fused input projection + LSTM recurrence for one
# (batch block, time chunk)
# ----------------------------------------------------------------------------
def _lstm_layer_kernel(x_ref, w_ih_ref, w_hh_ref, b_ref, hseq_ref,
                       xw_sc, h_sc, c_sc, *, tt, hidden):
    """x_ref    : (tt, tb, Din) bf16  layer-input chunk (time-major)
       w_ih_ref : (Din, 4Hp)    bf16  packed input->gate weights (resident)
       w_hh_ref : (Hp, 4Hp)     bf16  packed hidden->gate weights (resident)
       b_ref    : (1, 4Hp)      f32   packed bias b_ih + b_hh (resident)
       hseq_ref : (tt, tb, Hp)        hidden sequence for this chunk
       xw_sc    : (tt, tb, 4Hp) bf16  chunk input projection (VMEM scratch)
       h_sc/c_sc: (tb, Hp)      f32   carries, persist across the time axis
    """
    chunk = pl.program_id(1)

    @pl.when(chunk == 0)
    def _():
        h_sc[...] = jnp.zeros_like(h_sc)
        c_sc[...] = jnp.zeros_like(c_sc)

    tb = h_sc.shape[0]
    w_ih = w_ih_ref[...]
    bias = jnp.broadcast_to(b_ref[...].astype(jnp.float32), (tb, 4 * hidden))

    # Input projection for the whole chunk: no sequential dependence, so it is
    # tt independent bf16 MXU matmuls issued back-to-back before the recurrence.
    def proj(t, carry):
        xw = jnp.dot(x_ref[t], w_ih, preferred_element_type=jnp.float32) + bias
        xw_sc[t] = xw.astype(xw_sc.dtype)
        return carry

    lax.fori_loop(0, tt, proj, 0, unroll=min(tt, 8))

    w_hh = w_hh_ref[...]

    # Serial recurrence: one (tb,Hp)@(Hp,4Hp) bf16 MXU matmul per timestep,
    # f32 accumulation, f32 cell state.
    def step(t, carry):
        h_prev, c_prev = carry
        gates = xw_sc[t].astype(jnp.float32) + jnp.dot(
            h_prev.astype(w_hh.dtype), w_hh, preferred_element_type=jnp.float32)
        i_g = _sigmoid(gates[:, 0 * hidden:1 * hidden])
        f_g = _sigmoid(gates[:, 1 * hidden:2 * hidden])
        g_g = jnp.tanh(gates[:, 2 * hidden:3 * hidden])
        o_g = _sigmoid(gates[:, 3 * hidden:4 * hidden])
        c_new = f_g * c_prev + i_g * g_g
        h_new = o_g * jnp.tanh(c_new)
        hseq_ref[t] = h_new.astype(hseq_ref.dtype)
        return h_new, c_new

    h_fin, c_fin = lax.fori_loop(0, tt, step, (h_sc[...], c_sc[...]),
                                 unroll=min(tt, 8))
    h_sc[...] = h_fin
    c_sc[...] = c_fin


def lstm_layer_pallas(x_tm, w_ih, w_hh, b, *, out_dtype,
                      time_block=None, batch_block=None):
    """x_tm : (T, B, Din) time-major layer input (bf16)
       w_ih : (Din, 4Hp) bf16, w_hh : (Hp, 4Hp) bf16, b : (1, 4Hp) f32
       returns the hidden-state sequence (Tp, B, Hp) in `out_dtype`
       (Tp >= T: time padded up to a multiple of the time chunk)."""
    T, B, d_in = x_tm.shape
    hp = w_hh.shape[0]
    assert w_ih.shape == (d_in, 4 * hp) and w_hh.shape == (hp, 4 * hp)
    assert b.shape == (1, 4 * hp)

    budget, vmem_limit = _vmem_budget_bytes()
    tb = batch_block if batch_block is not None else _pick_batch_block(B)
    tt = time_block if time_block is not None else _pick_time_block(
        T, tb, d_in, hp, x_tm.dtype.itemsize, jnp.dtype(out_dtype).itemsize,
        budget)
    assert B % tb == 0

    t_pad = -(-T // tt) * tt
    if t_pad != T:
        x_tm = jnp.pad(x_tm, ((0, t_pad - T), (0, 0), (0, 0)))
    nb, nc = B // tb, t_pad // tt

    kernel = functools.partial(_lstm_layer_kernel, tt=tt, hidden=hp)

    grid_spec = pltpu.PrefetchScalarGridSpec(
        num_scalar_prefetch=0,
        grid=(nb, nc),                     # batch (parallel) x time (sequential)
        in_specs=[
            pl.BlockSpec((tt, tb, d_in), lambda bb, c: (c, bb, 0)),
            pl.BlockSpec((d_in, 4 * hp), lambda bb, c: (0, 0), **_WEIGHT_BUFFERING),
            pl.BlockSpec((hp, 4 * hp), lambda bb, c: (0, 0), **_WEIGHT_BUFFERING),
            pl.BlockSpec((1, 4 * hp), lambda bb, c: (0, 0), **_WEIGHT_BUFFERING),
        ],
        out_specs=pl.BlockSpec((tt, tb, hp), lambda bb, c: (c, bb, 0)),
        scratch_shapes=[
            pltpu.VMEM((tt, tb, 4 * hp), jnp.bfloat16),   # chunk input projection
            pltpu.VMEM((tb, hp), jnp.float32),            # h carry
            pltpu.VMEM((tb, hp), jnp.float32),            # c carry
        ],
    )

    return pl.pallas_call(
        kernel,
        out_shape=jax.ShapeDtypeStruct((t_pad, B, hp), out_dtype),
        grid_spec=grid_spec,
        compiler_params=pltpu.CompilerParams(
            dimension_semantics=("parallel", "arbitrary"),
            vmem_limit_bytes=vmem_limit,
        ),
    )(x_tm, w_ih, w_hh, b)


# ----------------------------------------------------------------------------
# Encoder parameters (PyTorch-compatible layout) and packing
# ----------------------------------------------------------------------------
def init_encoder_params(key, input_dim, embedding_dim, lstm_layers):
    """PyTorch nn.LSTM layout & init: W_ih:(4H,D), W_hh:(4H,H), b_ih/b_hh:(4H,),
    all U(-1/sqrt(H), 1/sqrt(H)), gate order (i, f, g, o)."""
    H = embedding_dim
    bound = 1.0 / math.sqrt(H)
    layers = []
    for layer in range(lstm_layers):
        d_in = input_dim if layer == 0 else H
        key, k1, k2, k3, k4 = jax.random.split(key, 5)
        layers.append(dict(
            w_ih=jax.random.uniform(k1, (4 * H, d_in), jnp.float32, -bound, bound),
            w_hh=jax.random.uniform(k2, (4 * H, H), jnp.float32, -bound, bound),
            b_ih=jax.random.uniform(k3, (4 * H,), jnp.float32, -bound, bound),
            b_hh=jax.random.uniform(k4, (4 * H,), jnp.float32, -bound, bound),
        ))
    return layers


def pack_params(torch_layout_params, *, lane=128, param_dtype=jnp.bfloat16):
    """Repack PyTorch-layout LSTM params for the kernel:
       w_ih -> (Din or Hp, 4Hp) bf16, w_hh -> (Hp, 4Hp) bf16, b -> (1, 4Hp) f32,
    with the hidden width zero-padded to a multiple of 128 so the four gate
    slices are lane-aligned.  Zero padding is exact: padded gate columns have
    pre-activation 0 -> (i,f,o)=0.5, g=0 -> padded h/c stay identically 0 and
    the zero weight rows keep them out of the real gates."""
    H = torch_layout_params[0]["w_hh"].shape[1]
    Hp = -(-H // lane) * lane
    packed = []
    for layer, p in enumerate(torch_layout_params):
        w_ih = jnp.asarray(p["w_ih"], jnp.float32)            # (4H, Din)
        w_hh = jnp.asarray(p["w_hh"], jnp.float32)            # (4H, H)
        bias = jnp.asarray(p["b_ih"] + p["b_hh"], jnp.float32)  # (4H,)
        d_in = w_ih.shape[1]

        w_ih_p = jnp.pad(w_ih.T.reshape(d_in, 4, H), ((0, 0), (0, 0), (0, Hp - H)))
        w_hh_p = jnp.pad(w_hh.T.reshape(H, 4, H),
                         ((0, Hp - H), (0, 0), (0, Hp - H)))
        b_p = jnp.pad(bias.reshape(4, H), ((0, 0), (0, Hp - H)))
        if layer > 0:
            # Hidden-sized input: pad the input rows too (they multiply the
            # padded, always-zero hidden columns of the previous layer).
            w_ih_p = jnp.pad(w_ih_p, ((0, Hp - H), (0, 0), (0, 0)))

        packed.append((
            w_ih_p.reshape(-1, 4 * Hp).astype(param_dtype),
            w_hh_p.reshape(Hp, 4 * Hp).astype(param_dtype),
            b_p.reshape(1, 4 * Hp),                           # bias stays f32
        ))
    return packed


@functools.partial(jax.jit, static_argnames=("hidden_dim",))
def encoder_forward(x_bt, packed_params, *, hidden_dim):
    """x_bt: (B, T, D) batch-first (like PyTorch).  Returns (hidden[-1], hidden_outs)."""
    T = x_bt.shape[1]
    x_tm = jnp.transpose(x_bt, (1, 0, 2)).astype(jnp.bfloat16)   # (T, B, D)
    n_layers = len(packed_params)
    for layer, (w_ih, w_hh, b) in enumerate(packed_params):
        last = layer == n_layers - 1
        x_tm = lstm_layer_pallas(
            x_tm, w_ih, w_hh, b,
            out_dtype=jnp.float32 if last else jnp.bfloat16)      # (Tp, B, Hp)
    h_seq = x_tm[:T, :, :hidden_dim]            # drop time / lane padding, f32
    h_last = h_seq[-1]                          # (B, H)  == hidden[-1]
    hidden_outs = jnp.transpose(h_seq, (1, 0, 2))                 # (B, T, H)
    return h_last, hidden_outs


# ----------------------------------------------------------------------------
# Pure-JAX f32 reference (independent implementation of the same math)
# ----------------------------------------------------------------------------
def encoder_reference(x_bt, torch_layout_params):
    with jax.default_matmul_precision("float32"):
        x = jnp.transpose(x_bt, (1, 0, 2))               # (T, B, D)
        B = x.shape[1]
        h_last = None
        for p in torch_layout_params:
            w_ih, w_hh = p["w_ih"], p["w_hh"]
            b = p["b_ih"] + p["b_hh"]
            H = w_hh.shape[1]

            def step(carry, x_t, w_ih=w_ih, w_hh=w_hh, b=b, H=H):
                h, c = carry
                gates = x_t @ w_ih.T + h @ w_hh.T + b
                i = jax.nn.sigmoid(gates[:, 0 * H:1 * H])
                f = jax.nn.sigmoid(gates[:, 1 * H:2 * H])
                g = jnp.tanh(gates[:, 2 * H:3 * H])
                o = jax.nn.sigmoid(gates[:, 3 * H:4 * H])
                c = f * c + i * g
                h = o * jnp.tanh(c)
                return (h, c), h

            init = (jnp.zeros((B, H), jnp.float32), jnp.zeros((B, H), jnp.float32))
            (h_last, _), h_seq = lax.scan(step, init, x)
            x = h_seq
        return h_last, jnp.transpose(x, (1, 0, 2))


if __name__ == "__main__":
    # Small shapes consistent with Encoder(input_dim, embedding_dim, dropout, lstm_layers)
    B, T = 2, 8
    input_dim, embedding_dim, lstm_layers = 16, 32, 2

    key = jax.random.PRNGKey(0)
    key, kx = jax.random.split(key)
    x = jax.random.normal(kx, (B, T, input_dim), jnp.float32)

    torch_params = init_encoder_params(key, input_dim, embedding_dim, lstm_layers)
    packed = pack_params(torch_params)

    h_last, hidden_outs = encoder_forward(x, packed, hidden_dim=embedding_dim)
    jax.block_until_ready((h_last, hidden_outs))

    assert h_last.shape == (B, embedding_dim)
    assert hidden_outs.shape == (B, T, embedding_dim)

    # Cross-check against the independent f32 reference.  The kernel path uses
    # bf16 weights / bf16 xw with f32 accumulation and f32 carries, giving
    # ~1e-2-level divergence over T steps and 2 layers; structural bugs (gate
    # order / packing / padding / carry) show up as O(0.1-1) errors, so 5e-2
    # still discriminates cleanly.
    h_last_ref, hidden_outs_ref = encoder_reference(x, torch_params)
    assert jnp.allclose(h_last, h_last_ref, atol=5e-2, rtol=5e-2)
    assert jnp.allclose(hidden_outs, hidden_outs_ref, atol=5e-2, rtol=5e-2)

    print("KERNEL_OK")
</pallas_src>

<mosaic_0001>
module attributes {stable_mosaic.version = 11 : i64} {
  func.func @k(%arg0: i32, %arg1: memref<8x128xf32, #tpu.memory_space<vmem>>, %arg2: memref<8x128xf32, #tpu.memory_space<vmem>>, %arg3: memref<8x128xf32, #tpu.memory_space<vmem>>) attributes {dimension_semantics = [#tpu.dimension_semantics<arbitrary>], iteration_bounds = array<i64: 2>, scalar_prefetch = 0 : i64, scratch_operands = 0 : i64, tpu.core_type = #tpu.core_type<tc>, window_params = [{transform_indices = @transform_0, window_bounds = array<i64: 8, 128>}, {pipeline_mode = #tpu.pipeline_mode<synchronous>, transform_indices = @transform_1, window_bounds = array<i64: 8, 128>}, {transform_indices = @transform_2, window_bounds = array<i64: 8, 128>}]} {
    %c0 = arith.constant 0 : index
    %c0_0 = arith.constant 0 : index
    %0 = vector.load %arg1[%c0, %c0_0] : memref<8x128xf32, #tpu.memory_space<vmem>>, vector<8x128xf32>
    %c0_1 = arith.constant 0 : index
    %c0_2 = arith.constant 0 : index
    %1 = vector.load %arg2[%c0_1, %c0_2] : memref<8x128xf32, #tpu.memory_space<vmem>>, vector<8x128xf32>
    %2 = arith.addf %0, %1 : vector<8x128xf32>
    %c0_3 = arith.constant 0 : index
    %c0_4 = arith.constant 0 : index
    %3 = vector.load %arg3[%c0_3, %c0_4] : memref<8x128xf32, #tpu.memory_space<vmem>>, vector<8x128xf32>
    tpu.vector_store %arg3[%c0_3, %c0_4], %2 {strides = array<i32>} : memref<8x128xf32, #tpu.memory_space<vmem>>, vector<8x128xf32>,
    return
  }
  func.func @transform_0(%arg0: i32) -> (i32, i32) {
    %c0_i32 = arith.constant 0 : i32
    %c0_i32_0 = arith.constant 0 : i32
    return %arg0, %c0_i32 : i32, i32
  }
  func.func @transform_1(%arg0: i32) -> (i32, i32) {
    %c0_i32 = arith.constant 0 : i32
    %c0_i32_0 = arith.constant 0 : i32
    %c0_i32_1 = arith.constant 0 : i32
    return %c0_i32, %c0_i32_0 : i32, i32
  }
  func.func @transform_2(%arg0: i32) -> (i32, i32) {
    %c0_i32 = arith.constant 0 : i32
    %c0_i32_0 = arith.constant 0 : i32
    return %arg0, %c0_i32 : i32, i32
  }
}

module attributes {stable_mosaic.version = 11 : i64} {
  func.func @_lstm_layer_kernel(%arg0: i32, %arg1: i32, %arg2: memref<8x2x128xbf16, #tpu.memory_space<vmem>>, %arg3: memref<128x512xbf16, #tpu.memory_space<vmem>>, %arg4: memref<128x512xbf16, #tpu.memory_space<vmem>>, %arg5: memref<1x512xf32, #tpu.memory_space<vmem>>, %arg6: memref<8x2x128xf32, #tpu.memory_space<vmem>>, %arg7: memref<8x2x512xbf16, #tpu.memory_space<vmem>>, %arg8: memref<2x128xf32, #tpu.memory_space<vmem>>, %arg9: memref<2x128xf32, #tpu.memory_space<vmem>>) attributes {dimension_semantics = [#tpu.dimension_semantics<parallel>, #tpu.dimension_semantics<arbitrary>], iteration_bounds = array<i64: 1, 1>, scalar_prefetch = 0 : i64, scratch_operands = 3 : i64, tpu.core_type = #tpu.core_type<tc>, window_params = [{transform_indices = @transform_0, window_bounds = array<i64: 8, 2, 128>}, {pipeline_mode = #tpu.pipeline_mode<synchronous>, transform_indices = @transform_1, window_bounds = array<i64: 128, 512>}, {pipeline_mode = #tpu.pipeline_mode<synchronous>, transform_indices = @transform_2, window_bounds = array<i64: 128, 512>}, {pipeline_mode = #tpu.pipeline_mode<synchronous>, transform_indices = @transform_3, window_bounds = array<i64: 1, 512>}, {transform_indices = @transform_4, window_bounds = array<i64: 8, 2, 128>}]} {
    %c0_i32 = arith.constant 0 : i32
    %0 = arith.cmpi eq, %arg1, %c0_i32 : i32
    %1 = arith.extui %0 : i1 to i32
    %c0_i32_0 = arith.constant 0 : i32
    %2 = arith.cmpi ne, %1, %c0_i32_0 : i32
    scf.if %2 {
      %cst_175 = arith.constant 0.000000e+00 : f32
      %428 = vector.broadcast %cst_175 : f32 to vector<2x128xf32>
      %c0_176 = arith.constant 0 : index
      %c0_177 = arith.constant 0 : index
      %429 = vector.load %arg8[%c0_176, %c0_177] : memref<2x128xf32, #tpu.memory_space<vmem>>, vector<2x128xf32>
      tpu.vector_store %arg8[%c0_176, %c0_177], %428 {strides = array<i32>} : memref<2x128xf32, #tpu.memory_space<vmem>>, vector<2x128xf32>,
      %cst_178 = arith.constant 0.000000e+00 : f32
      %430 = vector.broadcast %cst_178 : f32 to vector<2x128xf32>
      %c0_179 = arith.constant 0 : index
      %c0_180 = arith.constant 0 : index
      %431 = vector.load %arg9[%c0_179, %c0_180] : memref<2x128xf32, #tpu.memory_space<vmem>>, vector<2x128xf32>
      tpu.vector_store %arg9[%c0_179, %c0_180], %430 {strides = array<i32>} : memref<2x128xf32, #tpu.memory_space<vmem>>, vector<2x128xf32>,
    } else {
    }
    %c0 = arith.constant 0 : index
    %c0_1 = arith.constant 0 : index
    %3 = vector.load %arg3[%c0, %c0_1] : memref<128x512xbf16, #tpu.memory_space<vmem>>, vector<128x512xbf16>
    %c0_2 = arith.constant 0 : index
    %c0_3 = arith.constant 0 : index
    %4 = vector.load %arg5[%c0_2, %c0_3] : memref<1x512xf32, #tpu.memory_space<vmem>>, vector<1x512xf32>
    %5 = vector.shape_cast %4 : vector<1x512xf32> to vector<1x512xf32>
    %6 = vector.broadcast %5 : vector<1x512xf32> to vector<2x512xf32>
    %c0_i32_4 = arith.constant 0 : i32
    %7 = arith.index_cast %c0_i32_4 : i32 to index
    %c0_5 = arith.constant 0 : index
    %c0_6 = arith.constant 0 : index
    %8 = vector.load %arg2[%7, %c0_5, %c0_6] : memref<8x2x128xbf16, #tpu.memory_space<vmem>>, vector<1x2x128xbf16>
    %9 = vector.shape_cast %8 : vector<1x2x128xbf16> to vector<2x128xbf16>
    %cst = arith.constant dense<0.000000e+00> : vector<2x512xf32>
    %10 = tpu.matmul %9, %3, %cst {dimension_numbers = #tpu.dot_dimension_numbers<[1], [0], [0], [1], [0, 0, 1, 1], [], []>} : vector<2x128xbf16>, vector<128x512xbf16>, vector<2x512xf32> -> vector<2x512xf32>
    %11 = arith.addf %10, %6 : vector<2x512xf32>
    %12 = arith.truncf %11 : vector<2x512xf32> to vector<2x512xbf16>
    %13 = arith.index_cast %c0_i32_4 : i32 to index
    %c0_7 = arith.constant 0 : index
    %c0_8 = arith.constant 0 : index
    %14 = vector.load %arg7[%13, %c0_7, %c0_8] : memref<8x2x512xbf16, #tpu.memory_space<vmem>>, vector<1x2x512xbf16>
    %15 = vector.shape_cast %14 : vector<1x2x512xbf16> to vector<2x512xbf16>
    %16 = vector.shape_cast %12 : vector<2x512xbf16> to vector<1x2x512xbf16>
    tpu.vector_store %arg7[%13, %c0_7, %c0_8], %16 {strides = array<i32>} : memref<8x2x512xbf16, #tpu.memory_space<vmem>>, vector<1x2x512xbf16>,
    %c1_i32 = arith.constant 1 : i32
    %17 = arith.index_cast %c1_i32 : i32 to index
    %c0_9 = arith.constant 0 : index
    %c0_10 = arith.constant 0 : index
    %18 = vector.load %arg2[%17, %c0_9, %c0_10] : memref<8x2x128xbf16, #tpu.memory_space<vmem>>, vector<1x2x128xbf16>
    %19 = vector.shape_cast %18 : vector<1x2x128xbf16> to vector<2x128xbf16>
    %cst_11 = arith.constant dense<0.000000e+00> : vector<2x512xf32>
    %20 = tpu.matmul %19, %3, %cst_11 {dimension_numbers = #tpu.dot_dimension_numbers<[1], [0], [0], [1], [0, 0, 1, 1], [], []>} : vector<2x128xbf16>, vector<128x512xbf16>, vector<2x512xf32> -> vector<2x512xf32>
    %21 = arith.addf %20, %6 : vector<2x512xf32>
    %22 = arith.truncf %21 : vector<2x512xf32> to vector<2x512xbf16>
    %23 = arith.index_cast %c1_i32 : i32 to index
    %c0_12 = arith.constant 0 : index
    %c0_13 = arith.constant 0 : index
    %24 = vector.load %arg7[%23, %c0_12, %c0_13] : memref<8x2x512xbf16, #tpu.memory_space<vmem>>, vector<1x2x512xbf16>
    %25 = vector.shape_cast %24 : vector<1x2x512xbf16> to vector<2x512xbf16>
    %26 = vector.shape_cast %22 : vector<2x512xbf16> to vector<1x2x512xbf16>
    tpu.vector_store %arg7[%23, %c0_12, %c0_13], %26 {strides = array<i32>} : memref<8x2x512xbf16, #tpu.memory_space<vmem>>, vector<1x2x512xbf16>,
    %c2_i32 = arith.constant 2 : i32
    %27 = arith.index_cast %c2_i32 : i32 to index
    %c0_14 = arith.constant 0 : index
    %c0_15 = arith.constant 0 : index
    %28 = vector.load %arg2[%27, %c0_14, %c0_15] : memref<8x2x128xbf16, #tpu.memory_space<vmem>>, vector<1x2x128xbf16>
    %29 = vector.shape_cast %28 : vector<1x2x128xbf16> to vector<2x128xbf16>
    %cst_16 = arith.constant dense<0.000000e+00> : vector<2x512xf32>
    %30 = tpu.matmul %29, %3, %cst_16 {dimension_numbers = #tpu.dot_dimension_numbers<[1], [0], [0], [1], [0, 0, 1, 1], [], []>} : vector<2x128xbf16>, vector<128x512xbf16>, vector<2x512xf32> -> vector<2x512xf32>
    %31 = arith.addf %30, %6 : vector<2x512xf32>
    %32 = arith.truncf %31 : vector<2x512xf32> to vector<2x512xbf16>
    %33 = arith.index_cast %c2_i32 : i32 to index
    %c0_17 = arith.constant 0 : index
    %c0_18 = arith.constant 0 : index
    %34 = vector.load %arg7[%33, %c0_17, %c0_18] : memref<8x2x512xbf16, #tpu.memory_space<vmem>>, vector<1x2x512xbf16>
    %35 = vector.shape_cast %34 : vector<1x2x512xbf16> to vector<2x512xbf16>
    %36 = vector.shape_cast %32 : vector<2x512xbf16> to vector<1x2x512xbf16>
    tpu.vector_store %arg7[%33, %c0_17, %c0_18], %36 {strides = array<i32>} : memref<8x2x512xbf16, #tpu.memory_space<vmem>>, vector<1x2x512xbf16>,
    %c3_i32 = arith.constant 3 : i32
    %37 = arith.index_cast %c3_i32 : i32 to index
    %c0_19 = arith.constant 0 : index
    %c0_20 = arith.constant 0 : index
    %38 = vector.load %arg2[%37, %c0_19, %c0_20] : memref<8x2x128xbf16, #tpu.memory_space<vmem>>, vector<1x2x128xbf16>
    %39 = vector.shape_cast %38 : vector<1x2x128xbf16> to vector<2x128xbf16>
    %cst_21 = arith.constant dense<0.000000e+00> : vector<2x512xf32>
    %40 = tpu.matmul %39, %3, %cst_21 {dimension_numbers = #tpu.dot_dimension_numbers<[1], [0], [0], [1], [0, 0, 1, 1], [], []>} : vector<2x128xbf16>, vector<128x512xbf16>, vector<2x512xf32> -> vector<2x512xf32>
    %41 = arith.addf %40, %6 : vector<2x512xf32>
    %42 = arith.truncf %41 : vector<2x512xf32> to vector<2x512xbf16>
    %43 = arith.index_cast %c3_i32 : i32 to index
    %c0_22 = arith.constant 0 : index
    %c0_23 = arith.constant 0 : index
    %44 = vector.load %arg7[%43, %c0_22, %c0_23] : memref<8x2x512xbf16, #tpu.memory_space<vmem>>, vector<1x2x512xbf16>
    %45 = vector.shape_cast %44 : vector<1x2x512xbf16> to vector<2x512xbf16>
    %46 = vector.shape_cast %42 : vector<2x512xbf16> to vector<1x2x512xbf16>
    tpu.vector_store %arg7[%43, %c0_22, %c0_23], %46 {strides = array<i32>} : memref<8x2x512xbf16, #tpu.memory_space<vmem>>, vector<1x2x512xbf16>,
    %c4_i32 = arith.constant 4 : i32
    %47 = arith.index_cast %c4_i32 : i32 to index
    %c0_24 = arith.constant 0 : index
    %c0_25 = arith.constant 0 : index
    %48 = vector.load %arg2[%47, %c0_24, %c0_25] : memref<8x2x128xbf16, #tpu.memory_space<vmem>>, vector<1x2x128xbf16>
    %49 = vector.shape_cast %48 : vector<1x2x128xbf16> to vector<2x128xbf16>
    %cst_26 = arith.constant dense<0.000000e+00> : vector<2x512xf32>
    %50 = tpu.matmul %49, %3, %cst_26 {dimension_numbers = #tpu.dot_dimension_numbers<[1], [0], [0], [1], [0, 0, 1, 1], [], []>} : vector<2x128xbf16>, vector<128x512xbf16>, vector<2x512xf32> -> vector<2x512xf32>
    %51 = arith.addf %50, %6 : vector<2x512xf32>
    %52 = arith.truncf %51 : vector<2x512xf32> to vector<2x512xbf16>
    %53 = arith.index_cast %c4_i32 : i32 to index
    %c0_27 = arith.constant 0 : index
    %c0_28 = arith.constant 0 : index
    %54 = vector.load %arg7[%53, %c0_27, %c0_28] : memref<8x2x512xbf16, #tpu.memory_space<vmem>>, vector<1x2x512xbf16>
    %55 = vector.shape_cast %54 : vector<1x2x512xbf16> to vector<2x512xbf16>
    %56 = vector.shape_cast %52 : vector<2x512xbf16> to vector<1x2x512xbf16>
    tpu.vector_store %arg7[%53, %c0_27, %c0_28], %56 {strides = array<i32>} : memref<8x2x512xbf16, #tpu.memory_space<vmem>>, vector<1x2x512xbf16>,
    %c5_i32 = arith.constant 5 : i32
    %57 = arith.index_cast %c5_i32 : i32 to index
    %c0_29 = arith.constant 0 : index
    %c0_30 = arith.constant 0 : index
    %58 = vector.load %arg2[%57, %c0_29, %c0_30] : memref<8x2x128xbf16, #tpu.memory_space<vmem>>, vector<1x2x128xbf16>
    %59 = vector.shape_cast %58 : vector<1x2x128xbf16> to vector<2x128xbf16>
    %cst_31 = arith.constant dense<0.000000e+00> : vector<2x512xf32>
    %60 = tpu.matmul %59, %3, %cst_31 {dimension_numbers = #tpu.dot_dimension_numbers<[1], [0], [0], [1], [0, 0, 1, 1], [], []>} : vector<2x128xbf16>, vector<128x512xbf16>, vector<2x512xf32> -> vector<2x512xf32>
    %61 = arith.addf %60, %6 : vector<2x512xf32>
    %62 = arith.truncf %61 : vector<2x512xf32> to vector<2x512xbf16>
    %63 = arith.index_cast %c5_i32 : i32 to index
    %c0_32 = arith.constant 0 : index
    %c0_33 = arith.constant 0 : index
    %64 = vector.load %arg7[%63, %c0_32, %c0_33] : memref<8x2x512xbf16, #tpu.memory_space<vmem>>, vector<1x2x512xbf16>
    %65 = vector.shape_cast %64 : vector<1x2x512xbf16> to vector<2x512xbf16>
    %66 = vector.shape_cast %62 : vector<2x512xbf16> to vector<1x2x512xbf16>
    tpu.vector_store %arg7[%63, %c0_32, %c0_33], %66 {strides = array<i32>} : memref<8x2x512xbf16, #tpu.memory_space<vmem>>, vector<1x2x512xbf16>,
    %c6_i32 = arith.constant 6 : i32
    %67 = arith.index_cast %c6_i32 : i32 to index
    %c0_34 = arith.constant 0 : index
    %c0_35 = arith.constant 0 : index
    %68 = vector.load %arg2[%67, %c0_34, %c0_35] : memref<8x2x128xbf16, #tpu.memory_space<vmem>>, vector<1x2x128xbf16>
    %69 = vector.shape_cast %68 : vector<1x2x128xbf16> to vector<2x128xbf16>
    %cst_36 = arith.constant dense<0.000000e+00> : vector<2x512xf32>
    %70 = tpu.matmul %69, %3, %cst_36 {dimension_numbers = #tpu.dot_dimension_numbers<[1], [0], [0], [1], [0, 0, 1, 1], [], []>} : vector<2x128xbf16>, vector<128x512xbf16>, vector<2x512xf32> -> vector<2x512xf32>
    %71 = arith.addf %70, %6 : vector<2x512xf32>
    %72 = arith.truncf %71 : vector<2x512xf32> to vector<2x512xbf16>
    %73 = arith.index_cast %c6_i32 : i32 to index
    %c0_37 = arith.constant 0 : index
    %c0_38 = arith.constant 0 : index
    %74 = vector.load %arg7[%73, %c0_37, %c0_38] : memref<8x2x512xbf16, #tpu.memory_space<vmem>>, vector<1x2x512xbf16>
    %75 = vector.shape_cast %74 : vector<1x2x512xbf16> to vector<2x512xbf16>
    %76 = vector.shape_cast %72 : vector<2x512xbf16> to vector<1x2x512xbf16>
    tpu.vector_store %arg7[%73, %c0_37, %c0_38], %76 {strides = array<i32>} : memref<8x2x512xbf16, #tpu.memory_space<vmem>>, vector<1x2x512xbf16>,
    %c7_i32 = arith.constant 7 : i32
    %77 = arith.index_cast %c7_i32 : i32 to index
    %c0_39 = arith.constant 0 : index
    %c0_40 = arith.constant 0 : index
    %78 = vector.load %arg2[%77, %c0_39, %c0_40] : memref<8x2x128xbf16, #tpu.memory_space<vmem>>, vector<1x2x128xbf16>
    %79 = vector.shape_cast %78 : vector<1x2x128xbf16> to vector<2x128xbf16>
    %cst_41 = arith.constant dense<0.000000e+00> : vector<2x512xf32>
    %80 = tpu.matmul %79, %3, %cst_41 {dimension_numbers = #tpu.dot_dimension_numbers<[1], [0], [0], [1], [0, 0, 1, 1], [], []>} : vector<2x128xbf16>, vector<128x512xbf16>, vector<2x512xf32> -> vector<2x512xf32>
    %81 = arith.addf %80, %6 : vector<2x512xf32>
    %82 = arith.truncf %81 : vector<2x512xf32> to vector<2x512xbf16>
    %83 = arith.index_cast %c7_i32 : i32 to index
    %c0_42 = arith.constant 0 : index
    %c0_43 = arith.constant 0 : index
    %84 = vector.load %arg7[%83, %c0_42, %c0_43] : memref<8x2x512xbf16, #tpu.memory_space<vmem>>, vector<1x2x512xbf16>
    %85 = vector.shape_cast %84 : vector<1x2x512xbf16> to vector<2x512xbf16>
    %86 = vector.shape_cast %82 : vector<2x512xbf16> to vector<1x2x512xbf16>
    tpu.vector_store %arg7[%83, %c0_42, %c0_43], %86 {strides = array<i32>} : memref<8x2x512xbf16, #tpu.memory_space<vmem>>, vector<1x2x512xbf16>,
    %c8_i32 = arith.constant 8 : i32
    %c0_44 = arith.constant 0 : index
    %c0_45 = arith.constant 0 : index
    %87 = vector.load %arg4[%c0_44, %c0_45] : memref<128x512xbf16, #tpu.memory_space<vmem>>, vector<128x512xbf16>
    %c0_46 = arith.constant 0 : index
    %c0_47 = arith.constant 0 : index
    %88 = vector.load %arg8[%c0_46, %c0_47] : memref<2x128xf32, #tpu.memory_space<vmem>>, vector<2x128xf32>
    %c0_48 = arith.constant 0 : index
    %c0_49 = arith.constant 0 : index
    %89 = vector.load %arg9[%c0_48, %c0_49] : memref<2x128xf32, #tpu.memory_space<vmem>>, vector<2x128xf32>
    %c0_i32_50 = arith.constant 0 : i32
    %90 = arith.index_cast %c0_i32_50 : i32 to index
    %c0_51 = arith.constant 0 : index
    %c0_52 = arith.constant 0 : index
    %91 = vector.load %arg7[%90, %c0_51, %c0_52] : memref<8x2x512xbf16, #tpu.memory_space<vmem>>, vector<1x2x512xbf16>
    %92 = vector.shape_cast %91 : vector<1x2x512xbf16> to vector<2x512xbf16>
    %93 = arith.extf %92 : vector<2x512xbf16> to vector<2x512xf32>
    %94 = arith.truncf %88 : vector<2x128xf32> to vector<2x128xbf16>
    %cst_53 = arith.constant dense<0.000000e+00> : vector<2x512xf32>
    %95 = tpu.matmul %94, %87, %cst_53 {dimension_numbers = #tpu.dot_dimension_numbers<[1], [0], [0], [1], [0, 0, 1, 1], [], []>} : vector<2x128xbf16>, vector<128x512xbf16>, vector<2x512xf32> -> vector<2x512xf32>
    %96 = arith.addf %93, %95 : vector<2x512xf32>
    %97 = vector.extract_strided_slice %96 {offsets = [0, 0], sizes = [2, 128], strides = [1, 1]} : vector<2x512xf32> to vector<2x128xf32>
    %cst_54 = arith.constant 5.000000e-01 : f32
    %98 = vector.broadcast %cst_54 : f32 to vector<2x128xf32>
    %99 = arith.mulf %98, %97 : vector<2x128xf32>
    %100 = math.tanh %99 : vector<2x128xf32>
    %cst_55 = arith.constant 1.000000e+00 : f32
    %101 = vector.broadcast %cst_55 : f32 to vector<2x128xf32>
    %102 = arith.addf %100, %101 : vector<2x128xf32>
    %cst_56 = arith.constant 5.000000e-01 : f32
    %103 = vector.broadcast %cst_56 : f32 to vector<2x128xf32>
    %104 = arith.mulf %103, %102 : vector<2x128xf32>
    %105 = vector.extract_strided_slice %96 {offsets = [0, 128], sizes = [2, 128], strides = [1, 1]} : vector<2x512xf32> to vector<2x128xf32>
    %cst_57 = arith.constant 5.000000e-01 : f32
    %106 = vector.broadcast %cst_57 : f32 to vector<2x128xf32>
    %107 = arith.mulf %106, %105 : vector<2x128xf32>
    %108 = math.tanh %107 : vector<2x128xf32>
    %cst_58 = arith.constant 1.000000e+00 : f32
    %109 = vector.broadcast %cst_58 : f32 to vector<2x128xf32>
    %110 = arith.addf %108, %109 : vector<2x128xf32>
    %cst_59 = arith.constant 5.000000e-01 : f32
    %111 = vector.broadcast %cst_59 : f32 to vector<2x128xf32>
    %112 = arith.mulf %111, %110 : vector<2x128xf32>
    %113 = vector.extract_strided_slice %96 {offsets = [0, 256], sizes = [2, 128], strides = [1, 1]} : vector<2x512xf32> to vector<2x128xf32>
    %114 = math.tanh %113 : vector<2x128xf32>
    %115 = vector.extract_strided_slice %96 {offsets = [0, 384], sizes = [2, 128], strides = [1, 1]} : vector<2x512xf32> to vector<2x128xf32>
    %cst_60 = arith.constant 5.000000e-01 : f32
    %116 = vector.broadcast %cst_60 : f32 to vector<2x128xf32>
    %117 = arith.mulf %116, %115 : vector<2x128xf32>
    %118 = math.tanh %117 : vector<2x128xf32>
    %cst_61 = arith.constant 1.000000e+00 : f32
    %119 = vector.broadcast %cst_61 : f32 to vector<2x128xf32>
    %120 = arith.addf %118, %119 : vector<2x128xf32>
    %cst_62 = arith.constant 5.000000e-01 : f32
    %121 = vector.broadcast %cst_62 : f32 to vector<2x128xf32>
    %122 = arith.mulf %121, %120 : vector<2x128xf32>
    %123 = arith.mulf %112, %89 : vector<2x128xf32>
    %124 = arith.mulf %104, %114 : vector<2x128xf32>
    %125 = arith.addf %123, %124 : vector<2x128xf32>
    %126 = math.tanh %125 : vector<2x128xf32>
    %127 = arith.mulf %122, %126 : vector<2x128xf32>
    %128 = arith.index_cast %c0_i32_50 : i32 to index
    %c0_63 = arith.constant 0 : index
    %c0_64 = arith.constant 0 : index
    %129 = vector.load %arg6[%128, %c0_63, %c0_64] : memref<8x2x128xf32, #tpu.memory_space<vmem>>, vector<1x2x128xf32>
    %130 = vector.shape_cast %129 : vector<1x2x128xf32> to vector<2x128xf32>
    %131 = vector.shape_cast %127 : vector<2x128xf32> to vector<1x2x128xf32>
    tpu.vector_store %arg6[%128, %c0_63, %c0_64], %131 {strides = array<i32>} : memref<8x2x128xf32, #tpu.memory_space<vmem>>, vector<1x2x128xf32>,
    %c1_i32_65 = arith.constant 1 : i32
    %132 = arith.index_cast %c1_i32_65 : i32 to index
    %c0_66 = arith.constant 0 : index
    %c0_67 = arith.constant 0 : index
    %133 = vector.load %arg7[%132, %c0_66, %c0_67] : memref<8x2x512xbf16, #tpu.memory_space<vmem>>, vector<1x2x512xbf16>
    %134 = vector.shape_cast %133 : vector<1x2x512xbf16> to vector<2x512xbf16>
    %135 = arith.extf %134 : vector<2x512xbf16> to vector<2x512xf32>
    %136 = arith.truncf %127 : vector<2x128xf32> to vector<2x128xbf16>
    %cst_68 = arith.constant dense<0.000000e+00> : vector<2x512xf32>
    %137 = tpu.matmul %136, %87, %cst_68 {dimension_numbers = #tpu.dot_dimension_numbers<[1], [0], [0], [1], [0, 0, 1, 1], [], []>} : vector<2x128xbf16>, vector<128x512xbf16>, vector<2x512xf32> -> vector<2x512xf32>
    %138 = arith.addf %135, %137 : vector<2x512xf32>
    %139 = vector.extract_strided_slice %138 {offsets = [0, 0], sizes = [2, 128], strides = [1, 1]} : vector<2x512xf32> to vector<2x128xf32>
    %cst_69 = arith.constant 5.000000e-01 : f32
    %140 = vector.broadcast %cst_69 : f32 to vector<2x128xf32>
    %141 = arith.mulf %140, %139 : vector<2x128xf32>
    %142 = math.tanh %141 : vector<2x128xf32>
    %cst_70 = arith.constant 1.000000e+00 : f32
    %143 = vector.broadcast %cst_70 : f32 to vector<2x128xf32>
    %144 = arith.addf %142, %143 : vector<2x128xf32>
    %cst_71 = arith.constant 5.000000e-01 : f32
    %145 = vector.broadcast %cst_71 : f32 to vector<2x128xf32>
    %146 = arith.mulf %145, %144 : vector<2x128xf32>
    %147 = vector.extract_strided_slice %138 {offsets = [0, 128], sizes = [2, 128], strides = [1, 1]} : vector<2x512xf32> to vector<2x128xf32>
    %cst_72 = arith.constant 5.000000e-01 : f32
    %148 = vector.broadcast %cst_72 : f32 to vector<2x128xf32>
    %149 = arith.mulf %148, %147 : vector<2x128xf32>
    %150 = math.tanh %149 : vector<2x128xf32>
    %cst_73 = arith.constant 1.000000e+00 : f32
    %151 = vector.broadcast %cst_73 : f32 to vector<2x128xf32>
    %152 = arith.addf %150, %151 : vector<2x128xf32>
    %cst_74 = arith.constant 5.000000e-01 : f32
    %153 = vector.broadcast %cst_74 : f32 to vector<2x128xf32>
    %154 = arith.mulf %153, %152 : vector<2x128xf32>
    %155 = vector.extract_strided_slice %138 {offsets = [0, 256], sizes = [2, 128], strides = [1, 1]} : vector<2x512xf32> to vector<2x128xf32>
    %156 = math.tanh %155 : vector<2x128xf32>
    %157 = vector.extract_strided_slice %138 {offsets = [0, 384], sizes = [2, 128], strides = [1, 1]} : vector<2x512xf32> to vector<2x128xf32>
    %cst_75 = arith.constant 5.000000e-01 : f32
    %158 = vector.broadcast %cst_75 : f32 to vector<2x128xf32>
    %159 = arith.mulf %158, %157 : vector<2x128xf32>
    %160 = math.tanh %159 : vector<2x128xf32>
    %cst_76 = arith.constant 1.000000e+00 : f32
    %161 = vector.broadcast %cst_76 : f32 to vector<2x128xf32>
    %162 = arith.addf %160, %161 : vector<2x128xf32>
    %cst_77 = arith.constant 5.000000e-01 : f32
    %163 = vector.broadcast %cst_77 : f32 to vector<2x128xf32>
    %164 = arith.mulf %163, %162 : vector<2x128xf32>
    %165 = arith.mulf %154, %125 : vector<2x128xf32>
    %166 = arith.mulf %146, %156 : vector<2x128xf32>
    %167 = arith.addf %165, %166 : vector<2x128xf32>
    %168 = math.tanh %167 : vector<2x128xf32>
    %169 = arith.mulf %164, %168 : vector<2x128xf32>
    %170 = arith.index_cast %c1_i32_65 : i32 to index
    %c0_78 = arith.constant 0 : index
    %c0_79 = arith.constant 0 : index
    %171 = vector.load %arg6[%170, %c0_78, %c0_79] : memref<8x2x128xf32, #tpu.memory_space<vmem>>, vector<1x2x128xf32>
    %172 = vector.shape_cast %171 : vector<1x2x128xf32> to vector<2x128xf32>
    %173 = vector.shape_cast %169 : vector<2x128xf32> to vector<1x2x128xf32>
    tpu.vector_store %arg6[%170, %c0_78, %c0_79], %173 {strides = array<i32>} : memref<8x2x128xf32, #tpu.memory_space<vmem>>, vector<1x2x128xf32>,
    %c2_i32_80 = arith.constant 2 : i32
    %174 = arith.index_cast %c2_i32_80 : i32 to index
    %c0_81 = arith.constant 0 : index
    %c0_82 = arith.constant 0 : index
    %175 = vector.load %arg7[%174, %c0_81, %c0_82] : memref<8x2x512xbf16, #tpu.memory_space<vmem>>, vector<1x2x512xbf16>
    %176 = vector.shape_cast %175 : vector<1x2x512xbf16> to vector<2x512xbf16>
    %177 = arith.extf %176 : vector<2x512xbf16> to vector<2x512xf32>
    %178 = arith.truncf %169 : vector<2x128xf32> to vector<2x128xbf16>
    %cst_83 = arith.constant dense<0.000000e+00> : vector<2x512xf32>
    %179 = tpu.matmul %178, %87, %cst_83 {dimension_numbers = #tpu.dot_dimension_numbers<[1], [0], [0], [1], [0, 0, 1, 1], [], []>} : vector<2x128xbf16>, vector<128x512xbf16>, vector<2x512xf32> -> vector<2x512xf32>
    %180 = arith.addf %177, %179 : vector<2x512xf32>
    %181 = vector.extract_strided_slice %180 {offsets = [0, 0], sizes = [2, 128], strides = [1, 1]} : vector<2x512xf32> to vector<2x128xf32>
    %cst_84 = arith.constant 5.000000e-01 : f32
    %182 = vector.broadcast %cst_84 : f32 to vector<2x128xf32>
    %183 = arith.mulf %182, %181 : vector<2x128xf32>
    %184 = math.tanh %183 : vector<2x128xf32>
    %cst_85 = arith.constant 1.000000e+00 : f32
    %185 = vector.broadcast %cst_85 : f32 to vector<2x128xf32>
    %186 = arith.addf %184, %185 : vector<2x128xf32>
    %cst_86 = arith.constant 5.000000e-01 : f32
    %187 = vector.broadcast %cst_86 : f32 to vector<2x128xf32>
    %188 = arith.mulf %187, %186 : vector<2x128xf32>
    %189 = vector.extract_strided_slice %180 {offsets = [0, 128], sizes = [2, 128], strides = [1, 1]} : vector<2x512xf32> to vector<2x128xf32>
    %cst_87 = arith.constant 5.000000e-01 : f32
    %190 = vector.broadcast %cst_87 : f32 to vector<2x128xf32>
    %191 = arith.mulf %190, %189 : vector<2x128xf32>
    %192 = math.tanh %191 : vector<2x128xf32>
    %cst_88 = arith.constant 1.000000e+00 : f32
    %193 = vector.broadcast %cst_88 : f32 to vector<2x128xf32>
    %194 = arith.addf %192, %193 : vector<2x128xf32>
    %cst_89 = arith.constant 5.000000e-01 : f32
    %195 = vector.broadcast %cst_89 : f32 to vector<2x128xf32>
    %196 = arith.mulf %195, %194 : vector<2x128xf32>
    %197 = vector.extract_strided_slice %180 {offsets = [0, 256], sizes = [2, 128], strides = [1, 1]} : vector<2x512xf32> to vector<2x128xf32>
    %198 = math.tanh %197 : vector<2x128xf32>
    %199 = vector.extract_strided_slice %180 {offsets = [0, 384], sizes = [2, 128], strides = [1, 1]} : vector<2x512xf32> to vector<2x128xf32>
    %cst_90 = arith.constant 5.000000e-01 : f32
    %200 = vector.broadcast %cst_90 : f32 to vector<2x128xf32>
    %201 = arith.mulf %200, %199 : vector<2x128xf32>
    %202 = math.tanh %201 : vector<2x128xf32>
    %cst_91 = arith.constant 1.000000e+00 : f32
    %203 = vector.broadcast %cst_91 : f32 to vector<2x128xf32>
    %204 = arith.addf %202, %203 : vector<2x128xf32>
    %cst_92 = arith.constant 5.000000e-01 : f32
    %205 = vector.broadcast %cst_92 : f32 to vector<2x128xf32>
    %206 = arith.mulf %205, %204 : vector<2x128xf32>
    %207 = arith.mulf %196, %167 : vector<2x128xf32>
    %208 = arith.mulf %188, %198 : vector<2x128xf32>
    %209 = arith.addf %207, %208 : vector<2x128xf32>
    %210 = math.tanh %209 : vector<2x128xf32>
    %211 = arith.mulf %206, %210 : vector<2x128xf32>
    %212 = arith.index_cast %c2_i32_80 : i32 to index
    %c0_93 = arith.constant 0 : index
    %c0_94 = arith.constant 0 : index
    %213 = vector.load %arg6[%212, %c0_93, %c0_94] : memref<8x2x128xf32, #tpu.memory_space<vmem>>, vector<1x2x128xf32>
    %214 = vector.shape_cast %213 : vector<1x2x128xf32> to vector<2x128xf32>
    %215 = vector.shape_cast %211 : vector<2x128xf32> to vector<1x2x128xf32>
    tpu.vector_store %arg6[%212, %c0_93, %c0_94], %215 {strides = array<i32>} : memref<8x2x128xf32, #tpu.memory_space<vmem>>, vector<1x2x128xf32>,
    %c3_i32_95 = arith.constant 3 : i32
    %216 = arith.index_cast %c3_i32_95 : i32 to index
    %c0_96 = arith.constant 0 : index
    %c0_97 = arith.constant 0 : index
    %217 = vector.load %arg7[%216, %c0_96, %c0_97] : memref<8x2x512xbf16, #tpu.memory_space<vmem>>, vector<1x2x512xbf16>
    %218 = vector.shape_cast %217 : vector<1x2x512xbf16> to vector<2x512xbf16>
    %219 = arith.extf %218 : vector<2x512xbf16> to vector<2x512xf32>
    %220 = arith.truncf %211 : vector<2x128xf32> to vector<2x128xbf16>
    %cst_98 = arith.constant dense<0.000000e+00> : vector<2x512xf32>
    %221 = tpu.matmul %220, %87, %cst_98 {dimension_numbers = #tpu.dot_dimension_numbers<[1], [0], [0], [1], [0, 0, 1, 1], [], []>} : vector<2x128xbf16>, vector<128x512xbf16>, vector<2x512xf32> -> vector<2x512xf32>
    %222 = arith.addf %219, %221 : vector<2x512xf32>
    %223 = vector.extract_strided_slice %222 {offsets = [0, 0], sizes = [2, 128], strides = [1, 1]} : vector<2x512xf32> to vector<2x128xf32>
    %cst_99 = arith.constant 5.000000e-01 : f32
    %224 = vector.broadcast %cst_99 : f32 to vector<2x128xf32>
    %225 = arith.mulf %224, %223 : vector<2x128xf32>
    %226 = math.tanh %225 : vector<2x128xf32>
    %cst_100 = arith.constant 1.000000e+00 : f32
    %227 = vector.broadcast %cst_100 : f32 to vector<2x128xf32>
    %228 = arith.addf %226, %227 : vector<2x128xf32>
    %cst_101 = arith.constant 5.000000e-01 : f32
    %229 = vector.broadcast %cst_101 : f32 to vector<2x128xf32>
    %230 = arith.mulf %229, %228 : vector<2x128xf32>
    %231 = vector.extract_strided_slice %222 {offsets = [0, 128], sizes = [2, 128], strides = [1, 1]} : vector<2x512xf32> to vector<2x128xf32>
    %cst_102 = arith.constant 5.000000e-01 : f32
    %232 = vector.broadcast %cst_102 : f32 to vector<2x128xf32>
    %233 = arith.mulf %232, %231 : vector<2x128xf32>
    %234 = math.tanh %233 : vector<2x128xf32>
    %cst_103 = arith.constant 1.000000e+00 : f32
    %235 = vector.broadcast %cst_103 : f32 to vector<2x128xf32>
    %236 = arith.addf %234, %235 : vector<2x128xf32>
    %cst_104 = arith.constant 5.000000e-01 : f32
    %237 = vector.broadcast %cst_104 : f32 to vector<2x128xf32>
    %238 = arith.mulf %237, %236 : vector<2x128xf32>
    %239 = vector.extract_strided_slice %222 {offsets = [0, 256], sizes = [2, 128], strides = [1, 1]} : vector<2x512xf32> to vector<2x128xf32>
    %240 = math.tanh %239 : vector<2x128xf32>
    %241 = vector.extract_strided_slice %222 {offsets = [0, 384], sizes = [2, 128], strides = [1, 1]} : vector<2x512xf32> to vector<2x128xf32>
    %cst_105 = arith.constant 5.000000e-01 : f32
    %242 = vector.broadcast %cst_105 : f32 to vector<2x128xf32>
    %243 = arith.mulf %242, %241 : vector<2x128xf32>
    %244 = math.tanh %243 : vector<2x128xf32>
    %cst_106 = arith.constant 1.000000e+00 : f32
    %245 = vector.broadcast %cst_106 : f32 to vector<2x128xf32>
    %246 = arith.addf %244, %245 : vector<2x128xf32>
    %cst_107 = arith.constant 5.000000e-01 : f32
    %247 = vector.broadcast %cst_107 : f32 to vector<2x128xf32>
    %248 = arith.mulf %247, %246 : vector<2x128xf32>
    %249 = arith.mulf %238, %209 : vector<2x128xf32>
    %250 = arith.mulf %230, %240 : vector<2x128xf32>
    %251 = arith.addf %249, %250 : vector<2x128xf32>
    %252 = math.tanh %251 : vector<2x128xf32>
    %253 = arith.mulf %248, %252 : vector<2x128xf32>
    %254 = arith.index_cast %c3_i32_95 : i32 to index
    %c0_108 = arith.constant 0 : index
    %c0_109 = arith.constant 0 : index
    %255 = vector.load %arg6[%254, %c0_108, %c0_109] : memref<8x2x128xf32, #tpu.memory_space<vmem>>, vector<1x2x128xf32>
    %256 = vector.shape_cast %255 : vector<1x2x128xf32> to vector<2x128xf32>
    %257 = vector.shape_cast %253 : vector<2x128xf32> to vector<1x2x128xf32>
    tpu.vector_store %arg6[%254, %c0_108, %c0_109], %257 {strides = array<i32>} : memref<8x2x128xf32, #tpu.memory_space<vmem>>, vector<1x2x128xf32>,
    %c4_i32_110 = arith.constant 4 : i32
    %258 = arith.index_cast %c4_i32_110 : i32 to index
    %c0_111 = arith.constant 0 : index
    %c0_112 = arith.constant 0 : index
    %259 = vector.load %arg7[%258, %c0_111, %c0_112] : memref<8x2x512xbf16, #tpu.memory_space<vmem>>, vector<1x2x512xbf16>
    %260 = vector.shape_cast %259 : vector<1x2x512xbf16> to vector<2x512xbf16>
    %261 = arith.extf %260 : vector<2x512xbf16> to vector<2x512xf32>
    %262 = arith.truncf %253 : vector<2x128xf32> to vector<2x128xbf16>
    %cst_113 = arith.constant dense<0.000000e+00> : vector<2x512xf32>
    %263 = tpu.matmul %262, %87, %cst_113 {dimension_numbers = #tpu.dot_dimension_numbers<[1], [0], [0], [1], [0, 0, 1, 1], [], []>} : vector<2x128xbf16>, vector<128x512xbf16>, vector<2x512xf32> -> vector<2x512xf32>
    %264 = arith.addf %261, %263 : vector<2x512xf32>
    %265 = vector.extract_strided_slice %264 {offsets = [0, 0], sizes = [2, 128], strides = [1, 1]} : vector<2x512xf32> to vector<2x128xf32>
    %cst_114 = arith.constant 5.000000e-01 : f32
    %266 = vector.broadcast %cst_114 : f32 to vector<2x128xf32>
    %267 = arith.mulf %266, %265 : vector<2x128xf32>
    %268 = math.tanh %267 : vector<2x128xf32>
    %cst_115 = arith.constant 1.000000e+00 : f32
    %269 = vector.broadcast %cst_115 : f32 to vector<2x128xf32>
    %270 = arith.addf %268, %269 : vector<2x128xf32>
    %cst_116 = arith.constant 5.000000e-01 : f32
    %271 = vector.broadcast %cst_116 : f32 to vector<2x128xf32>
    %272 = arith.mulf %271, %270 : vector<2x128xf32>
    %273 = vector.extract_strided_slice %264 {offsets = [0, 128], sizes = [2, 128], strides = [1, 1]} : vector<2x512xf32> to vector<2x128xf32>
    %cst_117 = arith.constant 5.000000e-01 : f32
    %274 = vector.broadcast %cst_117 : f32 to vector<2x128xf32>
    %275 = arith.mulf %274, %273 : vector<2x128xf32>
    %276 = math.tanh %275 : vector<2x128xf32>
    %cst_118 = arith.constant 1.000000e+00 : f32
    %277 = vector.broadcast %cst_118 : f32 to vector<2x128xf32>
    %278 = arith.addf %276, %277 : vector<2x128xf32>
    %cst_119 = arith.constant 5.000000e-01 : f32
    %279 = vector.broadcast %cst_119 : f32 to vector<2x128xf32>
    %280 = arith.mulf %279, %278 : vector<2x128xf32>
    %281 = vector.extract_strided_slice %264 {offsets = [0, 256], sizes = [2, 128], strides = [1, 1]} : vector<2x512xf32> to vector<2x128xf32>
    %282 = math.tanh %281 : vector<2x128xf32>
    %283 = vector.extract_strided_slice %264 {offsets = [0, 384], sizes = [2, 128], strides = [1, 1]} : vector<2x512xf32> to vector<2x128xf32>
    %cst_120 = arith.constant 5.000000e-01 : f32
    %284 = vector.broadcast %cst_120 : f32 to vector<2x128xf32>
    %285 = arith.mulf %284, %283 : vector<2x128xf32>
    %286 = math.tanh %285 : vector<2x128xf32>
    %cst_121 = arith.constant 1.000000e+00 : f32
    %287 = vector.broadcast %cst_121 : f32 to vector<2x128xf32>
    %288 = arith.addf %286, %287 : vector<2x128xf32>
    %cst_122 = arith.constant 5.000000e-01 : f32
    %289 = vector.broadcast %cst_122 : f32 to vector<2x128xf32>
    %290 = arith.mulf %289, %288 : vector<2x128xf32>
    %291 = arith.mulf %280, %251 : vector<2x128xf32>
    %292 = arith.mulf %272, %282 : vector<2x128xf32>
    %293 = arith.addf %291, %292 : vector<2x128xf32>
    %294 = math.tanh %293 : vector<2x128xf32>
    %295 = arith.mulf %290, %294 : vector<2x128xf32>
    %296 = arith.index_cast %c4_i32_110 : i32 to index
    %c0_123 = arith.constant 0 : index
    %c0_124 = arith.constant 0 : index
    %297 = vector.load %arg6[%296, %c0_123, %c0_124] : memref<8x2x128xf32, #tpu.memory_space<vmem>>, vector<1x2x128xf32>
    %298 = vector.shape_cast %297 : vector<1x2x128xf32> to vector<2x128xf32>
    %299 = vector.shape_cast %295 : vector<2x128xf32> to vector<1x2x128xf32>
    tpu.vector_store %arg6[%296, %c0_123, %c0_124], %299 {strides = array<i32>} : memref<8x2x128xf32, #tpu.memory_space<vmem>>, vector<1x2x128xf32>,
    %c5_i32_125 = arith.constant 5 : i32
    %300 = arith.index_cast %c5_i32_125 : i32 to index
    %c0_126 = arith.constant 0 : index
    %c0_127 = arith.constant 0 : index
    %301 = vector.load %arg7[%300, %c0_126, %c0_127] : memref<8x2x512xbf16, #tpu.memory_space<vmem>>, vector<1x2x512xbf16>
    %302 = vector.shape_cast %301 : vector<1x2x512xbf16> to vector<2x512xbf16>
    %303 = arith.extf %302 : vector<2x512xbf16> to vector<2x512xf32>
    %304 = arith.truncf %295 : vector<2x128xf32> to vector<2x128xbf16>
    %cst_128 = arith.constant dense<0.000000e+00> : vector<2x512xf32>
    %305 = tpu.matmul %304, %87, %cst_128 {dimension_numbers = #tpu.dot_dimension_numbers<[1], [0], [0], [1], [0, 0, 1, 1], [], []>} : vector<2x128xbf16>, vector<128x512xbf16>, vector<2x512xf32> -> vector<2x512xf32>
    %306 = arith.addf %303, %305 : vector<2x512xf32>
    %307 = vector.extract_strided_slice %306 {offsets = [0, 0], sizes = [2, 128], strides = [1, 1]} : vector<2x512xf32> to vector<2x128xf32>
    %cst_129 = arith.constant 5.000000e-01 : f32
    %308 = vector.broadcast %cst_129 : f32 to vector<2x128xf32>
    %309 = arith.mulf %308, %307 : vector<2x128xf32>
    %310 = math.tanh %309 : vector<2x128xf32>
    %cst_130 = arith.constant 1.000000e+00 : f32
    %311 = vector.broadcast %cst_130 : f32 to vector<2x128xf32>
    %312 = arith.addf %310, %311 : vector<2x128xf32>
    %cst_131 = arith.constant 5.000000e-01 : f32
    %313 = vector.broadcast %cst_131 : f32 to vector<2x128xf32>
    %314 = arith.mulf %313, %312 : vector<2x128xf32>
    %315 = vector.extract_strided_slice %306 {offsets = [0, 128], sizes = [2, 128], strides = [1, 1]} : vector<2x512xf32> to vector<2x128xf32>
    %cst_132 = arith.constant 5.000000e-01 : f32
    %316 = vector.broadcast %cst_132 : f32 to vector<2x128xf32>
    %317 = arith.mulf %316, %315 : vector<2x128xf32>
    %318 = math.tanh %317 : vector<2x128xf32>
    %cst_133 = arith.constant 1.000000e+00 : f32
    %319 = vector.broadcast %cst_133 : f32 to vector<2x128xf32>
    %320 = arith.addf %318, %319 : vector<2x128xf32>
    %cst_134 = arith.constant 5.000000e-01 : f32
    %321 = vector.broadcast %cst_134 : f32 to vector<2x128xf32>
    %322 = arith.mulf %321, %320 : vector<2x128xf32>
    %323 = vector.extract_strided_slice %306 {offsets = [0, 256], sizes = [2, 128], strides = [1, 1]} : vector<2x512xf32> to vector<2x128xf32>
    %324 = math.tanh %323 : vector<2x128xf32>
    %325 = vector.extract_strided_slice %306 {offsets = [0, 384], sizes = [2, 128], strides = [1, 1]} : vector<2x512xf32> to vector<2x128xf32>
    %cst_135 = arith.constant 5.000000e-01 : f32
    %326 = vector.broadcast %cst_135 : f32 to vector<2x128xf32>
    %327 = arith.mulf %326, %325 : vector<2x128xf32>
    %328 = math.tanh %327 : vector<2x128xf32>
    %cst_136 = arith.constant 1.000000e+00 : f32
    %329 = vector.broadcast %cst_136 : f32 to vector<2x128xf32>
    %330 = arith.addf %328, %329 : vector<2x128xf32>
    %cst_137 = arith.constant 5.000000e-01 : f32
    %331 = vector.broadcast %cst_137 : f32 to vector<2x128xf32>
    %332 = arith.mulf %331, %330 : vector<2x128xf32>
    %333 = arith.mulf %322, %293 : vector<2x128xf32>
    %334 = arith.mulf %314, %324 : vector<2x128xf32>
    %335 = arith.addf %333, %334 : vector<2x128xf32>
    %336 = math.tanh %335 : vector<2x128xf32>
    %337 = arith.mulf %332, %336 : vector<2x128xf32>
    %338 = arith.index_cast %c5_i32_125 : i32 to index
    %c0_138 = arith.constant 0 : index
    %c0_139 = arith.constant 0 : index
    %339 = vector.load %arg6[%338, %c0_138, %c0_139] : memref<8x2x128xf32, #tpu.memory_space<vmem>>, vector<1x2x128xf32>
    %340 = vector.shape_cast %339 : vector<1x2x128xf32> to vector<2x128xf32>
    %341 = vector.shape_cast %337 : vector<2x128xf32> to vector<1x2x128xf32>
    tpu.vector_store %arg6[%338, %c0_138, %c0_139], %341 {strides = array<i32>} : memref<8x2x128xf32, #tpu.memory_space<vmem>>, vector<1x2x128xf32>,
    %c6_i32_140 = arith.constant 6 : i32
    %342 = arith.index_cast %c6_i32_140 : i32 to index
    %c0_141 = arith.constant 0 : index
    %c0_142 = arith.constant 0 : index
    %343 = vector.load %arg7[%342, %c0_141, %c0_142] : memref<8x2x512xbf16, #tpu.memory_space<vmem>>, vector<1x2x512xbf16>
    %344 = vector.shape_cast %343 : vector<1x2x512xbf16> to vector<2x512xbf16>
    %345 = arith.extf %344 : vector<2x512xbf16> to vector<2x512xf32>
    %346 = arith.truncf %337 : vector<2x128xf32> to vector<2x128xbf16>
    %cst_143 = arith.constant dense<0.000000e+00> : vector<2x512xf32>
    %347 = tpu.matmul %346, %87, %cst_143 {dimension_numbers = #tpu.dot_dimension_numbers<[1], [0], [0], [1], [0, 0, 1, 1], [], []>} : vector<2x128xbf16>, vector<128x512xbf16>, vector<2x512xf32> -> vector<2x512xf32>
    %348 = arith.addf %345, %347 : vector<2x512xf32>
    %349 = vector.extract_strided_slice %348 {offsets = [0, 0], sizes = [2, 128], strides = [1, 1]} : vector<2x512xf32> to vector<2x128xf32>
    %cst_144 = arith.constant 5.000000e-01 : f32
    %350 = vector.broadcast %cst_144 : f32 to vector<2x128xf32>
    %351 = arith.mulf %350, %349 : vector<2x128xf32>
    %352 = math.tanh %351 : vector<2x128xf32>
    %cst_145 = arith.constant 1.000000e+00 : f32
    %353 = vector.broadcast %cst_145 : f32 to vector<2x128xf32>
    %354 = arith.addf %352, %353 : vector<2x128xf32>
    %cst_146 = arith.constant 5.000000e-01 : f32
    %355 = vector.broadcast %cst_146 : f32 to vector<2x128xf32>
    %356 = arith.mulf %355, %354 : vector<2x128xf32>
    %357 = vector.extract_strided_slice %348 {offsets = [0, 128], sizes = [2, 128], strides = [1, 1]} : vector<2x512xf32> to vector<2x128xf32>
    %cst_147 = arith.constant 5.000000e-01 : f32
    %358 = vector.broadcast %cst_147 : f32 to vector<2x128xf32>
    %359 = arith.mulf %358, %357 : vector<2x128xf32>
    %360 = math.tanh %359 : vector<2x128xf32>
    %cst_148 = arith.constant 1.000000e+00 : f32
    %361 = vector.broadcast %cst_148 : f32 to vector<2x128xf32>
    %362 = arith.addf %360, %361 : vector<2x128xf32>
    %cst_149 = arith.constant 5.000000e-01 : f32
    %363 = vector.broadcast %cst_149 : f32 to vector<2x128xf32>
    %364 = arith.mulf %363, %362 : vector<2x128xf32>
    %365 = vector.extract_strided_slice %348 {offsets = [0, 256], sizes = [2, 128], strides = [1, 1]} : vector<2x512xf32> to vector<2x128xf32>
    %366 = math.tanh %365 : vector<2x128xf32>
    %367 = vector.extract_strided_slice %348 {offsets = [0, 384], sizes = [2, 128], strides = [1, 1]} : vector<2x512xf32> to vector<2x128xf32>
    %cst_150 = arith.constant 5.000000e-01 : f32
    %368 = vector.broadcast %cst_150 : f32 to vector<2x128xf32>
    %369 = arith.mulf %368, %367 : vector<2x128xf32>
    %370 = math.tanh %369 : vector<2x128xf32>
    %cst_151 = arith.constant 1.000000e+00 : f32
    %371 = vector.broadcast %cst_151 : f32 to vector<2x128xf32>
    %372 = arith.addf %370, %371 : vector<2x128xf32>
    %cst_152 = arith.constant 5.000000e-01 : f32
    %373 = vector.broadcast %cst_152 : f32 to vector<2x128xf32>
    %374 = arith.mulf %373, %372 : vector<2x128xf32>
    %375 = arith.mulf %364, %335 : vector<2x128xf32>
    %376 = arith.mulf %356, %366 : vector<2x128xf32>
    %377 = arith.addf %375, %376 : vector<2x128xf32>
    %378 = math.tanh %377 : vector<2x128xf32>
    %379 = arith.mulf %374, %378 : vector<2x128xf32>
    %380 = arith.index_cast %c6_i32_140 : i32 to index
    %c0_153 = arith.constant 0 : index
    %c0_154 = arith.constant 0 : index
    %381 = vector.load %arg6[%380, %c0_153, %c0_154] : memref<8x2x128xf32, #tpu.memory_space<vmem>>, vector<1x2x128xf32>
    %382 = vector.shape_cast %381 : vector<1x2x128xf32> to vector<2x128xf32>
    %383 = vector.shape_cast %379 : vector<2x128xf32> to vector<1x2x128xf32>
    tpu.vector_store %arg6[%380, %c0_153, %c0_154], %383 {strides = array<i32>} : memref<8x2x128xf32, #tpu.memory_space<vmem>>, vector<1x2x128xf32>,
    %c7_i32_155 = arith.constant 7 : i32
    %384 = arith.index_cast %c7_i32_155 : i32 to index
    %c0_156 = arith.constant 0 : index
    %c0_157 = arith.constant 0 : index
    %385 = vector.load %arg7[%384, %c0_156, %c0_157] : memref<8x2x512xbf16, #tpu.memory_space<vmem>>, vector<1x2x512xbf16>
    %386 = vector.shape_cast %385 : vector<1x2x512xbf16> to vector<2x512xbf16>
    %387 = arith.extf %386 : vector<2x512xbf16> to vector<2x512xf32>
    %388 = arith.truncf %379 : vector<2x128xf32> to vector<2x128xbf16>
    %cst_158 = arith.constant dense<0.000000e+00> : vector<2x512xf32>
    %389 = tpu.matmul %388, %87, %cst_158 {dimension_numbers = #tpu.dot_dimension_numbers<[1], [0], [0], [1], [0, 0, 1, 1], [], []>} : vector<2x128xbf16>, vector<128x512xbf16>, vector<2x512xf32> -> vector<2x512xf32>
    %390 = arith.addf %387, %389 : vector<2x512xf32>
    %391 = vector.extract_strided_slice %390 {offsets = [0, 0], sizes = [2, 128], strides = [1, 1]} : vector<2x512xf32> to vector<2x128xf32>
    %cst_159 = arith.constant 5.000000e-01 : f32
    %392 = vector.broadcast %cst_159 : f32 to vector<2x128xf32>
    %393 = arith.mulf %392, %391 : vector<2x128xf32>
    %394 = math.tanh %393 : vector<2x128xf32>
    %cst_160 = arith.constant 1.000000e+00 : f32
    %395 = vector.broadcast %cst_160 : f32 to vector<2x128xf32>
    %396 = arith.addf %394, %395 : vector<2x128xf32>
    %cst_161 = arith.constant 5.000000e-01 : f32
    %397 = vector.broadcast %cst_161 : f32 to vector<2x128xf32>
    %398 = arith.mulf %397, %396 : vector<2x128xf32>
    %399 = vector.extract_strided_slice %390 {offsets = [0, 128], sizes = [2, 128], strides = [1, 1]} : vector<2x512xf32> to vector<2x128xf32>
    %cst_162 = arith.constant 5.000000e-01 : f32
    %400 = vector.broadcast %cst_162 : f32 to vector<2x128xf32>
    %401 = arith.mulf %400, %399 : vector<2x128xf32>
    %402 = math.tanh %401 : vector<2x128xf32>
    %cst_163 = arith.constant 1.000000e+00 : f32
    %403 = vector.broadcast %cst_163 : f32 to vector<2x128xf32>
    %404 = arith.addf %402, %403 : vector<2x128xf32>
    %cst_164 = arith.constant 5.000000e-01 : f32
    %405 = vector.broadcast %cst_164 : f32 to vector<2x128xf32>
    %406 = arith.mulf %405, %404 : vector<2x128xf32>
    %407 = vector.extract_strided_slice %390 {offsets = [0, 256], sizes = [2, 128], strides = [1, 1]} : vector<2x512xf32> to vector<2x128xf32>
    %408 = math.tanh %407 : vector<2x128xf32>
    %409 = vector.extract_strided_slice %390 {offsets = [0, 384], sizes = [2, 128], strides = [1, 1]} : vector<2x512xf32> to vector<2x128xf32>
    %cst_165 = arith.constant 5.000000e-01 : f32
    %410 = vector.broadcast %cst_165 : f32 to vector<2x128xf32>
    %411 = arith.mulf %410, %409 : vector<2x128xf32>
    %412 = math.tanh %411 : vector<2x128xf32>
    %cst_166 = arith.constant 1.000000e+00 : f32
    %413 = vector.broadcast %cst_166 : f32 to vector<2x128xf32>
    %414 = arith.addf %412, %413 : vector<2x128xf32>
    %cst_167 = arith.constant 5.000000e-01 : f32
    %415 = vector.broadcast %cst_167 : f32 to vector<2x128xf32>
    %416 = arith.mulf %415, %414 : vector<2x128xf32>
    %417 = arith.mulf %406, %377 : vector<2x128xf32>
    %418 = arith.mulf %398, %408 : vector<2x128xf32>
    %419 = arith.addf %417, %418 : vector<2x128xf32>
    %420 = math.tanh %419 : vector<2x128xf32>
    %421 = arith.mulf %416, %420 : vector<2x128xf32>
    %422 = arith.index_cast %c7_i32_155 : i32 to index
    %c0_168 = arith.constant 0 : index
    %c0_169 = arith.constant 0 : index
    %423 = vector.load %arg6[%422, %c0_168, %c0_169] : memref<8x2x128xf32, #tpu.memory_space<vmem>>, vector<1x2x128xf32>
    %424 = vector.shape_cast %423 : vector<1x2x128xf32> to vector<2x128xf32>
    %425 = vector.shape_cast %421 : vector<2x128xf32> to vector<1x2x128xf32>
    tpu.vector_store %arg6[%422, %c0_168, %c0_169], %425 {strides = array<i32>} : memref<8x2x128xf32, #tpu.memory_space<vmem>>, vector<1x2x128xf32>,
    %c8_i32_170 = arith.constant 8 : i32
    %c0_171 = arith.constant 0 : index
    %c0_172 = arith.constant 0 : index
    %426 = vector.load %arg8[%c0_171, %c0_172] : memref<2x128xf32, #tpu.memory_space<vmem>>, vector<2x128xf32>
    tpu.vector_store %arg8[%c0_171, %c0_172], %421 {strides = array<i32>} : memref<2x128xf32, #tpu.memory_space<vmem>>, vector<2x128xf32>,
    %c0_173 = arith.constant 0 : index
    %c0_174 = arith.constant 0 : index
    %427 = vector.load %arg9[%c0_173, %c0_174] : memref<2x128xf32, #tpu.memory_space<vmem>>, vector<2x128xf32>
    tpu.vector_store %arg9[%c0_173, %c0_174], %419 {strides = array<i32>} : memref<2x128xf32, #tpu.memory_space<vmem>>, vector<2x128xf32>,
    return
  }
  func.func @transform_0(%arg0: i32, %arg1: i32) -> (i32, i32, i32) {
    %c0_i32 = arith.constant 0 : i32
    %c0_i32_0 = arith.constant 0 : i32
    return %arg1, %arg0, %c0_i32 : i32, i32, i32
  }
  func.func @transform_1(%arg0: i32, %arg1: i32) -> (i32, i32) {
    %c0_i32 = arith.constant 0 : i32
    %c0_i32_0 = arith.constant 0 : i32
    %c0_i32_1 = arith.constant 0 : i32
    return %c0_i32, %c0_i32_0 : i32, i32
  }
  func.func @transform_2(%arg0: i32, %arg1: i32) -> (i32, i32) {
    %c0_i32 = arith.constant 0 : i32
    %c0_i32_0 = arith.constant 0 : i32
    %c0_i32_1 = arith.constant 0 : i32
    return %c0_i32, %c0_i32_0 : i32, i32
  }
  func.func @transform_3(%arg0: i32, %arg1: i32) -> (i32, i32) {
    %c0_i32 = arith.constant 0 : i32
    %c0_i32_0 = arith.constant 0 : i32
    %c0_i32_1 = arith.constant 0 : i32
    return %c0_i32, %c0_i32_0 : i32, i32
  }
  func.func @transform_4(%arg0: i32, %arg1: i32) -> (i32, i32, i32) {
    %c0_i32 = arith.constant 0 : i32
    %c0_i32_0 = arith.constant 0 : i32
    return %arg1, %arg0, %c0_i32 : i32, i32, i32
  }
}

module attributes {stable_mosaic.version = 11 : i64} {
  func.func @_lstm_layer_kernel(%arg0: i32, %arg1: i32, %arg2: memref<8x2x16xbf16, #tpu.memory_space<vmem>>, %arg3: memref<16x512xbf16, #tpu.memory_space<vmem>>, %arg4: memref<128x512xbf16, #tpu.memory_space<vmem>>, %arg5: memref<1x512xf32, #tpu.memory_space<vmem>>, %arg6: memref<8x2x128xbf16, #tpu.memory_space<vmem>>, %arg7: memref<8x2x512xbf16, #tpu.memory_space<vmem>>, %arg8: memref<2x128xf32, #tpu.memory_space<vmem>>, %arg9: memref<2x128xf32, #tpu.memory_space<vmem>>) attributes {dimension_semantics = [#tpu.dimension_semantics<parallel>, #tpu.dimension_semantics<arbitrary>], iteration_bounds = array<i64: 1, 1>, scalar_prefetch = 0 : i64, scratch_operands = 3 : i64, tpu.core_type = #tpu.core_type<tc>, window_params = [{transform_indices = @transform_0, window_bounds = array<i64: 8, 2, 16>}, {pipeline_mode = #tpu.pipeline_mode<synchronous>, transform_indices = @transform_1, window_bounds = array<i64: 16, 512>}, {pipeline_mode = #tpu.pipeline_mode<synchronous>, transform_indices = @transform_2, window_bounds = array<i64: 128, 512>}, {pipeline_mode = #tpu.pipeline_mode<synchronous>, transform_indices = @transform_3, window_bounds = array<i64: 1, 512>}, {transform_indices = @transform_4, window_bounds = array<i64: 8, 2, 128>}]} {
    %c0_i32 = arith.constant 0 : i32
    %0 = arith.cmpi eq, %arg1, %c0_i32 : i32
    %1 = arith.extui %0 : i1 to i32
    %c0_i32_0 = arith.constant 0 : i32
    %2 = arith.cmpi ne, %1, %c0_i32_0 : i32
    scf.if %2 {
      %cst_175 = arith.constant 0.000000e+00 : f32
      %436 = vector.broadcast %cst_175 : f32 to vector<2x128xf32>
      %c0_176 = arith.constant 0 : index
      %c0_177 = arith.constant 0 : index
      %437 = vector.load %arg8[%c0_176, %c0_177] : memref<2x128xf32, #tpu.memory_space<vmem>>, vector<2x128xf32>
      tpu.vector_store %arg8[%c0_176, %c0_177], %436 {strides = array<i32>} : memref<2x128xf32, #tpu.memory_space<vmem>>, vector<2x128xf32>,
      %cst_178 = arith.constant 0.000000e+00 : f32
      %438 = vector.broadcast %cst_178 : f32 to vector<2x128xf32>
      %c0_179 = arith.constant 0 : index
      %c0_180 = arith.constant 0 : index
      %439 = vector.load %arg9[%c0_179, %c0_180] : memref<2x128xf32, #tpu.memory_space<vmem>>, vector<2x128xf32>
      tpu.vector_store %arg9[%c0_179, %c0_180], %438 {strides = array<i32>} : memref<2x128xf32, #tpu.memory_space<vmem>>, vector<2x128xf32>,
    } else {
    }
    %c0 = arith.constant 0 : index
    %c0_1 = arith.constant 0 : index
    %3 = vector.load %arg3[%c0, %c0_1] : memref<16x512xbf16, #tpu.memory_space<vmem>>, vector<16x512xbf16>
    %c0_2 = arith.constant 0 : index
    %c0_3 = arith.constant 0 : index
    %4 = vector.load %arg5[%c0_2, %c0_3] : memref<1x512xf32, #tpu.memory_space<vmem>>, vector<1x512xf32>
    %5 = vector.shape_cast %4 : vector<1x512xf32> to vector<1x512xf32>
    %6 = vector.broadcast %5 : vector<1x512xf32> to vector<2x512xf32>
    %c0_i32_4 = arith.constant 0 : i32
    %7 = arith.index_cast %c0_i32_4 : i32 to index
    %c0_5 = arith.constant 0 : index
    %c0_6 = arith.constant 0 : index
    %8 = vector.load %arg2[%7, %c0_5, %c0_6] : memref<8x2x16xbf16, #tpu.memory_space<vmem>>, vector<1x2x16xbf16>
    %9 = vector.shape_cast %8 : vector<1x2x16xbf16> to vector<2x16xbf16>
    %cst = arith.constant dense<0.000000e+00> : vector<2x512xf32>
    %10 = tpu.matmul %9, %3, %cst {dimension_numbers = #tpu.dot_dimension_numbers<[1], [0], [0], [1], [0, 0, 1, 1], [], []>} : vector<2x16xbf16>, vector<16x512xbf16>, vector<2x512xf32> -> vector<2x512xf32>
    %11 = arith.addf %10, %6 : vector<2x512xf32>
    %12 = arith.truncf %11 : vector<2x512xf32> to vector<2x512xbf16>
    %13 = arith.index_cast %c0_i32_4 : i32 to index
    %c0_7 = arith.constant 0 : index
    %c0_8 = arith.constant 0 : index
    %14 = vector.load %arg7[%13, %c0_7, %c0_8] : memref<8x2x512xbf16, #tpu.memory_space<vmem>>, vector<1x2x512xbf16>
    %15 = vector.shape_cast %14 : vector<1x2x512xbf16> to vector<2x512xbf16>
    %16 = vector.shape_cast %12 : vector<2x512xbf16> to vector<1x2x512xbf16>
    tpu.vector_store %arg7[%13, %c0_7, %c0_8], %16 {strides = array<i32>} : memref<8x2x512xbf16, #tpu.memory_space<vmem>>, vector<1x2x512xbf16>,
    %c1_i32 = arith.constant 1 : i32
    %17 = arith.index_cast %c1_i32 : i32 to index
    %c0_9 = arith.constant 0 : index
    %c0_10 = arith.constant 0 : index
    %18 = vector.load %arg2[%17, %c0_9, %c0_10] : memref<8x2x16xbf16, #tpu.memory_space<vmem>>, vector<1x2x16xbf16>
    %19 = vector.shape_cast %18 : vector<1x2x16xbf16> to vector<2x16xbf16>
    %cst_11 = arith.constant dense<0.000000e+00> : vector<2x512xf32>
    %20 = tpu.matmul %19, %3, %cst_11 {dimension_numbers = #tpu.dot_dimension_numbers<[1], [0], [0], [1], [0, 0, 1, 1], [], []>} : vector<2x16xbf16>, vector<16x512xbf16>, vector<2x512xf32> -> vector<2x512xf32>
    %21 = arith.addf %20, %6 : vector<2x512xf32>
    %22 = arith.truncf %21 : vector<2x512xf32> to vector<2x512xbf16>
    %23 = arith.index_cast %c1_i32 : i32 to index
    %c0_12 = arith.constant 0 : index
    %c0_13 = arith.constant 0 : index
    %24 = vector.load %arg7[%23, %c0_12, %c0_13] : memref<8x2x512xbf16, #tpu.memory_space<vmem>>, vector<1x2x512xbf16>
    %25 = vector.shape_cast %24 : vector<1x2x512xbf16> to vector<2x512xbf16>
    %26 = vector.shape_cast %22 : vector<2x512xbf16> to vector<1x2x512xbf16>
    tpu.vector_store %arg7[%23, %c0_12, %c0_13], %26 {strides = array<i32>} : memref<8x2x512xbf16, #tpu.memory_space<vmem>>, vector<1x2x512xbf16>,
    %c2_i32 = arith.constant 2 : i32
    %27 = arith.index_cast %c2_i32 : i32 to index
    %c0_14 = arith.constant 0 : index
    %c0_15 = arith.constant 0 : index
    %28 = vector.load %arg2[%27, %c0_14, %c0_15] : memref<8x2x16xbf16, #tpu.memory_space<vmem>>, vector<1x2x16xbf16>
    %29 = vector.shape_cast %28 : vector<1x2x16xbf16> to vector<2x16xbf16>
    %cst_16 = arith.constant dense<0.000000e+00> : vector<2x512xf32>
    %30 = tpu.matmul %29, %3, %cst_16 {dimension_numbers = #tpu.dot_dimension_numbers<[1], [0], [0], [1], [0, 0, 1, 1], [], []>} : vector<2x16xbf16>, vector<16x512xbf16>, vector<2x512xf32> -> vector<2x512xf32>
    %31 = arith.addf %30, %6 : vector<2x512xf32>
    %32 = arith.truncf %31 : vector<2x512xf32> to vector<2x512xbf16>
    %33 = arith.index_cast %c2_i32 : i32 to index
    %c0_17 = arith.constant 0 : index
    %c0_18 = arith.constant 0 : index
    %34 = vector.load %arg7[%33, %c0_17, %c0_18] : memref<8x2x512xbf16, #tpu.memory_space<vmem>>, vector<1x2x512xbf16>
    %35 = vector.shape_cast %34 : vector<1x2x512xbf16> to vector<2x512xbf16>
    %36 = vector.shape_cast %32 : vector<2x512xbf16> to vector<1x2x512xbf16>
    tpu.vector_store %arg7[%33, %c0_17, %c0_18], %36 {strides = array<i32>} : memref<8x2x512xbf16, #tpu.memory_space<vmem>>, vector<1x2x512xbf16>,
    %c3_i32 = arith.constant 3 : i32
    %37 = arith.index_cast %c3_i32 : i32 to index
    %c0_19 = arith.constant 0 : index
    %c0_20 = arith.constant 0 : index
    %38 = vector.load %arg2[%37, %c0_19, %c0_20] : memref<8x2x16xbf16, #tpu.memory_space<vmem>>, vector<1x2x16xbf16>
    %39 = vector.shape_cast %38 : vector<1x2x16xbf16> to vector<2x16xbf16>
    %cst_21 = arith.constant dense<0.000000e+00> : vector<2x512xf32>
    %40 = tpu.matmul %39, %3, %cst_21 {dimension_numbers = #tpu.dot_dimension_numbers<[1], [0], [0], [1], [0, 0, 1, 1], [], []>} : vector<2x16xbf16>, vector<16x512xbf16>, vector<2x512xf32> -> vector<2x512xf32>
    %41 = arith.addf %40, %6 : vector<2x512xf32>
    %42 = arith.truncf %41 : vector<2x512xf32> to vector<2x512xbf16>
    %43 = arith.index_cast %c3_i32 : i32 to index
    %c0_22 = arith.constant 0 : index
    %c0_23 = arith.constant 0 : index
    %44 = vector.load %arg7[%43, %c0_22, %c0_23] : memref<8x2x512xbf16, #tpu.memory_space<vmem>>, vector<1x2x512xbf16>
    %45 = vector.shape_cast %44 : vector<1x2x512xbf16> to vector<2x512xbf16>
    %46 = vector.shape_cast %42 : vector<2x512xbf16> to vector<1x2x512xbf16>
    tpu.vector_store %arg7[%43, %c0_22, %c0_23], %46 {strides = array<i32>} : memref<8x2x512xbf16, #tpu.memory_space<vmem>>, vector<1x2x512xbf16>,
    %c4_i32 = arith.constant 4 : i32
    %47 = arith.index_cast %c4_i32 : i32 to index
    %c0_24 = arith.constant 0 : index
    %c0_25 = arith.constant 0 : index
    %48 = vector.load %arg2[%47, %c0_24, %c0_25] : memref<8x2x16xbf16, #tpu.memory_space<vmem>>, vector<1x2x16xbf16>
    %49 = vector.shape_cast %48 : vector<1x2x16xbf16> to vector<2x16xbf16>
    %cst_26 = arith.constant dense<0.000000e+00> : vector<2x512xf32>
    %50 = tpu.matmul %49, %3, %cst_26 {dimension_numbers = #tpu.dot_dimension_numbers<[1], [0], [0], [1], [0, 0, 1, 1], [], []>} : vector<2x16xbf16>, vector<16x512xbf16>, vector<2x512xf32> -> vector<2x512xf32>
    %51 = arith.addf %50, %6 : vector<2x512xf32>
    %52 = arith.truncf %51 : vector<2x512xf32> to vector<2x512xbf16>
    %53 = arith.index_cast %c4_i32 : i32 to index
    %c0_27 = arith.constant 0 : index
    %c0_28 = arith.constant 0 : index
    %54 = vector.load %arg7[%53, %c0_27, %c0_28] : memref<8x2x512xbf16, #tpu.memory_space<vmem>>, vector<1x2x512xbf16>
    %55 = vector.shape_cast %54 : vector<1x2x512xbf16> to vector<2x512xbf16>
    %56 = vector.shape_cast %52 : vector<2x512xbf16> to vector<1x2x512xbf16>
    tpu.vector_store %arg7[%53, %c0_27, %c0_28], %56 {strides = array<i32>} : memref<8x2x512xbf16, #tpu.memory_space<vmem>>, vector<1x2x512xbf16>,
    %c5_i32 = arith.constant 5 : i32
    %57 = arith.index_cast %c5_i32 : i32 to index
    %c0_29 = arith.constant 0 : index
    %c0_30 = arith.constant 0 : index
    %58 = vector.load %arg2[%57, %c0_29, %c0_30] : memref<8x2x16xbf16, #tpu.memory_space<vmem>>, vector<1x2x16xbf16>
    %59 = vector.shape_cast %58 : vector<1x2x16xbf16> to vector<2x16xbf16>
    %cst_31 = arith.constant dense<0.000000e+00> : vector<2x512xf32>
    %60 = tpu.matmul %59, %3, %cst_31 {dimension_numbers = #tpu.dot_dimension_numbers<[1], [0], [0], [1], [0, 0, 1, 1], [], []>} : vector<2x16xbf16>, vector<16x512xbf16>, vector<2x512xf32> -> vector<2x512xf32>
    %61 = arith.addf %60, %6 : vector<2x512xf32>
    %62 = arith.truncf %61 : vector<2x512xf32> to vector<2x512xbf16>
    %63 = arith.index_cast %c5_i32 : i32 to index
    %c0_32 = arith.constant 0 : index
    %c0_33 = arith.constant 0 : index
    %64 = vector.load %arg7[%63, %c0_32, %c0_33] : memref<8x2x512xbf16, #tpu.memory_space<vmem>>, vector<1x2x512xbf16>
    %65 = vector.shape_cast %64 : vector<1x2x512xbf16> to vector<2x512xbf16>
    %66 = vector.shape_cast %62 : vector<2x512xbf16> to vector<1x2x512xbf16>
    tpu.vector_store %arg7[%63, %c0_32, %c0_33], %66 {strides = array<i32>} : memref<8x2x512xbf16, #tpu.memory_space<vmem>>, vector<1x2x512xbf16>,
    %c6_i32 = arith.constant 6 : i32
    %67 = arith.index_cast %c6_i32 : i32 to index
    %c0_34 = arith.constant 0 : index
    %c0_35 = arith.constant 0 : index
    %68 = vector.load %arg2[%67, %c0_34, %c0_35] : memref<8x2x16xbf16, #tpu.memory_space<vmem>>, vector<1x2x16xbf16>
    %69 = vector.shape_cast %68 : vector<1x2x16xbf16> to vector<2x16xbf16>
    %cst_36 = arith.constant dense<0.000000e+00> : vector<2x512xf32>
    %70 = tpu.matmul %69, %3, %cst_36 {dimension_numbers = #tpu.dot_dimension_numbers<[1], [0], [0], [1], [0, 0, 1, 1], [], []>} : vector<2x16xbf16>, vector<16x512xbf16>, vector<2x512xf32> -> vector<2x512xf32>
    %71 = arith.addf %70, %6 : vector<2x512xf32>
    %72 = arith.truncf %71 : vector<2x512xf32> to vector<2x512xbf16>
    %73 = arith.index_cast %c6_i32 : i32 to index
    %c0_37 = arith.constant 0 : index
    %c0_38 = arith.constant 0 : index
    %74 = vector.load %arg7[%73, %c0_37, %c0_38] : memref<8x2x512xbf16, #tpu.memory_space<vmem>>, vector<1x2x512xbf16>
    %75 = vector.shape_cast %74 : vector<1x2x512xbf16> to vector<2x512xbf16>
    %76 = vector.shape_cast %72 : vector<2x512xbf16> to vector<1x2x512xbf16>
    tpu.vector_store %arg7[%73, %c0_37, %c0_38], %76 {strides = array<i32>} : memref<8x2x512xbf16, #tpu.memory_space<vmem>>, vector<1x2x512xbf16>,
    %c7_i32 = arith.constant 7 : i32
    %77 = arith.index_cast %c7_i32 : i32 to index
    %c0_39 = arith.constant 0 : index
    %c0_40 = arith.constant 0 : index
    %78 = vector.load %arg2[%77, %c0_39, %c0_40] : memref<8x2x16xbf16, #tpu.memory_space<vmem>>, vector<1x2x16xbf16>
    %79 = vector.shape_cast %78 : vector<1x2x16xbf16> to vector<2x16xbf16>
    %cst_41 = arith.constant dense<0.000000e+00> : vector<2x512xf32>
    %80 = tpu.matmul %79, %3, %cst_41 {dimension_numbers = #tpu.dot_dimension_numbers<[1], [0], [0], [1], [0, 0, 1, 1], [], []>} : vector<2x16xbf16>, vector<16x512xbf16>, vector<2x512xf32> -> vector<2x512xf32>
    %81 = arith.addf %80, %6 : vector<2x512xf32>
    %82 = arith.truncf %81 : vector<2x512xf32> to vector<2x512xbf16>
    %83 = arith.index_cast %c7_i32 : i32 to index
    %c0_42 = arith.constant 0 : index
    %c0_43 = arith.constant 0 : index
    %84 = vector.load %arg7[%83, %c0_42, %c0_43] : memref<8x2x512xbf16, #tpu.memory_space<vmem>>, vector<1x2x512xbf16>
    %85 = vector.shape_cast %84 : vector<1x2x512xbf16> to vector<2x512xbf16>
    %86 = vector.shape_cast %82 : vector<2x512xbf16> to vector<1x2x512xbf16>
    tpu.vector_store %arg7[%83, %c0_42, %c0_43], %86 {strides = array<i32>} : memref<8x2x512xbf16, #tpu.memory_space<vmem>>, vector<1x2x512xbf16>,
    %c8_i32 = arith.constant 8 : i32
    %c0_44 = arith.constant 0 : index
    %c0_45 = arith.constant 0 : index
    %87 = vector.load %arg4[%c0_44, %c0_45] : memref<128x512xbf16, #tpu.memory_space<vmem>>, vector<128x512xbf16>
    %c0_46 = arith.constant 0 : index
    %c0_47 = arith.constant 0 : index
    %88 = vector.load %arg8[%c0_46, %c0_47] : memref<2x128xf32, #tpu.memory_space<vmem>>, vector<2x128xf32>
    %c0_48 = arith.constant 0 : index
    %c0_49 = arith.constant 0 : index
    %89 = vector.load %arg9[%c0_48, %c0_49] : memref<2x128xf32, #tpu.memory_space<vmem>>, vector<2x128xf32>
    %c0_i32_50 = arith.constant 0 : i32
    %90 = arith.index_cast %c0_i32_50 : i32 to index
    %c0_51 = arith.constant 0 : index
    %c0_52 = arith.constant 0 : index
    %91 = vector.load %arg7[%90, %c0_51, %c0_52] : memref<8x2x512xbf16, #tpu.memory_space<vmem>>, vector<1x2x512xbf16>
    %92 = vector.shape_cast %91 : vector<1x2x512xbf16> to vector<2x512xbf16>
    %93 = arith.extf %92 : vector<2x512xbf16> to vector<2x512xf32>
    %94 = arith.truncf %88 : vector<2x128xf32> to vector<2x128xbf16>
    %cst_53 = arith.constant dense<0.000000e+00> : vector<2x512xf32>
    %95 = tpu.matmul %94, %87, %cst_53 {dimension_numbers = #tpu.dot_dimension_numbers<[1], [0], [0], [1], [0, 0, 1, 1], [], []>} : vector<2x128xbf16>, vector<128x512xbf16>, vector<2x512xf32> -> vector<2x512xf32>
    %96 = arith.addf %93, %95 : vector<2x512xf32>
    %97 = vector.extract_strided_slice %96 {offsets = [0, 0], sizes = [2, 128], strides = [1, 1]} : vector<2x512xf32> to vector<2x128xf32>
    %cst_54 = arith.constant 5.000000e-01 : f32
    %98 = vector.broadcast %cst_54 : f32 to vector<2x128xf32>
    %99 = arith.mulf %98, %97 : vector<2x128xf32>
    %100 = math.tanh %99 : vector<2x128xf32>
    %cst_55 = arith.constant 1.000000e+00 : f32
    %101 = vector.broadcast %cst_55 : f32 to vector<2x128xf32>
    %102 = arith.addf %100, %101 : vector<2x128xf32>
    %cst_56 = arith.constant 5.000000e-01 : f32
    %103 = vector.broadcast %cst_56 : f32 to vector<2x128xf32>
    %104 = arith.mulf %103, %102 : vector<2x128xf32>
    %105 = vector.extract_strided_slice %96 {offsets = [0, 128], sizes = [2, 128], strides = [1, 1]} : vector<2x512xf32> to vector<2x128xf32>
    %cst_57 = arith.constant 5.000000e-01 : f32
    %106 = vector.broadcast %cst_57 : f32 to vector<2x128xf32>
    %107 = arith.mulf %106, %105 : vector<2x128xf32>
    %108 = math.tanh %107 : vector<2x128xf32>
    %cst_58 = arith.constant 1.000000e+00 : f32
    %109 = vector.broadcast %cst_58 : f32 to vector<2x128xf32>
    %110 = arith.addf %108, %109 : vector<2x128xf32>
    %cst_59 = arith.constant 5.000000e-01 : f32
    %111 = vector.broadcast %cst_59 : f32 to vector<2x128xf32>
    %112 = arith.mulf %111, %110 : vector<2x128xf32>
    %113 = vector.extract_strided_slice %96 {offsets = [0, 256], sizes = [2, 128], strides = [1, 1]} : vector<2x512xf32> to vector<2x128xf32>
    %114 = math.tanh %113 : vector<2x128xf32>
    %115 = vector.extract_strided_slice %96 {offsets = [0, 384], sizes = [2, 128], strides = [1, 1]} : vector<2x512xf32> to vector<2x128xf32>
    %cst_60 = arith.constant 5.000000e-01 : f32
    %116 = vector.broadcast %cst_60 : f32 to vector<2x128xf32>
    %117 = arith.mulf %116, %115 : vector<2x128xf32>
    %118 = math.tanh %117 : vector<2x128xf32>
    %cst_61 = arith.constant 1.000000e+00 : f32
    %119 = vector.broadcast %cst_61 : f32 to vector<2x128xf32>
    %120 = arith.addf %118, %119 : vector<2x128xf32>
    %cst_62 = arith.constant 5.000000e-01 : f32
    %121 = vector.broadcast %cst_62 : f32 to vector<2x128xf32>
    %122 = arith.mulf %121, %120 : vector<2x128xf32>
    %123 = arith.mulf %112, %89 : vector<2x128xf32>
    %124 = arith.mulf %104, %114 : vector<2x128xf32>
    %125 = arith.addf %123, %124 : vector<2x128xf32>
    %126 = math.tanh %125 : vector<2x128xf32>
    %127 = arith.mulf %122, %126 : vector<2x128xf32>
    %128 = arith.truncf %127 : vector<2x128xf32> to vector<2x128xbf16>
    %129 = arith.index_cast %c0_i32_50 : i32 to index
    %c0_63 = arith.constant 0 : index
    %c0_64 = arith.constant 0 : index
    %130 = vector.load %arg6[%129, %c0_63, %c0_64] : memref<8x2x128xbf16, #tpu.memory_space<vmem>>, vector<1x2x128xbf16>
    %131 = vector.shape_cast %130 : vector<1x2x128xbf16> to vector<2x128xbf16>
    %132 = vector.shape_cast %128 : vector<2x128xbf16> to vector<1x2x128xbf16>
    tpu.vector_store %arg6[%129, %c0_63, %c0_64], %132 {strides = array<i32>} : memref<8x2x128xbf16, #tpu.memory_space<vmem>>, vector<1x2x128xbf16>,
    %c1_i32_65 = arith.constant 1 : i32
    %133 = arith.index_cast %c1_i32_65 : i32 to index
    %c0_66 = arith.constant 0 : index
    %c0_67 = arith.constant 0 : index
    %134 = vector.load %arg7[%133, %c0_66, %c0_67] : memref<8x2x512xbf16, #tpu.memory_space<vmem>>, vector<1x2x512xbf16>
    %135 = vector.shape_cast %134 : vector<1x2x512xbf16> to vector<2x512xbf16>
    %136 = arith.extf %135 : vector<2x512xbf16> to vector<2x512xf32>
    %137 = arith.truncf %127 : vector<2x128xf32> to vector<2x128xbf16>
    %cst_68 = arith.constant dense<0.000000e+00> : vector<2x512xf32>
    %138 = tpu.matmul %137, %87, %cst_68 {dimension_numbers = #tpu.dot_dimension_numbers<[1], [0], [0], [1], [0, 0, 1, 1], [], []>} : vector<2x128xbf16>, vector<128x512xbf16>, vector<2x512xf32> -> vector<2x512xf32>
    %139 = arith.addf %136, %138 : vector<2x512xf32>
    %140 = vector.extract_strided_slice %139 {offsets = [0, 0], sizes = [2, 128], strides = [1, 1]} : vector<2x512xf32> to vector<2x128xf32>
    %cst_69 = arith.constant 5.000000e-01 : f32
    %141 = vector.broadcast %cst_69 : f32 to vector<2x128xf32>
    %142 = arith.mulf %141, %140 : vector<2x128xf32>
    %143 = math.tanh %142 : vector<2x128xf32>
    %cst_70 = arith.constant 1.000000e+00 : f32
    %144 = vector.broadcast %cst_70 : f32 to vector<2x128xf32>
    %145 = arith.addf %143, %144 : vector<2x128xf32>
    %cst_71 = arith.constant 5.000000e-01 : f32
    %146 = vector.broadcast %cst_71 : f32 to vector<2x128xf32>
    %147 = arith.mulf %146, %145 : vector<2x128xf32>
    %148 = vector.extract_strided_slice %139 {offsets = [0, 128], sizes = [2, 128], strides = [1, 1]} : vector<2x512xf32> to vector<2x128xf32>
    %cst_72 = arith.constant 5.000000e-01 : f32
    %149 = vector.broadcast %cst_72 : f32 to vector<2x128xf32>
    %150 = arith.mulf %149, %148 : vector<2x128xf32>
    %151 = math.tanh %150 : vector<2x128xf32>
    %cst_73 = arith.constant 1.000000e+00 : f32
    %152 = vector.broadcast %cst_73 : f32 to vector<2x128xf32>
    %153 = arith.addf %151, %152 : vector<2x128xf32>
    %cst_74 = arith.constant 5.000000e-01 : f32
    %154 = vector.broadcast %cst_74 : f32 to vector<2x128xf32>
    %155 = arith.mulf %154, %153 : vector<2x128xf32>
    %156 = vector.extract_strided_slice %139 {offsets = [0, 256], sizes = [2, 128], strides = [1, 1]} : vector<2x512xf32> to vector<2x128xf32>
    %157 = math.tanh %156 : vector<2x128xf32>
    %158 = vector.extract_strided_slice %139 {offsets = [0, 384], sizes = [2, 128], strides = [1, 1]} : vector<2x512xf32> to vector<2x128xf32>
    %cst_75 = arith.constant 5.000000e-01 : f32
    %159 = vector.broadcast %cst_75 : f32 to vector<2x128xf32>
    %160 = arith.mulf %159, %158 : vector<2x128xf32>
    %161 = math.tanh %160 : vector<2x128xf32>
    %cst_76 = arith.constant 1.000000e+00 : f32
    %162 = vector.broadcast %cst_76 : f32 to vector<2x128xf32>
    %163 = arith.addf %161, %162 : vector<2x128xf32>
    %cst_77 = arith.constant 5.000000e-01 : f32
    %164 = vector.broadcast %cst_77 : f32 to vector<2x128xf32>
    %165 = arith.mulf %164, %163 : vector<2x128xf32>
    %166 = arith.mulf %155, %125 : vector<2x128xf32>
    %167 = arith.mulf %147, %157 : vector<2x128xf32>
    %168 = arith.addf %166, %167 : vector<2x128xf32>
    %169 = math.tanh %168 : vector<2x128xf32>
    %170 = arith.mulf %165, %169 : vector<2x128xf32>
    %171 = arith.truncf %170 : vector<2x128xf32> to vector<2x128xbf16>
    %172 = arith.index_cast %c1_i32_65 : i32 to index
    %c0_78 = arith.constant 0 : index
    %c0_79 = arith.constant 0 : index
    %173 = vector.load %arg6[%172, %c0_78, %c0_79] : memref<8x2x128xbf16, #tpu.memory_space<vmem>>, vector<1x2x128xbf16>
    %174 = vector.shape_cast %173 : vector<1x2x128xbf16> to vector<2x128xbf16>
    %175 = vector.shape_cast %171 : vector<2x128xbf16> to vector<1x2x128xbf16>
    tpu.vector_store %arg6[%172, %c0_78, %c0_79], %175 {strides = array<i32>} : memref<8x2x128xbf16, #tpu.memory_space<vmem>>, vector<1x2x128xbf16>,
    %c2_i32_80 = arith.constant 2 : i32
    %176 = arith.index_cast %c2_i32_80 : i32 to index
    %c0_81 = arith.constant 0 : index
    %c0_82 = arith.constant 0 : index
    %177 = vector.load %arg7[%176, %c0_81, %c0_82] : memref<8x2x512xbf16, #tpu.memory_space<vmem>>, vector<1x2x512xbf16>
    %178 = vector.shape_cast %177 : vector<1x2x512xbf16> to vector<2x512xbf16>
    %179 = arith.extf %178 : vector<2x512xbf16> to vector<2x512xf32>
    %180 = arith.truncf %170 : vector<2x128xf32> to vector<2x128xbf16>
    %cst_83 = arith.constant dense<0.000000e+00> : vector<2x512xf32>
    %181 = tpu.matmul %180, %87, %cst_83 {dimension_numbers = #tpu.dot_dimension_numbers<[1], [0], [0], [1], [0, 0, 1, 1], [], []>} : vector<2x128xbf16>, vector<128x512xbf16>, vector<2x512xf32> -> vector<2x512xf32>
    %182 = arith.addf %179, %181 : vector<2x512xf32>
    %183 = vector.extract_strided_slice %182 {offsets = [0, 0], sizes = [2, 128], strides = [1, 1]} : vector<2x512xf32> to vector<2x128xf32>
    %cst_84 = arith.constant 5.000000e-01 : f32
    %184 = vector.broadcast %cst_84 : f32 to vector<2x128xf32>
    %185 = arith.mulf %184, %183 : vector<2x128xf32>
    %186 = math.tanh %185 : vector<2x128xf32>
    %cst_85 = arith.constant 1.000000e+00 : f32
    %187 = vector.broadcast %cst_85 : f32 to vector<2x128xf32>
    %188 = arith.addf %186, %187 : vector<2x128xf32>
    %cst_86 = arith.constant 5.000000e-01 : f32
    %189 = vector.broadcast %cst_86 : f32 to vector<2x128xf32>
    %190 = arith.mulf %189, %188 : vector<2x128xf32>
    %191 = vector.extract_strided_slice %182 {offsets = [0, 128], sizes = [2, 128], strides = [1, 1]} : vector<2x512xf32> to vector<2x128xf32>
    %cst_87 = arith.constant 5.000000e-01 : f32
    %192 = vector.broadcast %cst_87 : f32 to vector<2x128xf32>
    %193 = arith.mulf %192, %191 : vector<2x128xf32>
    %194 = math.tanh %193 : vector<2x128xf32>
    %cst_88 = arith.constant 1.000000e+00 : f32
    %195 = vector.broadcast %cst_88 : f32 to vector<2x128xf32>
    %196 = arith.addf %194, %195 : vector<2x128xf32>
    %cst_89 = arith.constant 5.000000e-01 : f32
    %197 = vector.broadcast %cst_89 : f32 to vector<2x128xf32>
    %198 = arith.mulf %197, %196 : vector<2x128xf32>
    %199 = vector.extract_strided_slice %182 {offsets = [0, 256], sizes = [2, 128], strides = [1, 1]} : vector<2x512xf32> to vector<2x128xf32>
    %200 = math.tanh %199 : vector<2x128xf32>
    %201 = vector.extract_strided_slice %182 {offsets = [0, 384], sizes = [2, 128], strides = [1, 1]} : vector<2x512xf32> to vector<2x128xf32>
    %cst_90 = arith.constant 5.000000e-01 : f32
    %202 = vector.broadcast %cst_90 : f32 to vector<2x128xf32>
    %203 = arith.mulf %202, %201 : vector<2x128xf32>
    %204 = math.tanh %203 : vector<2x128xf32>
    %cst_91 = arith.constant 1.000000e+00 : f32
    %205 = vector.broadcast %cst_91 : f32 to vector<2x128xf32>
    %206 = arith.addf %204, %205 : vector<2x128xf32>
    %cst_92 = arith.constant 5.000000e-01 : f32
    %207 = vector.broadcast %cst_92 : f32 to vector<2x128xf32>
    %208 = arith.mulf %207, %206 : vector<2x128xf32>
    %209 = arith.mulf %198, %168 : vector<2x128xf32>
    %210 = arith.mulf %190, %200 : vector<2x128xf32>
    %211 = arith.addf %209, %210 : vector<2x128xf32>
    %212 = math.tanh %211 : vector<2x128xf32>
    %213 = arith.mulf %208, %212 : vector<2x128xf32>
    %214 = arith.truncf %213 : vector<2x128xf32> to vector<2x128xbf16>
    %215 = arith.index_cast %c2_i32_80 : i32 to index
    %c0_93 = arith.constant 0 : index
    %c0_94 = arith.constant 0 : index
    %216 = vector.load %arg6[%215, %c0_93, %c0_94] : memref<8x2x128xbf16, #tpu.memory_space<vmem>>, vector<1x2x128xbf16>
    %217 = vector.shape_cast %216 : vector<1x2x128xbf16> to vector<2x128xbf16>
    %218 = vector.shape_cast %214 : vector<2x128xbf16> to vector<1x2x128xbf16>
    tpu.vector_store %arg6[%215, %c0_93, %c0_94], %218 {strides = array<i32>} : memref<8x2x128xbf16, #tpu.memory_space<vmem>>, vector<1x2x128xbf16>,
    %c3_i32_95 = arith.constant 3 : i32
    %219 = arith.index_cast %c3_i32_95 : i32 to index
    %c0_96 = arith.constant 0 : index
    %c0_97 = arith.constant 0 : index
    %220 = vector.load %arg7[%219, %c0_96, %c0_97] : memref<8x2x512xbf16, #tpu.memory_space<vmem>>, vector<1x2x512xbf16>
    %221 = vector.shape_cast %220 : vector<1x2x512xbf16> to vector<2x512xbf16>
    %222 = arith.extf %221 : vector<2x512xbf16> to vector<2x512xf32>
    %223 = arith.truncf %213 : vector<2x128xf32> to vector<2x128xbf16>
    %cst_98 = arith.constant dense<0.000000e+00> : vector<2x512xf32>
    %224 = tpu.matmul %223, %87, %cst_98 {dimension_numbers = #tpu.dot_dimension_numbers<[1], [0], [0], [1], [0, 0, 1, 1], [], []>} : vector<2x128xbf16>, vector<128x512xbf16>, vector<2x512xf32> -> vector<2x512xf32>
    %225 = arith.addf %222, %224 : vector<2x512xf32>
    %226 = vector.extract_strided_slice %225 {offsets = [0, 0], sizes = [2, 128], strides = [1, 1]} : vector<2x512xf32> to vector<2x128xf32>
    %cst_99 = arith.constant 5.000000e-01 : f32
    %227 = vector.broadcast %cst_99 : f32 to vector<2x128xf32>
    %228 = arith.mulf %227, %226 : vector<2x128xf32>
    %229 = math.tanh %228 : vector<2x128xf32>
    %cst_100 = arith.constant 1.000000e+00 : f32
    %230 = vector.broadcast %cst_100 : f32 to vector<2x128xf32>
    %231 = arith.addf %229, %230 : vector<2x128xf32>
    %cst_101 = arith.constant 5.000000e-01 : f32
    %232 = vector.broadcast %cst_101 : f32 to vector<2x128xf32>
    %233 = arith.mulf %232, %231 : vector<2x128xf32>
    %234 = vector.extract_strided_slice %225 {offsets = [0, 128], sizes = [2, 128], strides = [1, 1]} : vector<2x512xf32> to vector<2x128xf32>
    %cst_102 = arith.constant 5.000000e-01 : f32
    %235 = vector.broadcast %cst_102 : f32 to vector<2x128xf32>
    %236 = arith.mulf %235, %234 : vector<2x128xf32>
    %237 = math.tanh %236 : vector<2x128xf32>
    %cst_103 = arith.constant 1.000000e+00 : f32
    %238 = vector.broadcast %cst_103 : f32 to vector<2x128xf32>
    %239 = arith.addf %237, %238 : vector<2x128xf32>
    %cst_104 = arith.constant 5.000000e-01 : f32
    %240 = vector.broadcast %cst_104 : f32 to vector<2x128xf32>
    %241 = arith.mulf %240, %239 : vector<2x128xf32>
    %242 = vector.extract_strided_slice %225 {offsets = [0, 256], sizes = [2, 128], strides = [1, 1]} : vector<2x512xf32> to vector<2x128xf32>
    %243 = math.tanh %242 : vector<2x128xf32>
    %244 = vector.extract_strided_slice %225 {offsets = [0, 384], sizes = [2, 128], strides = [1, 1]} : vector<2x512xf32> to vector<2x128xf32>
    %cst_105 = arith.constant 5.000000e-01 : f32
    %245 = vector.broadcast %cst_105 : f32 to vector<2x128xf32>
    %246 = arith.mulf %245, %244 : vector<2x128xf32>
    %247 = math.tanh %246 : vector<2x128xf32>
    %cst_106 = arith.constant 1.000000e+00 : f32
    %248 = vector.broadcast %cst_106 : f32 to vector<2x128xf32>
    %249 = arith.addf %247, %248 : vector<2x128xf32>
    %cst_107 = arith.constant 5.000000e-01 : f32
    %250 = vector.broadcast %cst_107 : f32 to vector<2x128xf32>
    %251 = arith.mulf %250, %249 : vector<2x128xf32>
    %252 = arith.mulf %241, %211 : vector<2x128xf32>
    %253 = arith.mulf %233, %243 : vector<2x128xf32>
    %254 = arith.addf %252, %253 : vector<2x128xf32>
    %255 = math.tanh %254 : vector<2x128xf32>
    %256 = arith.mulf %251, %255 : vector<2x128xf32>
    %257 = arith.truncf %256 : vector<2x128xf32> to vector<2x128xbf16>
    %258 = arith.index_cast %c3_i32_95 : i32 to index
    %c0_108 = arith.constant 0 : index
    %c0_109 = arith.constant 0 : index
    %259 = vector.load %arg6[%258, %c0_108, %c0_109] : memref<8x2x128xbf16, #tpu.memory_space<vmem>>, vector<1x2x128xbf16>
    %260 = vector.shape_cast %259 : vector<1x2x128xbf16> to vector<2x128xbf16>
    %261 = vector.shape_cast %257 : vector<2x128xbf16> to vector<1x2x128xbf16>
    tpu.vector_store %arg6[%258, %c0_108, %c0_109], %261 {strides = array<i32>} : memref<8x2x128xbf16, #tpu.memory_space<vmem>>, vector<1x2x128xbf16>,
    %c4_i32_110 = arith.constant 4 : i32
    %262 = arith.index_cast %c4_i32_110 : i32 to index
    %c0_111 = arith.constant 0 : index
    %c0_112 = arith.constant 0 : index
    %263 = vector.load %arg7[%262, %c0_111, %c0_112] : memref<8x2x512xbf16, #tpu.memory_space<vmem>>, vector<1x2x512xbf16>
    %264 = vector.shape_cast %263 : vector<1x2x512xbf16> to vector<2x512xbf16>
    %265 = arith.extf %264 : vector<2x512xbf16> to vector<2x512xf32>
    %266 = arith.truncf %256 : vector<2x128xf32> to vector<2x128xbf16>
    %cst_113 = arith.constant dense<0.000000e+00> : vector<2x512xf32>
    %267 = tpu.matmul %266, %87, %cst_113 {dimension_numbers = #tpu.dot_dimension_numbers<[1], [0], [0], [1], [0, 0, 1, 1], [], []>} : vector<2x128xbf16>, vector<128x512xbf16>, vector<2x512xf32> -> vector<2x512xf32>
    %268 = arith.addf %265, %267 : vector<2x512xf32>
    %269 = vector.extract_strided_slice %268 {offsets = [0, 0], sizes = [2, 128], strides = [1, 1]} : vector<2x512xf32> to vector<2x128xf32>
    %cst_114 = arith.constant 5.000000e-01 : f32
    %270 = vector.broadcast %cst_114 : f32 to vector<2x128xf32>
    %271 = arith.mulf %270, %269 : vector<2x128xf32>
    %272 = math.tanh %271 : vector<2x128xf32>
    %cst_115 = arith.constant 1.000000e+00 : f32
    %273 = vector.broadcast %cst_115 : f32 to vector<2x128xf32>
    %274 = arith.addf %272, %273 : vector<2x128xf32>
    %cst_116 = arith.constant 5.000000e-01 : f32
    %275 = vector.broadcast %cst_116 : f32 to vector<2x128xf32>
    %276 = arith.mulf %275, %274 : vector<2x128xf32>
    %277 = vector.extract_strided_slice %268 {offsets = [0, 128], sizes = [2, 128], strides = [1, 1]} : vector<2x512xf32> to vector<2x128xf32>
    %cst_117 = arith.constant 5.000000e-01 : f32
    %278 = vector.broadcast %cst_117 : f32 to vector<2x128xf32>
    %279 = arith.mulf %278, %277 : vector<2x128xf32>
    %280 = math.tanh %279 : vector<2x128xf32>
    %cst_118 = arith.constant 1.000000e+00 : f32
    %281 = vector.broadcast %cst_118 : f32 to vector<2x128xf32>
    %282 = arith.addf %280, %281 : vector<2x128xf32>
    %cst_119 = arith.constant 5.000000e-01 : f32
    %283 = vector.broadcast %cst_119 : f32 to vector<2x128xf32>
    %284 = arith.mulf %283, %282 : vector<2x128xf32>
    %285 = vector.extract_strided_slice %268 {offsets = [0, 256], sizes = [2, 128], strides = [1, 1]} : vector<2x512xf32> to vector<2x128xf32>
    %286 = math.tanh %285 : vector<2x128xf32>
    %287 = vector.extract_strided_slice %268 {offsets = [0, 384], sizes = [2, 128], strides = [1, 1]} : vector<2x512xf32> to vector<2x128xf32>
    %cst_120 = arith.constant 5.000000e-01 : f32
    %288 = vector.broadcast %cst_120 : f32 to vector<2x128xf32>
    %289 = arith.mulf %288, %287 : vector<2x128xf32>
    %290 = math.tanh %289 : vector<2x128xf32>
    %cst_121 = arith.constant 1.000000e+00 : f32
    %291 = vector.broadcast %cst_121 : f32 to vector<2x128xf32>
    %292 = arith.addf %290, %291 : vector<2x128xf32>
    %cst_122 = arith.constant 5.000000e-01 : f32
    %293 = vector.broadcast %cst_122 : f32 to vector<2x128xf32>
    %294 = arith.mulf %293, %292 : vector<2x128xf32>
    %295 = arith.mulf %284, %254 : vector<2x128xf32>
    %296 = arith.mulf %276, %286 : vector<2x128xf32>
    %297 = arith.addf %295, %296 : vector<2x128xf32>
    %298 = math.tanh %297 : vector<2x128xf32>
    %299 = arith.mulf %294, %298 : vector<2x128xf32>
    %300 = arith.truncf %299 : vector<2x128xf32> to vector<2x128xbf16>
    %301 = arith.index_cast %c4_i32_110 : i32 to index
    %c0_123 = arith.constant 0 : index
    %c0_124 = arith.constant 0 : index
    %302 = vector.load %arg6[%301, %c0_123, %c0_124] : memref<8x2x128xbf16, #tpu.memory_space<vmem>>, vector<1x2x128xbf16>
    %303 = vector.shape_cast %302 : vector<1x2x128xbf16> to vector<2x128xbf16>
    %304 = vector.shape_cast %300 : vector<2x128xbf16> to vector<1x2x128xbf16>
    tpu.vector_store %arg6[%301, %c0_123, %c0_124], %304 {strides = array<i32>} : memref<8x2x128xbf16, #tpu.memory_space<vmem>>, vector<1x2x128xbf16>,
    %c5_i32_125 = arith.constant 5 : i32
    %305 = arith.index_cast %c5_i32_125 : i32 to index
    %c0_126 = arith.constant 0 : index
    %c0_127 = arith.constant 0 : index
    %306 = vector.load %arg7[%305, %c0_126, %c0_127] : memref<8x2x512xbf16, #tpu.memory_space<vmem>>, vector<1x2x512xbf16>
    %307 = vector.shape_cast %306 : vector<1x2x512xbf16> to vector<2x512xbf16>
    %308 = arith.extf %307 : vector<2x512xbf16> to vector<2x512xf32>
    %309 = arith.truncf %299 : vector<2x128xf32> to vector<2x128xbf16>
    %cst_128 = arith.constant dense<0.000000e+00> : vector<2x512xf32>
    %310 = tpu.matmul %309, %87, %cst_128 {dimension_numbers = #tpu.dot_dimension_numbers<[1], [0], [0], [1], [0, 0, 1, 1], [], []>} : vector<2x128xbf16>, vector<128x512xbf16>, vector<2x512xf32> -> vector<2x512xf32>
    %311 = arith.addf %308, %310 : vector<2x512xf32>
    %312 = vector.extract_strided_slice %311 {offsets = [0, 0], sizes = [2, 128], strides = [1, 1]} : vector<2x512xf32> to vector<2x128xf32>
    %cst_129 = arith.constant 5.000000e-01 : f32
    %313 = vector.broadcast %cst_129 : f32 to vector<2x128xf32>
    %314 = arith.mulf %313, %312 : vector<2x128xf32>
    %315 = math.tanh %314 : vector<2x128xf32>
    %cst_130 = arith.constant 1.000000e+00 : f32
    %316 = vector.broadcast %cst_130 : f32 to vector<2x128xf32>
    %317 = arith.addf %315, %316 : vector<2x128xf32>
    %cst_131 = arith.constant 5.000000e-01 : f32
    %318 = vector.broadcast %cst_131 : f32 to vector<2x128xf32>
    %319 = arith.mulf %318, %317 : vector<2x128xf32>
    %320 = vector.extract_strided_slice %311 {offsets = [0, 128], sizes = [2, 128], strides = [1, 1]} : vector<2x512xf32> to vector<2x128xf32>
    %cst_132 = arith.constant 5.000000e-01 : f32
    %321 = vector.broadcast %cst_132 : f32 to vector<2x128xf32>
    %322 = arith.mulf %321, %320 : vector<2x128xf32>
    %323 = math.tanh %322 : vector<2x128xf32>
    %cst_133 = arith.constant 1.000000e+00 : f32
    %324 = vector.broadcast %cst_133 : f32 to vector<2x128xf32>
    %325 = arith.addf %323, %324 : vector<2x128xf32>
    %cst_134 = arith.constant 5.000000e-01 : f32
    %326 = vector.broadcast %cst_134 : f32 to vector<2x128xf32>
    %327 = arith.mulf %326, %325 : vector<2x128xf32>
    %328 = vector.extract_strided_slice %311 {offsets = [0, 256], sizes = [2, 128], strides = [1, 1]} : vector<2x512xf32> to vector<2x128xf32>
    %329 = math.tanh %328 : vector<2x128xf32>
    %330 = vector.extract_strided_slice %311 {offsets = [0, 384], sizes = [2, 128], strides = [1, 1]} : vector<2x512xf32> to vector<2x128xf32>
    %cst_135 = arith.constant 5.000000e-01 : f32
    %331 = vector.broadcast %cst_135 : f32 to vector<2x128xf32>
    %332 = arith.mulf %331, %330 : vector<2x128xf32>
    %333 = math.tanh %332 : vector<2x128xf32>
    %cst_136 = arith.constant 1.000000e+00 : f32
    %334 = vector.broadcast %cst_136 : f32 to vector<2x128xf32>
    %335 = arith.addf %333, %334 : vector<2x128xf32>
    %cst_137 = arith.constant 5.000000e-01 : f32
    %336 = vector.broadcast %cst_137 : f32 to vector<2x128xf32>
    %337 = arith.mulf %336, %335 : vector<2x128xf32>
    %338 = arith.mulf %327, %297 : vector<2x128xf32>
    %339 = arith.mulf %319, %329 : vector<2x128xf32>
    %340 = arith.addf %338, %339 : vector<2x128xf32>
    %341 = math.tanh %340 : vector<2x128xf32>
    %342 = arith.mulf %337, %341 : vector<2x128xf32>
    %343 = arith.truncf %342 : vector<2x128xf32> to vector<2x128xbf16>
    %344 = arith.index_cast %c5_i32_125 : i32 to index
    %c0_138 = arith.constant 0 : index
    %c0_139 = arith.constant 0 : index
    %345 = vector.load %arg6[%344, %c0_138, %c0_139] : memref<8x2x128xbf16, #tpu.memory_space<vmem>>, vector<1x2x128xbf16>
    %346 = vector.shape_cast %345 : vector<1x2x128xbf16> to vector<2x128xbf16>
    %347 = vector.shape_cast %343 : vector<2x128xbf16> to vector<1x2x128xbf16>
    tpu.vector_store %arg6[%344, %c0_138, %c0_139], %347 {strides = array<i32>} : memref<8x2x128xbf16, #tpu.memory_space<vmem>>, vector<1x2x128xbf16>,
    %c6_i32_140 = arith.constant 6 : i32
    %348 = arith.index_cast %c6_i32_140 : i32 to index
    %c0_141 = arith.constant 0 : index
    %c0_142 = arith.constant 0 : index
    %349 = vector.load %arg7[%348, %c0_141, %c0_142] : memref<8x2x512xbf16, #tpu.memory_space<vmem>>, vector<1x2x512xbf16>
    %350 = vector.shape_cast %349 : vector<1x2x512xbf16> to vector<2x512xbf16>
    %351 = arith.extf %350 : vector<2x512xbf16> to vector<2x512xf32>
    %352 = arith.truncf %342 : vector<2x128xf32> to vector<2x128xbf16>
    %cst_143 = arith.constant dense<0.000000e+00> : vector<2x512xf32>
    %353 = tpu.matmul %352, %87, %cst_143 {dimension_numbers = #tpu.dot_dimension_numbers<[1], [0], [0], [1], [0, 0, 1, 1], [], []>} : vector<2x128xbf16>, vector<128x512xbf16>, vector<2x512xf32> -> vector<2x512xf32>
    %354 = arith.addf %351, %353 : vector<2x512xf32>
    %355 = vector.extract_strided_slice %354 {offsets = [0, 0], sizes = [2, 128], strides = [1, 1]} : vector<2x512xf32> to vector<2x128xf32>
    %cst_144 = arith.constant 5.000000e-01 : f32
    %356 = vector.broadcast %cst_144 : f32 to vector<2x128xf32>
    %357 = arith.mulf %356, %355 : vector<2x128xf32>
    %358 = math.tanh %357 : vector<2x128xf32>
    %cst_145 = arith.constant 1.000000e+00 : f32
    %359 = vector.broadcast %cst_145 : f32 to vector<2x128xf32>
    %360 = arith.addf %358, %359 : vector<2x128xf32>
    %cst_146 = arith.constant 5.000000e-01 : f32
    %361 = vector.broadcast %cst_146 : f32 to vector<2x128xf32>
    %362 = arith.mulf %361, %360 : vector<2x128xf32>
    %363 = vector.extract_strided_slice %354 {offsets = [0, 128], sizes = [2, 128], strides = [1, 1]} : vector<2x512xf32> to vector<2x128xf32>
    %cst_147 = arith.constant 5.000000e-01 : f32
    %364 = vector.broadcast %cst_147 : f32 to vector<2x128xf32>
    %365 = arith.mulf %364, %363 : vector<2x128xf32>
    %366 = math.tanh %365 : vector<2x128xf32>
    %cst_148 = arith.constant 1.000000e+00 : f32
    %367 = vector.broadcast %cst_148 : f32 to vector<2x128xf32>
    %368 = arith.addf %366, %367 : vector<2x128xf32>
    %cst_149 = arith.constant 5.000000e-01 : f32
    %369 = vector.broadcast %cst_149 : f32 to vector<2x128xf32>
    %370 = arith.mulf %369, %368 : vector<2x128xf32>
    %371 = vector.extract_strided_slice %354 {offsets = [0, 256], sizes = [2, 128], strides = [1, 1]} : vector<2x512xf32> to vector<2x128xf32>
    %372 = math.tanh %371 : vector<2x128xf32>
    %373 = vector.extract_strided_slice %354 {offsets = [0, 384], sizes = [2, 128], strides = [1, 1]} : vector<2x512xf32> to vector<2x128xf32>
    %cst_150 = arith.constant 5.000000e-01 : f32
    %374 = vector.broadcast %cst_150 : f32 to vector<2x128xf32>
    %375 = arith.mulf %374, %373 : vector<2x128xf32>
    %376 = math.tanh %375 : vector<2x128xf32>
    %cst_151 = arith.constant 1.000000e+00 : f32
    %377 = vector.broadcast %cst_151 : f32 to vector<2x128xf32>
    %378 = arith.addf %376, %377 : vector<2x128xf32>
    %cst_152 = arith.constant 5.000000e-01 : f32
    %379 = vector.broadcast %cst_152 : f32 to vector<2x128xf32>
    %380 = arith.mulf %379, %378 : vector<2x128xf32>
    %381 = arith.mulf %370, %340 : vector<2x128xf32>
    %382 = arith.mulf %362, %372 : vector<2x128xf32>
    %383 = arith.addf %381, %382 : vector<2x128xf32>
    %384 = math.tanh %383 : vector<2x128xf32>
    %385 = arith.mulf %380, %384 : vector<2x128xf32>
    %386 = arith.truncf %385 : vector<2x128xf32> to vector<2x128xbf16>
    %387 = arith.index_cast %c6_i32_140 : i32 to index
    %c0_153 = arith.constant 0 : index
    %c0_154 = arith.constant 0 : index
    %388 = vector.load %arg6[%387, %c0_153, %c0_154] : memref<8x2x128xbf16, #tpu.memory_space<vmem>>, vector<1x2x128xbf16>
    %389 = vector.shape_cast %388 : vector<1x2x128xbf16> to vector<2x128xbf16>
    %390 = vector.shape_cast %386 : vector<2x128xbf16> to vector<1x2x128xbf16>
    tpu.vector_store %arg6[%387, %c0_153, %c0_154], %390 {strides = array<i32>} : memref<8x2x128xbf16, #tpu.memory_space<vmem>>, vector<1x2x128xbf16>,
    %c7_i32_155 = arith.constant 7 : i32
    %391 = arith.index_cast %c7_i32_155 : i32 to index
    %c0_156 = arith.constant 0 : index
    %c0_157 = arith.constant 0 : index
    %392 = vector.load %arg7[%391, %c0_156, %c0_157] : memref<8x2x512xbf16, #tpu.memory_space<vmem>>, vector<1x2x512xbf16>
    %393 = vector.shape_cast %392 : vector<1x2x512xbf16> to vector<2x512xbf16>
    %394 = arith.extf %393 : vector<2x512xbf16> to vector<2x512xf32>
    %395 = arith.truncf %385 : vector<2x128xf32> to vector<2x128xbf16>
    %cst_158 = arith.constant dense<0.000000e+00> : vector<2x512xf32>
    %396 = tpu.matmul %395, %87, %cst_158 {dimension_numbers = #tpu.dot_dimension_numbers<[1], [0], [0], [1], [0, 0, 1, 1], [], []>} : vector<2x128xbf16>, vector<128x512xbf16>, vector<2x512xf32> -> vector<2x512xf32>
    %397 = arith.addf %394, %396 : vector<2x512xf32>
    %398 = vector.extract_strided_slice %397 {offsets = [0, 0], sizes = [2, 128], strides = [1, 1]} : vector<2x512xf32> to vector<2x128xf32>
    %cst_159 = arith.constant 5.000000e-01 : f32
    %399 = vector.broadcast %cst_159 : f32 to vector<2x128xf32>
    %400 = arith.mulf %399, %398 : vector<2x128xf32>
    %401 = math.tanh %400 : vector<2x128xf32>
    %cst_160 = arith.constant 1.000000e+00 : f32
    %402 = vector.broadcast %cst_160 : f32 to vector<2x128xf32>
    %403 = arith.addf %401, %402 : vector<2x128xf32>
    %cst_161 = arith.constant 5.000000e-01 : f32
    %404 = vector.broadcast %cst_161 : f32 to vector<2x128xf32>
    %405 = arith.mulf %404, %403 : vector<2x128xf32>
    %406 = vector.extract_strided_slice %397 {offsets = [0, 128], sizes = [2, 128], strides = [1, 1]} : vector<2x512xf32> to vector<2x128xf32>
    %cst_162 = arith.constant 5.000000e-01 : f32
    %407 = vector.broadcast %cst_162 : f32 to vector<2x128xf32>
    %408 = arith.mulf %407, %406 : vector<2x128xf32>
    %409 = math.tanh %408 : vector<2x128xf32>
    %cst_163 = arith.constant 1.000000e+00 : f32
    %410 = vector.broadcast %cst_163 : f32 to vector<2x128xf32>
    %411 = arith.addf %409, %410 : vector<2x128xf32>
    %cst_164 = arith.constant 5.000000e-01 : f32
    %412 = vector.broadcast %cst_164 : f32 to vector<2x128xf32>
    %413 = arith.mulf %412, %411 : vector<2x128xf32>
    %414 = vector.extract_strided_slice %397 {offsets = [0, 256], sizes = [2, 128], strides = [1, 1]} : vector<2x512xf32> to vector<2x128xf32>
    %415 = math.tanh %414 : vector<2x128xf32>
    %416 = vector.extract_strided_slice %397 {offsets = [0, 384], sizes = [2, 128], strides = [1, 1]} : vector<2x512xf32> to vector<2x128xf32>
    %cst_165 = arith.constant 5.000000e-01 : f32
    %417 = vector.broadcast %cst_165 : f32 to vector<2x128xf32>
    %418 = arith.mulf %417, %416 : vector<2x128xf32>
    %419 = math.tanh %418 : vector<2x128xf32>
    %cst_166 = arith.constant 1.000000e+00 : f32
    %420 = vector.broadcast %cst_166 : f32 to vector<2x128xf32>
    %421 = arith.addf %419, %420 : vector<2x128xf32>
    %cst_167 = arith.constant 5.000000e-01 : f32
    %422 = vector.broadcast %cst_167 : f32 to vector<2x128xf32>
    %423 = arith.mulf %422, %421 : vector<2x128xf32>
    %424 = arith.mulf %413, %383 : vector<2x128xf32>
    %425 = arith.mulf %405, %415 : vector<2x128xf32>
    %426 = arith.addf %424, %425 : vector<2x128xf32>
    %427 = math.tanh %426 : vector<2x128xf32>
    %428 = arith.mulf %423, %427 : vector<2x128xf32>
    %429 = arith.truncf %428 : vector<2x128xf32> to vector<2x128xbf16>
    %430 = arith.index_cast %c7_i32_155 : i32 to index
    %c0_168 = arith.constant 0 : index
    %c0_169 = arith.constant 0 : index
    %431 = vector.load %arg6[%430, %c0_168, %c0_169] : memref<8x2x128xbf16, #tpu.memory_space<vmem>>, vector<1x2x128xbf16>
    %432 = vector.shape_cast %431 : vector<1x2x128xbf16> to vector<2x128xbf16>
    %433 = vector.shape_cast %429 : vector<2x128xbf16> to vector<1x2x128xbf16>
    tpu.vector_store %arg6[%430, %c0_168, %c0_169], %433 {strides = array<i32>} : memref<8x2x128xbf16, #tpu.memory_space<vmem>>, vector<1x2x128xbf16>,
    %c8_i32_170 = arith.constant 8 : i32
    %c0_171 = arith.constant 0 : index
    %c0_172 = arith.constant 0 : index
    %434 = vector.load %arg8[%c0_171, %c0_172] : memref<2x128xf32, #tpu.memory_space<vmem>>, vector<2x128xf32>
    tpu.vector_store %arg8[%c0_171, %c0_172], %428 {strides = array<i32>} : memref<2x128xf32, #tpu.memory_space<vmem>>, vector<2x128xf32>,
    %c0_173 = arith.constant 0 : index
    %c0_174 = arith.constant 0 : index
    %435 = vector.load %arg9[%c0_173, %c0_174] : memref<2x128xf32, #tpu.memory_space<vmem>>, vector<2x128xf32>
    tpu.vector_store %arg9[%c0_173, %c0_174], %426 {strides = array<i32>} : memref<2x128xf32, #tpu.memory_space<vmem>>, vector<2x128xf32>,
    return
  }
  func.func @transform_0(%arg0: i32, %arg1: i32) -> (i32, i32, i32) {
    %c0_i32 = arith.constant 0 : i32
    %c0_i32_0 = arith.constant 0 : i32
    return %arg1, %arg0, %c0_i32 : i32, i32, i32
  }
  func.func @transform_1(%arg0: i32, %arg1: i32) -> (i32, i32) {
    %c0_i32 = arith.constant 0 : i32
    %c0_i32_0 = arith.constant 0 : i32
    %c0_i32_1 = arith.constant 0 : i32
    return %c0_i32, %c0_i32_0 : i32, i32
  }
  func.func @transform_2(%arg0: i32, %arg1: i32) -> (i32, i32) {
    %c0_i32 = arith.constant 0 : i32
    %c0_i32_0 = arith.constant 0 : i32
    %c0_i32_1 = arith.constant 0 : i32
    return %c0_i32, %c0_i32_0 : i32, i32
  }
  func.func @transform_3(%arg0: i32, %arg1: i32) -> (i32, i32) {
    %c0_i32 = arith.constant 0 : i32
    %c0_i32_0 = arith.constant 0 : i32
    %c0_i32_1 = arith.constant 0 : i32
    return %c0_i32, %c0_i32_0 : i32, i32
  }
  func.func @transform_4(%arg0: i32, %arg1: i32) -> (i32, i32, i32) {
    %c0_i32 = arith.constant 0 : i32
    %c0_i32_0 = arith.constant 0 : i32
    return %arg1, %arg0, %c0_i32 : i32, i32, i32
  }
}

</mosaic_0001>

<bundles_post_ra>
// kernel: tpu_custom_call.1
= control target key start
LH: loop header
LB: loop body
LE: loop exit
PB: predicated region body
PF: predicated region fallthrough
CT: control target
= control target key end

     0   :  { %7 = vsyncpa [#allocation3], 0  ;;  %s690_s0 = inlined_call_operand.hbm [shape: f32[16,128], index: 0, kind: input, shape index: {}]   ;;  %s691_s1 = inlined_call_operand.hbm [shape: f32[8,128], index: 1, kind: input, shape index: {}]   ;;  %s692_s2 = inlined_call_operand.hbm [shape: f32[16,128], index: 2, kind: output, shape index: {}]  }
   0x1   :  { %9 = vsyncpa [#allocation3 + $0x1], 0 }
   0x2   :  { %10 = vsyncpa [#allocation6], 0 }
   0x3   :  { %11 = vsyncpa [#allocation4], 0 }
   0x4   :  { %13 = vsyncpa [#allocation4 + $0x1], 0  ;;  %s489_s9 = smov 0   ;;  %s491_s10 = smov 0  }
   0x5   :  { %s493_s11 = smov 0   ;;  %s495_s12 = smov 0  }
   0x6 LB: > { %s510_s13 = sadd.s32 4294967295, %s469_s12   ;;  %s270_s14 = sadd.s32 4294967294, %s469_s12   ;;  %s469_s12 = sphi %s495_s12, %s716_s12   ;;  %s465_s11 = sphi %s493_s11, %s715_s11   ;;  %s461_s10 = sphi %s491_s10, %s714_s10   ;;  %s457_s9 = sphi %s489_s9, %s713_s9  }
   0x7   : > { %p39_p0 = scmp.ne.s32.totalorder %s461_s10, %s457_s9  ;;  %p693_p1 = scmp.eq.s32.totalorder %s510_s13, 0 }
   0x8   : > { %p90_p3 = scmp.eq.s32.totalorder %s270_s14, 1  ;;  %p271_p5 = scmp.ge.s32.totalorder %s469_s12, 1 }
   0x9   : > { %p519_p4 = por %p693_p1, %p39_p0  ;;  %p97_p7 = scmp.lt.s32.totalorder %s469_s12, 3 }
   0xa   : > { %p524_p6 = por %p90_p3, %p39_p0  ;;  %s471_s18 = smov [#allocation5]  }
   0xb   : > { %s696_s15 = scalar_select %p519_p4, 1, 0 }
   0xc   : > { %s697_s16 = scalar_select %p524_p6, 1, 0 }
   0xd   : > { %p529_p8 = pnand %p271_p5, %p97_p7  ;;  %s110_s19 = sshll.u32 %s471_s18, 4  ;;  %s111_s19 = int_to_ptr.vmem [resolvable:$true] %s110_s19 }
   0xe   : > { %s537_s20 = sadd.s32 1, %s469_s12   ;;  %s26_s24 = sadd.s32 1, %s465_s11 }
   0xf   : > { %s698_s17 = scalar_select %p529_p8, 1, 0 }
  0x10   : > { %p292_p10 = pneg %p529_p8  ;;  %s23_s22 = ssub.s32 %s469_s12, %s537_s20 }
  0x11   : > { %p547_p12 = scmp.eq.s32.totalorder %s23_s22, 0  ;;  %s341_s27 = scalar_lea.hbm %s691_s1, 128 }
  0x12   : > { %p541_p11 = pnand %p292_p10, %p693_p1  ;;  %p342_p0 = scmp.ne.s32.totalorder %s691_s1, %s341_s27 }
  0x13   : > { %s700_s23 = scalar_select %p547_p12, 1, 0 }
  0x14   : > { %p343_p3 = pneg %p541_p11  ;;  %p348_p10 = scmp.lt.u32.totalorder %s341_s27, %s691_s1 }
  0x16   : > { %p344_p5 = pnand %p343_p3, %p342_p0 }
  0x18   : > { %p345_p7 = pneg %p344_p5 }
  0x1a   : > { %p350_p9 = pnand %p348_p10, %p345_p7 }
  0x1c   : > { %353 = shalt.err (!%p350_p9)
}
  0x1d   : > { %s354_s4 = scalar_lea.vmem %s111_s19, 128  ;;  %p362_p6 = scmp.lt.s32.totalorder %s111_s19, %s111_s19 }
  0x1e   : > { %p355_p1 = scmp.ne.s32.totalorder %s111_s19, %s354_s4  ;;  %p363_p4 = scmp.lt.s32.totalorder %s354_s4, %s354_s4 }
  0x20   : > { %p357_p2 = pnand %p355_p1, %p343_p3  ;;  %p364_p8 = por %p363_p4, %p362_p6 }
  0x22   : > { %p358_p13 = pneg %p357_p2 }
  0x24   : > { %p365_p12 = pnand %p364_p8, %p358_p13 }
  0x26   : > { %368 = shalt.err (!%p365_p12)
}
  0x27   : > { %295 = dma.hbm_to_vmem [thread:$0]  (!%p541_p11), %s691_s1, 128, %s111_s19, [#allocation6]  }
  0x28   : > { %p701_p1 = scmp.ne.s32.totalorder %s700_s23, 0  ;;  %p34_p2 = scmp.eq.s32.totalorder %s469_s12, 0 }
  0x29   : > { %p702_p4 = scmp.ne.s32.totalorder %s465_s11, %s461_s10  ;;  %p703_p6 = scmp.eq.s32.totalorder %s510_s13, 1 }
  0x2a   : > { %s573_s7 = scalar_select %p701_p1, %s465_s11, %s26_s24  }
  0x2b   : > { %p581_p8 = por %p703_p6, %p702_p4  ;;  %p305_p9 = scmp.lt.s32.totalorder %s469_s12, 2 }
  0x2c   : > { %s121_s14 = sand.u32 1, %s465_s11   ;;  %p705_p12 = pmov %p702_p4 }
  0x2d   : > { %s274_s18 = sshll.u32 %s121_s14, 3  ;;  %s275_s21 = sshll.u32 %s469_s12, 7 }
  0x2e   : > { %p35_p13 = por %p34_p2, %p705_p12  ;;  %s594_s19 = scalar_lea.hbm %s690_s0, %s275_s21 }
  0x2f   : > { %s125_s23 = scalar_lea.vmem [#allocation2], %s274_s18  ;;  %s122_s27 = scalar_lea.sflag [#allocation3], %s121_s14 }
  0x30   : > { %s132_s24 = sshll.u32 %s125_s23, 4  ;;  %p596_p11 = pnand %p305_p9, %p35_p13  ;;  %s600_s24 = int_to_ptr.vmem [resolvable:$true] %s132_s24 }
  0x31   : > { %s369_s28 = scalar_lea.hbm %s594_s19, 128  ;;  %s374_s3 = scalar_lea.hbm %s690_s0, 256 }
  0x32   : > { %p370_p0 = scmp.ne.s32.totalorder %s594_s19, %s369_s28  ;;  %p371_p3 = pneg %p596_p11 }
  0x33   : > { %p375_p10 = scmp.lt.u32.totalorder %s594_s19, %s690_s0  ;;  %p376_p1 = scmp.lt.u32.totalorder %s374_s3, %s369_s28 }
  0x34   : > { %p372_p5 = pnand %p371_p3, %p370_p0  ;;  %p378_p4 = scmp.lt.u32.totalorder %s369_s28, %s594_s19 }
  0x35   : > { %p377_p2 = por %p376_p1, %p375_p10 }
  0x36   : > { %p373_p7 = pneg %p372_p5 }
  0x37   : > { %p379_p6 = por %p378_p4, %p377_p2 }
  0x39   : > { %p380_p9 = pnand %p379_p6, %p373_p7 }
  0x3b   : > { %383 = shalt.err (!%p380_p9)
}
  0x3c   : > { %s384_s6 = scalar_lea.vmem %s600_s24, 128  ;;  %s472_s14 = smov [#allocation2]  }
  0x3d   : > { %p385_p12 = scmp.ne.s32.totalorder %s600_s24, %s384_s6  ;;  %s389_s18 = sshll.u32 %s472_s14, 4  ;;  %s390_s18 = int_to_ptr.vmem [resolvable:$false] %s389_s18 }
  0x3e   : > { %s391_s21 = scalar_lea.vmem %s390_s18, 256  ;;  %p392_p5 = scmp.lt.s32.totalorder %s600_s24, %s390_s18 }
  0x3f   : > { %p387_p13 = pnand %p385_p12, %p371_p3  ;;  %p393_p10 = scmp.lt.s32.totalorder %s391_s21, %s384_s6 }
  0x41   : > { %p388_p0 = pneg %p387_p13  ;;  %p394_p1 = por %p393_p10, %p392_p5 }
  0x43   : > { %p395_p2 = pnand %p394_p1, %p388_p0 }
  0x45   : > { %398 = shalt.err (!%p395_p2)
}
  0x46   : > { %299 = dma.hbm_to_vmem [thread:$0]  (!%p596_p11), %s594_s19, 128, %s600_s24, %s122_s27  }
  0x47   : > { %p707_p7 = scmp.ne.s32.totalorder %s698_s17, 0 }
  0x48   : > { %s630_s22 = sand.u32 (!%p707_p7), 1, %s461_s10   ;;  %p708_p3 = scmp.ne.s32.totalorder (!%p707_p7), %s696_s15, 0 }
  0x49   : > { %141 = sbr.rel (%p707_p7) target bundleno = 109 (0x6d), region = 28  ;;  %s277_s25 = sshll.u32 (!%p707_p7), %s630_s22, 3 }
  0x4a   : > { %s144_s23 = scalar_lea.sflag (!%p707_p7), [#allocation3], %s630_s22  ;;  %s147_s28 = scalar_lea.vmem (!%p707_p7), [#allocation2], %s277_s25 }
  0x50   : > { %444 = dma.done.wait (%p708_p3), %s144_s23, 128  }
  0x51   : > { %446 = vsyncadd (%p708_p3), %s144_s23, 4294967168  ;;  %p709_p4 = scmp.eq.s32.totalorder %s510_s13, 0 }
  0x53   : > { %448 = dma.done.wait (%p709_p4), [#allocation6], 128   ;;  %p710_p11 = pmov %p709_p4 }
  0x54   : > { %s171_s17 = scalar_lea.vmem [#allocation7], %s277_s25  ;;  %s281_s24 = sshll.u32 %s510_s13, 7  ;;  %v172_v0 = vld [vmem:[%s147_s28] sm:$0xff]  ;;  %v173_v1 = vld [vmem:[#allocation5] sm:$0xff] }
  0x55   : > { %450 = vsyncadd (%p710_p11), [#allocation6], 4294967168  ;;  %s190_s19 = sshll.u32 %s171_s17, 4  ;;  %v174_v2 = vadd.f32 %v173_v1, %v172_v0  ;;  %s648_s27 = scalar_lea.hbm %s692_s2, %s281_s24  ;;  %s643_s19 = int_to_ptr.vmem [resolvable:$true] %s190_s19 }
  0x56   : > { %s177_s29 = scalar_lea.sflag [#allocation4], %s630_s22  ;;  %s399_s30 = scalar_lea.vmem %s643_s19, 128 }
  0x57   : > { %175 = vst [vmem:[%s171_s17] sm:$0xff] %v174_v2  ;;  %p400_p6 = scmp.ne.s32.totalorder %s643_s19, %s399_s30  ;;  %s473_s13 = smov [#allocation7]  }
  0x58   : > { %s403_s3 = sshll.u32 %s473_s13, 4  ;;  %s404_s3 = int_to_ptr.vmem [resolvable:$false] %s403_s3 }
  0x59   : > { %p401_p9 = pnand %p400_p6, %p581_p8  ;;  %s405_s4 = scalar_lea.vmem %s404_s3, 256 }
  0x5a   : > { %p406_p13 = scmp.lt.s32.totalorder %s643_s19, %s404_s3  ;;  %p407_p0 = scmp.lt.s32.totalorder %s405_s4, %s399_s30 }
  0x5b   : > { %p402_p12 = pneg %p401_p9 }
  0x5c   : > { %p408_p5 = por %p407_p0, %p406_p13 }
  0x5e   : > { %p409_p10 = pnand %p408_p5, %p402_p12 }
  0x60   : > { %412 = shalt.err (!%p409_p10)
}
  0x61   : > { %s413_s5 = scalar_lea.hbm %s648_s27, 128  ;;  %s417_s18 = scalar_lea.hbm %s692_s2, 256 }
  0x62   : > { %p414_p1 = scmp.ne.s32.totalorder %s648_s27, %s413_s5  ;;  %p418_p3 = scmp.lt.u32.totalorder %s648_s27, %s692_s2 }
  0x63   : > { %p419_p4 = scmp.lt.u32.totalorder %s417_s18, %s413_s5  ;;  %p421_p6 = scmp.lt.u32.totalorder %s413_s5, %s648_s27 }
  0x64   : > { %p415_p2 = pnand %p414_p1, %p581_p8 }
  0x65   : > { %p420_p11 = por %p419_p4, %p418_p3 }
  0x66   : > { %p416_p7 = pneg %p415_p2 }
  0x67   : > { %p422_p9 = por %p421_p6, %p420_p11 }
  0x69   : > { %p423_p12 = pnand %p422_p9, %p416_p7 }
  0x6b   : > { %426 = shalt.err (!%p423_p12)
}
  0x6c   : > { %290 = dma.vmem_to_hbm [thread:$0]  (%p581_p8), %s643_s19, 128, %s648_s27, %s177_s29  }
  0x6d PF: > { %s202_s25 = sand.u32 1, %s457_s9   ;;  %p711_p13 = scmp.ne.s32.totalorder %s697_s16, 0 }
  0x6e   : > { %p712_p0 = scmp.ge.s32.totalorder %s469_s12, 2  ;;  %s203_s23 = scalar_lea.sflag [#allocation4], %s202_s25 }
  0x70   : > { %p301_p5 = pnand %p712_p0, %p711_p13 }
  0x72   : > { %452 = dma.done.wait (!%p301_p5), %s203_s23, 128  }
  0x73   : > { %454 = vsyncadd (!%p301_p5), %s203_s23, 4294967168  ;;  %p16_p10 = scmp.ge.s32.totalorder %s537_s20, 4   ;;  %s713_s9 = smov %s461_s10 }
  0x74   : > { %s714_s10 = smov %s465_s11  ;;  %s715_s11 = smov %s573_s7 }
  0x75   : > { %s716_s12 = smov %s537_s20  ;;  %18 = sbr.rel (!%p16_p10) target bundleno = 6 (0x6), region = 77 }
  0x7c   :  { %208 = vsyncpa [#allocation3], 1 }
  0x7d   :  { %210 = vsyncpa [#allocation3 + $0x1], 1 }
  0x7e   :  { %211 = vsyncpa [#allocation6], 1 }
  0x7f   :  { %212 = vsyncpa [#allocation4], 1 }
  0x80   :  { %214 = vsyncpa [#allocation4 + $0x1], 1 }

// kernel: encoder_forward.3
= control target key start
LH: loop header
LB: loop body
LE: loop exit
PB: predicated region body
PF: predicated region fallthrough
CT: control target
= control target key end

     0   :  { %9 = vsyncpa [#allocation6], 0  ;;  %s2823_s15 = smov [#allocation5]   ;;  %s3870_s0 = inlined_call_operand.vmem [shape: bf16[8,2,128], index: 0, kind: input, shape index: {}]   ;;  %s3871_s1 = inlined_call_operand.vmem [shape: bf16[128,512], index: 1, kind: input, shape index: {}]   ;;  %s3872_s2 = inlined_call_operand.hbm [shape: bf16[128,512], index: 2, kind: input, shape index: {}]   ;;  %s3873_s3 = inlined_call_operand.vmem [shape: f32[1,512], index: 3, kind: input, shape index: {}]   ;;  %s3874_s4 = inlined_call_operand.vmem [shape: f32[8,2,128], index: 4, kind: output, shape index: {}]  }
   0x1   :  { %s19_s16 = sshll.u32 %s2823_s15, 4  ;;  %s2799_s19 = scalar_lea.hbm %s3872_s2, 4096  ;;  %s20_s16 = int_to_ptr.vmem [resolvable:$true] %s19_s16 }
   0x2   :  { %p2800_p0 = scmp.ne.s32.totalorder %s3872_s2, %s2799_s19  ;;  %p2803_p1 = scmp.lt.u32.totalorder %s2799_s19, %s3872_s2 }
   0x4   :  { %p2805_p2 = pnand %p2803_p1, %p2800_p0 }
   0x6   :  { %2808 = shalt.err (!%p2805_p2)
}
   0x7   :  { %s2809_s24 = scalar_lea.vmem %s20_s16, 4096  ;;  %p2814_p4 = scmp.lt.s32.totalorder %s20_s16, %s20_s16 }
   0x8   :  { %p2810_p3 = scmp.ne.s32.totalorder %s20_s16, %s2809_s24  ;;  %p2815_p5 = scmp.lt.s32.totalorder %s2809_s24, %s2809_s24 }
   0xa   :  { %p2816_p6 = por %p2815_p5, %p2814_p4 }
   0xc   :  { %p2817_p7 = pnand %p2816_p6, %p2810_p3 }
   0xe   :  { %2820 = shalt.err (!%p2817_p7)
}
   0xf   :  { %s2824_s25 = smov 256   ;;  %s2825_s26 = smov 16  }
  0x10   :  { %25 = dma.hbm_to_vmem [thread:$0]  %s3872_s2, 4096, %s20_s16, [#allocation6], %s2824_s25, %s2824_s25, %s2825_s26  }
  0x11   :  { %2821 = dma.done.wait [#allocation6], 4096  }
  0x12   :  { %2822 = vsyncadd [#allocation6], 4294963200  ;;  %v2826_v0 = vmov 0   ;;  %v2872_v1 = vld [vmem:[%s3871_s1 + $0x4] ss:$16 sps:$4 sm:$0xff]   ;;  %v2827_v37 = vmov 0.0   ;;  %v72_v41 = vlaneseq }
  0x13   :  { %285 = vmatprep.mubr.bf16.mxu0 %v2826_v0  ;;  %326 = vmatprep.mubr.bf16.mxu1 %v2826_v0  ;;  %v2877_v2 = vld [vmem:[%s3871_s1 + $0xc] ss:$16 sps:$4 sm:$0xff]   ;;  %v2883_v3 = vld [vmem:[%s3871_s1] ss:$16 sps:$4 sm:$0xff]   ;;  %v2888_v4 = vld [vmem:[%s3871_s1 + $0x8] ss:$16 sps:$4 sm:$0xff]  }
  0x14   :  { %253 = vmatprep.subr.bf16.mxu0 %v2872_v1  ;;  %294 = vmatprep.subr.bf16.mxu1 %v2877_v2  ;;  %v2894_v5 = vld [vmem:[%s3871_s1 + $0x24] ss:$16 sps:$4 sm:$0xff]   ;;  %v2901_v6 = vld [vmem:[%s3871_s1 + $0x2c] ss:$16 sps:$4 sm:$0xff]   ;;  %v2906_v7 = vld [vmem:[%s3871_s1 + $0x20] ss:$16 sps:$4 sm:$0xff]  }
  0x15   :  { %254 = vmatpush1.bf16.msra.mxu0 %v2883_v3  ;;  %295 = vmatpush1.bf16.msra.mxu1 %v2888_v4  ;;  %v2912_v8 = vld [vmem:[%s3871_s1 + $0x28] ss:$16 sps:$4 sm:$0xff]   ;;  %v2918_v9 = vld [vmem:[%s3871_s1 + $0x44] ss:$16 sps:$4 sm:$0xff]   ;;  %v2923_v10 = vld [vmem:[%s3871_s1 + $0x4c] ss:$16 sps:$4 sm:$0xff]  }
  0x16   :  { %255 = vmatprep.subr.bf16.mxu0 %v2894_v5  ;;  %296 = vmatprep.subr.bf16.mxu1 %v2901_v6  ;;  %v2928_v11 = vld [vmem:[%s3871_s1 + $0x40] ss:$16 sps:$4 sm:$0xff]   ;;  %v2933_v12 = vld [vmem:[%s3871_s1 + $0x48] ss:$16 sps:$4 sm:$0xff]   ;;  %v2940_v13 = vld [vmem:[%s3871_s1 + $0x64] ss:$16 sps:$4 sm:$0xff]  }
  0x17   :  { %v2947_v14 = vld [vmem:[%s3871_s1 + $0x6c] ss:$16 sps:$4 sm:$0xff]   ;;  %v2952_v15 = vld [vmem:[%s3871_s1 + $0x60] ss:$16 sps:$4 sm:$0xff]   ;;  %v2959_v16 = vld [vmem:[%s3871_s1 + $0x68] ss:$16 sps:$4 sm:$0xff]  }
  0x18   :  { %v2964_v17 = vld [vmem:[%s3871_s1 + $0x84] ss:$16 sps:$4 sm:$0xff]   ;;  %v2971_v18 = vld [vmem:[%s3871_s1 + $0x8c] ss:$16 sps:$4 sm:$0xff]   ;;  %v2976_v19 = vld [vmem:[%s3871_s1 + $0x80] ss:$16 sps:$4 sm:$0xff]  }
  0x19   :  { %256 = vmatpush1.bf16.msra.mxu0 %v2906_v7  ;;  %297 = vmatpush1.bf16.msra.mxu1 %v2912_v8  ;;  %v2981_v20 = vld [vmem:[%s3871_s1 + $0x88] ss:$16 sps:$4 sm:$0xff]   ;;  %v2988_v21 = vld [vmem:[%s3871_s1 + $0xa4] ss:$16 sps:$4 sm:$0xff]   ;;  %v2995_v22 = vld [vmem:[%s3871_s1 + $0xac] ss:$16 sps:$4 sm:$0xff]  }
  0x1a   :  { %257 = vmatprep.subr.bf16.mxu0 %v2918_v9  ;;  %298 = vmatprep.subr.bf16.mxu1 %v2923_v10  ;;  %v3002_v23 = vld [vmem:[%s3871_s1 + $0xa0] ss:$16 sps:$4 sm:$0xff]   ;;  %v3007_v24 = vld [vmem:[%s3871_s1 + $0xa8] ss:$16 sps:$4 sm:$0xff]   ;;  %v3014_v25 = vld [vmem:[%s3871_s1 + $0xc4] ss:$16 sps:$4 sm:$0xff]  }
  0x1b   :  { %v3019_v26 = vld [vmem:[%s3871_s1 + $0xcc] ss:$16 sps:$4 sm:$0xff]   ;;  %v3024_v27 = vld [vmem:[%s3871_s1 + $0xc0] ss:$16 sps:$4 sm:$0xff]   ;;  %v3029_v28 = vld [vmem:[%s3871_s1 + $0xc8] ss:$16 sps:$4 sm:$0xff]  }
  0x1c   :  { %v3034_v29 = vld [vmem:[%s3871_s1 + $0xe4] ss:$16 sps:$4 sm:$0xff]   ;;  %v3039_v30 = vld [vmem:[%s3871_s1 + $0xec] ss:$16 sps:$4 sm:$0xff]   ;;  %v3048_v31 = vld [vmem:[%s3871_s1 + $0xe0] ss:$16 sps:$4 sm:$0xff]  }
  0x1d   :  { %258 = vmatpush1.bf16.msra.mxu0 %v2928_v11  ;;  %299 = vmatpush1.bf16.msra.mxu1 %v2933_v12  ;;  %v3053_v32 = vld [vmem:[%s3871_s1 + $0xe8] ss:$16 sps:$4 sm:$0xff]   ;;  %v92_v33 = vld [vmem:[%s3870_s0] sm:$0x1]  ;;  %v2517_v34 = vld [vmem:[%s3870_s0 + $0x1] sm:$0x1] }
  0x1e   :  { %259 = vmatprep.subr.bf16.mxu0 %v2940_v13  ;;  %300 = vmatprep.subr.bf16.mxu1 %v2947_v14  ;;  %v2521_v35 = vld [vmem:[%s3870_s0 + $0x2] sm:$0x1]  ;;  %v2525_v36 = vld [vmem:[%s3870_s0 + $0x3] sm:$0x1]  ;;  %36 = vst [vmem:[#allocation3] sm:$0x3] %v2827_v37 }
  0x1f   :  { %37 = vst [vmem:[#allocation4] sm:$0x3] %v2827_v37  ;;  %v2529_v38 = vld [vmem:[%s3870_s0 + $0x4] sm:$0x1]  ;;  %v2533_v39 = vld [vmem:[%s3870_s0 + $0x5] sm:$0x1] }
  0x20   :  { %v2537_v40 = vld [vmem:[%s3870_s0 + $0x6] sm:$0x1]  ;;  %v3298_v42 = vshrl.u32 %v72_v41, 7  ;;  %v70_v45 = vld [vmem:[%s3873_s3] sm:$0xf] }
  0x21   :  { %260 = vmatpush1.bf16.msra.mxu0 %v2952_v15  ;;  %301 = vmatpush1.bf16.msra.mxu1 %v2959_v16  ;;  %v2828_v47 = vmov 1966171168  }
  0x22   :  { %261 = vmatprep.subr.bf16.mxu0 %v2964_v17  ;;  %302 = vmatprep.subr.bf16.mxu1 %v2971_v18  ;;  %v74_v43 = vsub.s32 0, %v3298_v42  ;;  %v82_v44 = vsub.s32 2, %v3298_v42  ;;  %v78_v46 = vsub.s32 1, %v3298_v42  ;;  %v346_v48 = vunpack.c.l.s4 %v2828_v47 }
  0x23   :  { %v86_v49 = vsub.s32 3, %v3298_v42 }
  0x24   :  { %v3315_v50 = vrot.slane %v70_v45, %v74_v43  ;;  %v3317_v51 = vrot.slane %v70_v45, %v82_v44  ;;  %v3321_v52 = vrot.slane %v70_v45, %v78_v46  ;;  %v347_v53 = vunpack.c.0.s8 %v346_v48  ;;  %v3431_v48 = vld [vmem:[#allocation5 + $0xc0] ss:$16 sps:$4 sm:$0xff]  }
  0x25   :  { %262 = vmatpush1.bf16.msra.mxu0 %v2976_v19  ;;  %303 = vmatpush1.bf16.msra.mxu1 %v2981_v20  ;;  %v3323_v54 = vrot.slane %v70_v45, %v86_v49  ;;  %v3433_v49 = vld [vmem:[#allocation5 + $0xc8] ss:$16 sps:$4 sm:$0xff]  }
  0x26   :  { %263 = vmatprep.subr.bf16.mxu0 %v2988_v21  ;;  %304 = vmatprep.subr.bf16.mxu1 %v2995_v22  ;;  %v3331_v62 = vsub.s32 %v347_v53, %v3298_v42 }
  0x29   :  { %264 = vmatpush1.bf16.msra.mxu0 %v3002_v23  ;;  %305 = vmatpush1.bf16.msra.mxu1 %v3007_v24 }
  0x2a   :  { %265 = vmatprep.subr.bf16.mxu0 %v3014_v25  ;;  %306 = vmatprep.subr.bf16.mxu1 %v3019_v26 }
  0x2d   :  { %266 = vmatpush1.bf16.msra.mxu0 %v3024_v27  ;;  %307 = vmatpush1.bf16.msra.mxu1 %v3029_v28 }
  0x2e   :  { %267 = vmatprep.subr.bf16.mxu0 %v3034_v29  ;;  %308 = vmatprep.subr.bf16.mxu1 %v3039_v30 }
  0x31   :  { %268 = vmatpush1.bf16.msra.mxu0 %v3048_v31  ;;  %309 = vmatpush1.bf16.msra.mxu1 %v3053_v32 }
  0x32   :  { %371 = vmatprep.subr.bf16.mxu0 %v2872_v1  ;;  %412 = vmatprep.subr.bf16.mxu1 %v2877_v2 }
  0x34   :  { %286 = vmatmul.mubr.bf16.vlgmr.msra.gmra.mrb[0].mxu0 %v92_v33  ;;  %327 = vmatmul.mubr.bf16.vlgmr.msra.gmra.mrb[0].mxu1 %v92_v33  ;;  %v3415_v33 = vld [vmem:[#allocation5 + $0xa0] ss:$16 sps:$4 sm:$0xff]  }
  0x35   :  { %372 = vmatpush1.bf16.msra.mxu0 %v2883_v3  ;;  %413 = vmatpush1.bf16.msra.mxu1 %v2888_v4 }
  0x36   :  { %373 = vmatprep.subr.bf16.mxu0 %v2894_v5  ;;  %414 = vmatprep.subr.bf16.mxu1 %v2901_v6 }
  0x37   :  { %403 = vmatprep.mubr.bf16.mxu0 %v2826_v0  ;;  %444 = vmatprep.mubr.bf16.mxu1 %v2826_v0 }
  0x39   :  { %374 = vmatpush1.bf16.msra.mxu0 %v2906_v7  ;;  %415 = vmatpush1.bf16.msra.mxu1 %v2912_v8 }
  0x3a   :  { %375 = vmatprep.subr.bf16.mxu0 %v2918_v9  ;;  %416 = vmatprep.subr.bf16.mxu1 %v2923_v10 }
  0x3d   :  { %376 = vmatpush1.bf16.msra.mxu0 %v2928_v11  ;;  %417 = vmatpush1.bf16.msra.mxu1 %v2933_v12 }
  0x3e   :  { %377 = vmatprep.subr.bf16.mxu0 %v2940_v13  ;;  %418 = vmatprep.subr.bf16.mxu1 %v2947_v14 }
  0x41   :  { %378 = vmatpush1.bf16.msra.mxu0 %v2952_v15  ;;  %419 = vmatpush1.bf16.msra.mxu1 %v2959_v16 }
  0x42   :  { %379 = vmatprep.subr.bf16.mxu0 %v2964_v17  ;;  %420 = vmatprep.subr.bf16.mxu1 %v2971_v18 }
  0x45   :  { %380 = vmatpush1.bf16.msra.mxu0 %v2976_v19  ;;  %421 = vmatpush1.bf16.msra.mxu1 %v2981_v20 }
  0x46   :  { %381 = vmatprep.subr.bf16.mxu0 %v2988_v21  ;;  %422 = vmatprep.subr.bf16.mxu1 %v2995_v22 }
  0x49   :  { %382 = vmatpush1.bf16.msra.mxu0 %v3002_v23  ;;  %423 = vmatpush1.bf16.msra.mxu1 %v3007_v24 }
  0x4a   :  { %383 = vmatprep.subr.bf16.mxu0 %v3014_v25  ;;  %424 = vmatprep.subr.bf16.mxu1 %v3019_v26 }
  0x4d   :  { %384 = vmatpush1.bf16.msra.mxu0 %v3024_v27  ;;  %425 = vmatpush1.bf16.msra.mxu1 %v3029_v28 }
  0x4e   :  { %385 = vmatprep.subr.bf16.mxu0 %v3034_v29  ;;  %426 = vmatprep.subr.bf16.mxu1 %v3039_v30 }
  0x51   :  { %386 = vmatpush1.bf16.msra.mxu0 %v3048_v31  ;;  %427 = vmatpush1.bf16.msra.mxu1 %v3053_v32 }
  0x52   :  { %490 = vmatprep.subr.bf16.mxu0 %v2872_v1  ;;  %531 = vmatprep.subr.bf16.mxu1 %v2877_v2 }
  0x54   :  { %404 = vmatmul.mubr.bf16.vlgmr.msra.gmra.mrb[4].mxu0 %v2517_v34  ;;  %445 = vmatmul.mubr.bf16.vlgmr.msra.gmra.mrb[4].mxu1 %v2517_v34  ;;  %v3417_v34 = vld [vmem:[#allocation5 + $0xa8] ss:$16 sps:$4 sm:$0xff]  }
  0x55   :  { %491 = vmatpush1.bf16.msra.mxu0 %v2883_v3  ;;  %532 = vmatpush1.bf16.msra.mxu1 %v2888_v4 }
  0x56   :  { %492 = vmatprep.subr.bf16.mxu0 %v2894_v5  ;;  %533 = vmatprep.subr.bf16.mxu1 %v2901_v6 }
  0x57   :  { %522 = vmatprep.mubr.bf16.mxu0 %v2826_v0  ;;  %563 = vmatprep.mubr.bf16.mxu1 %v2826_v0 }
  0x59   :  { %493 = vmatpush1.bf16.msra.mxu0 %v2906_v7  ;;  %534 = vmatpush1.bf16.msra.mxu1 %v2912_v8 }
  0x5a   :  { %494 = vmatprep.subr.bf16.mxu0 %v2918_v9  ;;  %535 = vmatprep.subr.bf16.mxu1 %v2923_v10 }
  0x5d   :  { %495 = vmatpush1.bf16.msra.mxu0 %v2928_v11  ;;  %536 = vmatpush1.bf16.msra.mxu1 %v2933_v12 }
  0x5e   :  { %496 = vmatprep.subr.bf16.mxu0 %v2940_v13  ;;  %537 = vmatprep.subr.bf16.mxu1 %v2947_v14 }
  0x61   :  { %497 = vmatpush1.bf16.msra.mxu0 %v2952_v15  ;;  %538 = vmatpush1.bf16.msra.mxu1 %v2959_v16 }
  0x62   :  { %498 = vmatprep.subr.bf16.mxu0 %v2964_v17  ;;  %539 = vmatprep.subr.bf16.mxu1 %v2971_v18 }
  0x65   :  { %499 = vmatpush1.bf16.msra.mxu0 %v2976_v19  ;;  %540 = vmatpush1.bf16.msra.mxu1 %v2981_v20 }
  0x66   :  { %500 = vmatprep.subr.bf16.mxu0 %v2988_v21  ;;  %541 = vmatprep.subr.bf16.mxu1 %v2995_v22 }
  0x69   :  { %501 = vmatpush1.bf16.msra.mxu0 %v3002_v23  ;;  %542 = vmatpush1.bf16.msra.mxu1 %v3007_v24 }
  0x6a   :  { %502 = vmatprep.subr.bf16.mxu0 %v3014_v25  ;;  %543 = vmatprep.subr.bf16.mxu1 %v3019_v26 }
  0x6d   :  { %503 = vmatpush1.bf16.msra.mxu0 %v3024_v27  ;;  %544 = vmatpush1.bf16.msra.mxu1 %v3029_v28 }
  0x6e   :  { %504 = vmatprep.subr.bf16.mxu0 %v3034_v29  ;;  %545 = vmatprep.subr.bf16.mxu1 %v3039_v30 }
  0x71   :  { %505 = vmatpush1.bf16.msra.mxu0 %v3048_v31  ;;  %546 = vmatpush1.bf16.msra.mxu1 %v3053_v32 }
  0x72   :  { %609 = vmatprep.subr.bf16.mxu0 %v2872_v1  ;;  %650 = vmatprep.subr.bf16.mxu1 %v2877_v2 }
  0x74   :  { %523 = vmatmul.mubr.bf16.vlgmr.msra.gmra.mrb[8].mxu0 %v2521_v35  ;;  %564 = vmatmul.mubr.bf16.vlgmr.msra.gmra.mrb[8].mxu1 %v2521_v35  ;;  %v3421_v35 = vld [vmem:[#allocation5 + $0xc4] ss:$16 sps:$4 sm:$0xff]  }
  0x75   :  { %610 = vmatpush1.bf16.msra.mxu0 %v2883_v3  ;;  %651 = vmatpush1.bf16.msra.mxu1 %v2888_v4 }
  0x76   :  { %611 = vmatprep.subr.bf16.mxu0 %v2894_v5  ;;  %652 = vmatprep.subr.bf16.mxu1 %v2901_v6 }
  0x77   :  { %641 = vmatprep.mubr.bf16.mxu0 %v2826_v0  ;;  %682 = vmatprep.mubr.bf16.mxu1 %v2826_v0 }
  0x79   :  { %612 = vmatpush1.bf16.msra.mxu0 %v2906_v7  ;;  %653 = vmatpush1.bf16.msra.mxu1 %v2912_v8 }
  0x7a   :  { %613 = vmatprep.subr.bf16.mxu0 %v2918_v9  ;;  %654 = vmatprep.subr.bf16.mxu1 %v2923_v10 }
  0x7d   :  { %614 = vmatpush1.bf16.msra.mxu0 %v2928_v11  ;;  %655 = vmatpush1.bf16.msra.mxu1 %v2933_v12 }
  0x7e   :  { %615 = vmatprep.subr.bf16.mxu0 %v2940_v13  ;;  %656 = vmatprep.subr.bf16.mxu1 %v2947_v14 }
  0x81   :  { %616 = vmatpush1.bf16.msra.mxu0 %v2952_v15  ;;  %657 = vmatpush1.bf16.msra.mxu1 %v2959_v16 }
  0x82   :  { %617 = vmatprep.subr.bf16.mxu0 %v2964_v17  ;;  %658 = vmatprep.subr.bf16.mxu1 %v2971_v18 }
  0x85   :  { %618 = vmatpush1.bf16.msra.mxu0 %v2976_v19  ;;  %659 = vmatpush1.bf16.msra.mxu1 %v2981_v20 }
  0x86   :  { %619 = vmatprep.subr.bf16.mxu0 %v2988_v21  ;;  %660 = vmatprep.subr.bf16.mxu1 %v2995_v22 }
  0x89   :  { %620 = vmatpush1.bf16.msra.mxu0 %v3002_v23  ;;  %661 = vmatpush1.bf16.msra.mxu1 %v3007_v24 }
  0x8a   :  { %621 = vmatprep.subr.bf16.mxu0 %v3014_v25  ;;  %662 = vmatprep.subr.bf16.mxu1 %v3019_v26 }
  0x8d   :  { %622 = vmatpush1.bf16.msra.mxu0 %v3024_v27  ;;  %663 = vmatpush1.bf16.msra.mxu1 %v3029_v28 }
  0x8e   :  { %623 = vmatprep.subr.bf16.mxu0 %v3034_v29  ;;  %664 = vmatprep.subr.bf16.mxu1 %v3039_v30 }
  0x91   :  { %624 = vmatpush1.bf16.msra.mxu0 %v3048_v31  ;;  %665 = vmatpush1.bf16.msra.mxu1 %v3053_v32 }
  0x92   :  { %728 = vmatprep.subr.bf16.mxu0 %v2872_v1  ;;  %769 = vmatprep.subr.bf16.mxu1 %v2877_v2 }
  0x94   :  { %642 = vmatmul.mubr.bf16.vlgmr.msra.gmra.mrb[12].mxu0 %v2525_v36  ;;  %683 = vmatmul.mubr.bf16.vlgmr.msra.gmra.mrb[12].mxu1 %v2525_v36  ;;  %v3423_v36 = vld [vmem:[#allocation5 + $0xcc] ss:$16 sps:$4 sm:$0xff]  }
  0x95   :  { %729 = vmatpush1.bf16.msra.mxu0 %v2883_v3  ;;  %770 = vmatpush1.bf16.msra.mxu1 %v2888_v4 }
  0x96   :  { %730 = vmatprep.subr.bf16.mxu0 %v2894_v5  ;;  %771 = vmatprep.subr.bf16.mxu1 %v2901_v6 }
  0x97   :  { %760 = vmatprep.mubr.bf16.mxu0 %v2826_v0  ;;  %801 = vmatprep.mubr.bf16.mxu1 %v2826_v0 }
  0x99   :  { %731 = vmatpush1.bf16.msra.mxu0 %v2906_v7  ;;  %772 = vmatpush1.bf16.msra.mxu1 %v2912_v8 }
  0x9a   :  { %732 = vmatprep.subr.bf16.mxu0 %v2918_v9  ;;  %773 = vmatprep.subr.bf16.mxu1 %v2923_v10 }
  0x9d   :  { %733 = vmatpush1.bf16.msra.mxu0 %v2928_v11  ;;  %774 = vmatpush1.bf16.msra.mxu1 %v2933_v12 }
  0x9e   :  { %734 = vmatprep.subr.bf16.mxu0 %v2940_v13  ;;  %775 = vmatprep.subr.bf16.mxu1 %v2947_v14 }
  0xa1   :  { %735 = vmatpush1.bf16.msra.mxu0 %v2952_v15  ;;  %776 = vmatpush1.bf16.msra.mxu1 %v2959_v16 }
  0xa2   :  { %736 = vmatprep.subr.bf16.mxu0 %v2964_v17  ;;  %777 = vmatprep.subr.bf16.mxu1 %v2971_v18 }
  0xa5   :  { %737 = vmatpush1.bf16.msra.mxu0 %v2976_v19  ;;  %778 = vmatpush1.bf16.msra.mxu1 %v2981_v20 }
  0xa6   :  { %738 = vmatprep.subr.bf16.mxu0 %v2988_v21  ;;  %779 = vmatprep.subr.bf16.mxu1 %v2995_v22 }
  0xa9   :  { %739 = vmatpush1.bf16.msra.mxu0 %v3002_v23  ;;  %780 = vmatpush1.bf16.msra.mxu1 %v3007_v24 }
  0xaa   :  { %740 = vmatprep.subr.bf16.mxu0 %v3014_v25  ;;  %781 = vmatprep.subr.bf16.mxu1 %v3019_v26 }
  0xad   :  { %741 = vmatpush1.bf16.msra.mxu0 %v3024_v27  ;;  %782 = vmatpush1.bf16.msra.mxu1 %v3029_v28 }
  0xae   :  { %742 = vmatprep.subr.bf16.mxu0 %v3034_v29  ;;  %783 = vmatprep.subr.bf16.mxu1 %v3039_v30 }
  0xb1   :  { %743 = vmatpush1.bf16.msra.mxu0 %v3048_v31  ;;  %784 = vmatpush1.bf16.msra.mxu1 %v3053_v32 }
  0xb2   :  { %847 = vmatprep.subr.bf16.mxu0 %v2872_v1  ;;  %888 = vmatprep.subr.bf16.mxu1 %v2877_v2 }
  0xb4   :  { %761 = vmatmul.mubr.bf16.vlgmr.msra.gmra.mrb[16].mxu0 %v2529_v38  ;;  %802 = vmatmul.mubr.bf16.vlgmr.msra.gmra.mrb[16].mxu1 %v2529_v38 }
  0xb5   :  { %848 = vmatpush1.bf16.msra.mxu0 %v2883_v3  ;;  %889 = vmatpush1.bf16.msra.mxu1 %v2888_v4 }
  0xb6   :  { %849 = vmatprep.subr.bf16.mxu0 %v2894_v5  ;;  %890 = vmatprep.subr.bf16.mxu1 %v2901_v6 }
  0xb7   :  { %879 = vmatprep.mubr.bf16.mxu0 %v2826_v0  ;;  %920 = vmatprep.mubr.bf16.mxu1 %v2826_v0 }
  0xb9   :  { %850 = vmatpush1.bf16.msra.mxu0 %v2906_v7  ;;  %891 = vmatpush1.bf16.msra.mxu1 %v2912_v8 }
  0xba   :  { %851 = vmatprep.subr.bf16.mxu0 %v2918_v9  ;;  %892 = vmatprep.subr.bf16.mxu1 %v2923_v10 }
  0xbd   :  { %852 = vmatpush1.bf16.msra.mxu0 %v2928_v11  ;;  %893 = vmatpush1.bf16.msra.mxu1 %v2933_v12 }
  0xbe   :  { %853 = vmatprep.subr.bf16.mxu0 %v2940_v13  ;;  %894 = vmatprep.subr.bf16.mxu1 %v2947_v14 }
  0xc1   :  { %854 = vmatpush1.bf16.msra.mxu0 %v2952_v15  ;;  %895 = vmatpush1.bf16.msra.mxu1 %v2959_v16 }
  0xc2   :  { %855 = vmatprep.subr.bf16.mxu0 %v2964_v17  ;;  %896 = vmatprep.subr.bf16.mxu1 %v2971_v18 }
  0xc5   :  { %856 = vmatpush1.bf16.msra.mxu0 %v2976_v19  ;;  %897 = vmatpush1.bf16.msra.mxu1 %v2981_v20 }
  0xc6   :  { %857 = vmatprep.subr.bf16.mxu0 %v2988_v21  ;;  %898 = vmatprep.subr.bf16.mxu1 %v2995_v22 }
  0xc9   :  { %858 = vmatpush1.bf16.msra.mxu0 %v3002_v23  ;;  %899 = vmatpush1.bf16.msra.mxu1 %v3007_v24 }
  0xca   :  { %859 = vmatprep.subr.bf16.mxu0 %v3014_v25  ;;  %900 = vmatprep.subr.bf16.mxu1 %v3019_v26 }
  0xcd   :  { %860 = vmatpush1.bf16.msra.mxu0 %v3024_v27  ;;  %901 = vmatpush1.bf16.msra.mxu1 %v3029_v28 }
  0xce   :  { %861 = vmatprep.subr.bf16.mxu0 %v3034_v29  ;;  %902 = vmatprep.subr.bf16.mxu1 %v3039_v30 }
  0xd1   :  { %862 = vmatpush1.bf16.msra.mxu0 %v3048_v31  ;;  %903 = vmatpush1.bf16.msra.mxu1 %v3053_v32 }
  0xd2   :  { %966 = vmatprep.subr.bf16.mxu0 %v2872_v1  ;;  %1007 = vmatprep.subr.bf16.mxu1 %v2877_v2 }
  0xd4   :  { %880 = vmatmul.mubr.bf16.vlgmr.msra.gmra.mrb[20].mxu0 %v2533_v39  ;;  %921 = vmatmul.mubr.bf16.vlgmr.msra.gmra.mrb[20].mxu1 %v2533_v39 }
  0xd5   :  { %967 = vmatpush1.bf16.msra.mxu0 %v2883_v3  ;;  %1008 = vmatpush1.bf16.msra.mxu1 %v2888_v4 }
  0xd6   :  { %968 = vmatprep.subr.bf16.mxu0 %v2894_v5  ;;  %1009 = vmatprep.subr.bf16.mxu1 %v2901_v6 }
  0xd7   :  { %998 = vmatprep.mubr.bf16.mxu0 %v2826_v0  ;;  %1039 = vmatprep.mubr.bf16.mxu1 %v2826_v0 }
  0xd9   :  { %969 = vmatpush1.bf16.msra.mxu0 %v2906_v7  ;;  %1010 = vmatpush1.bf16.msra.mxu1 %v2912_v8 }
  0xda   :  { %970 = vmatprep.subr.bf16.mxu0 %v2918_v9  ;;  %1011 = vmatprep.subr.bf16.mxu1 %v2923_v10 }
  0xdd   :  { %971 = vmatpush1.bf16.msra.mxu0 %v2928_v11  ;;  %1012 = vmatpush1.bf16.msra.mxu1 %v2933_v12 }
  0xde   :  { %972 = vmatprep.subr.bf16.mxu0 %v2940_v13  ;;  %1013 = vmatprep.subr.bf16.mxu1 %v2947_v14 }
  0xe1   :  { %973 = vmatpush1.bf16.msra.mxu0 %v2952_v15  ;;  %1014 = vmatpush1.bf16.msra.mxu1 %v2959_v16 }
  0xe2   :  { %974 = vmatprep.subr.bf16.mxu0 %v2964_v17  ;;  %1015 = vmatprep.subr.bf16.mxu1 %v2971_v18 }
  0xe5   :  { %975 = vmatpush1.bf16.msra.mxu0 %v2976_v19  ;;  %1016 = vmatpush1.bf16.msra.mxu1 %v2981_v20 }
  0xe6   :  { %976 = vmatprep.subr.bf16.mxu0 %v2988_v21  ;;  %1017 = vmatprep.subr.bf16.mxu1 %v2995_v22 }
  0xe9   :  { %977 = vmatpush1.bf16.msra.mxu0 %v3002_v23  ;;  %1018 = vmatpush1.bf16.msra.mxu1 %v3007_v24 }
  0xea   :  { %978 = vmatprep.subr.bf16.mxu0 %v3014_v25  ;;  %1019 = vmatprep.subr.bf16.mxu1 %v3019_v26 }
  0xed   :  { %979 = vmatpush1.bf16.msra.mxu0 %v3024_v27  ;;  %1020 = vmatpush1.bf16.msra.mxu1 %v3029_v28 }
  0xee   :  { %980 = vmatprep.subr.bf16.mxu0 %v3034_v29  ;;  %1021 = vmatprep.subr.bf16.mxu1 %v3039_v30 }
  0xf1   :  { %981 = vmatpush1.bf16.msra.mxu0 %v3048_v31  ;;  %1022 = vmatpush1.bf16.msra.mxu1 %v3053_v32 }
  0xf2   :  { %1085 = vmatprep.subr.bf16.mxu0 %v2872_v1  ;;  %1126 = vmatprep.subr.bf16.mxu1 %v2877_v2 }
  0xf4   :  { %999 = vmatmul.mubr.bf16.vlgmr.msra.gmra.mrb[24].mxu0 %v2537_v40  ;;  %1040 = vmatmul.mubr.bf16.vlgmr.msra.gmra.mrb[24].mxu1 %v2537_v40 }
  0xf5   :  { %1086 = vmatpush1.bf16.msra.mxu0 %v2883_v3  ;;  %1127 = vmatpush1.bf16.msra.mxu1 %v2888_v4 }
  0xf6   :  { %1087 = vmatprep.subr.bf16.mxu0 %v2894_v5  ;;  %1128 = vmatprep.subr.bf16.mxu1 %v2901_v6 }
  0xf7   :  { %1117 = vmatprep.mubr.bf16.mxu0 %v2826_v0  ;;  %1158 = vmatprep.mubr.bf16.mxu1 %v2826_v0 }
  0xf9   :  { %1088 = vmatpush1.bf16.msra.mxu0 %v2906_v7  ;;  %1129 = vmatpush1.bf16.msra.mxu1 %v2912_v8 }
  0xfa   :  { %1089 = vmatprep.subr.bf16.mxu0 %v2918_v9  ;;  %1130 = vmatprep.subr.bf16.mxu1 %v2923_v10  ;;  %v3344_v9 = vld [vmem:[#allocation5 + $0x4] ss:$16 sps:$4 sm:$0xff]   ;;  %v3346_v10 = vld [vmem:[#allocation5 + $0xc] ss:$16 sps:$4 sm:$0xff]  }
  0xfd   :  { %1090 = vmatpush1.bf16.msra.mxu0 %v2928_v11  ;;  %1131 = vmatpush1.bf16.msra.mxu1 %v2933_v12  ;;  %v2541_v12 = vld [vmem:[%s3870_s0 + $0x7] sm:$0x1] }
  0xfe   :  { %1091 = vmatprep.subr.bf16.mxu0 %v2940_v13  ;;  %1132 = vmatprep.subr.bf16.mxu1 %v2947_v14  ;;  %v3353_v13 = vld [vmem:[#allocation5] ss:$16 sps:$4 sm:$0xff]   ;;  %v3355_v14 = vld [vmem:[#allocation5 + $0x8] ss:$16 sps:$4 sm:$0xff]  }
 0x101   :  { %1092 = vmatpush1.bf16.msra.mxu0 %v2952_v15  ;;  %1133 = vmatpush1.bf16.msra.mxu1 %v2959_v16  ;;  %v3359_v15 = vld [vmem:[#allocation5 + $0x24] ss:$16 sps:$4 sm:$0xff]   ;;  %v3361_v16 = vld [vmem:[#allocation5 + $0x2c] ss:$16 sps:$4 sm:$0xff]  }
 0x102   :  { %1093 = vmatprep.subr.bf16.mxu0 %v2964_v17  ;;  %1134 = vmatprep.subr.bf16.mxu1 %v2971_v18  ;;  %v3365_v17 = vld [vmem:[#allocation5 + $0x20] ss:$16 sps:$4 sm:$0xff]   ;;  %v3367_v18 = vld [vmem:[#allocation5 + $0x28] ss:$16 sps:$4 sm:$0xff]  }
 0x105   :  { %1094 = vmatpush1.bf16.msra.mxu0 %v2976_v19  ;;  %1135 = vmatpush1.bf16.msra.mxu1 %v2981_v20  ;;  %v3371_v19 = vld [vmem:[#allocation5 + $0x44] ss:$16 sps:$4 sm:$0xff]   ;;  %v3373_v20 = vld [vmem:[#allocation5 + $0x4c] ss:$16 sps:$4 sm:$0xff]  }
 0x106   :  { %1095 = vmatprep.subr.bf16.mxu0 %v2988_v21  ;;  %1136 = vmatprep.subr.bf16.mxu1 %v2995_v22  ;;  %v3379_v21 = vld [vmem:[#allocation5 + $0x40] ss:$16 sps:$4 sm:$0xff]   ;;  %v3381_v22 = vld [vmem:[#allocation5 + $0x48] ss:$16 sps:$4 sm:$0xff]  }
 0x107   :  { %v287_v55 = vpop.f32.mrb[0].mxu0  ;;  %v328_v56 = vpop.f32.mrb[0].mxu1 }
 0x108   :  { %v288_v57 = vadd.f32 %v287_v55, %v3315_v50  ;;  %v329_v58 = vadd.f32 %v328_v56, %v3317_v51  ;;  %v289_v59 = vpop.f32.mrb[1].mxu0  ;;  %v330_v60 = vpop.f32.mrb[1].mxu1  ;;  %v3437_v56 = vld [vmem:[#allocation5 + $0xe4] ss:$16 sps:$4 sm:$0xff]  }
 0x109   :  { %v290_v61 = vadd.f32 %v289_v59, %v3321_v52  ;;  %v331_v63 = vadd.f32 %v330_v60, %v3323_v54  ;;  %v291_v1 = vpop.f32.mrb[2].mxu0  ;;  %v332_v2 = vpop.f32.mrb[2].mxu1  ;;  %1096 = vmatpush1.bf16.msra.mxu0 %v3002_v23  ;;  %1137 = vmatpush1.bf16.msra.mxu1 %v3007_v24  ;;  %v3385_v23 = vld [vmem:[#allocation5 + $0x64] ss:$16 sps:$4 sm:$0xff]   ;;  %v3387_v24 = vld [vmem:[#allocation5 + $0x6c] ss:$16 sps:$4 sm:$0xff]  }
 0x10a   :  { %v292_v3 = vpop.f32.mrb[3].mxu0  ;;  %v333_v4 = vpop.f32.mrb[3].mxu1  ;;  %1097 = vmatprep.subr.bf16.mxu0 %v3014_v25  ;;  %1138 = vmatprep.subr.bf16.mxu1 %v3019_v26  ;;  %v3391_v25 = vld [vmem:[#allocation5 + $0x60] ss:$16 sps:$4 sm:$0xff]   ;;  %v3393_v26 = vld [vmem:[#allocation5 + $0x68] ss:$16 sps:$4 sm:$0xff]  }
 0x10b   :  { %v2514_v5 = vpack.c.bf16 %v290_v61, %v288_v57  ;;  %v2515_v6 = vpack.c.bf16 %v331_v63, %v329_v58  ;;  %v3439_v57 = vld [vmem:[#allocation5 + $0xec] ss:$16 sps:$4 sm:$0xff]   ;;  %v3445_v63 = vld [vmem:[#allocation5 + $0xe0] ss:$16 sps:$4 sm:$0xff]   ;;  %v3447_v1 = vld [vmem:[#allocation5 + $0xe8] ss:$16 sps:$4 sm:$0xff]  }
 0x10c   :  { %v1234_v2 = vld [vmem:[#allocation3] sm:$0x3] }
 0x10d   :  { %v351_v7 = vrot.slane %v2514_v5, %v3331_v62  ;;  %v358_v8 = vrot.slane %v2515_v6, %v3331_v62  ;;  %1098 = vmatpush1.bf16.msra.mxu0 %v3024_v27  ;;  %1139 = vmatpush1.bf16.msra.mxu1 %v3029_v28  ;;  %v3397_v27 = vld [vmem:[#allocation5 + $0x84] ss:$16 sps:$4 sm:$0xff]   ;;  %v3399_v28 = vld [vmem:[#allocation5 + $0x8c] ss:$16 sps:$4 sm:$0xff]   ;;  %v1238_v4 = vpack.c.bf16 %v1234_v2, %v1234_v2 }
 0x10e   :  { %1099 = vmatprep.subr.bf16.mxu0 %v3034_v29  ;;  %1140 = vmatprep.subr.bf16.mxu1 %v3039_v30  ;;  %v3403_v29 = vld [vmem:[#allocation5 + $0x80] ss:$16 sps:$4 sm:$0xff]   ;;  %v3405_v30 = vld [vmem:[#allocation5 + $0x88] ss:$16 sps:$4 sm:$0xff]  }
 0x10f   :  { %v359_v11 = vcombine.low %v351_v7, %v358_v8 }
 0x111   :  { %2516 = vst.sshfl [vmem:[#allocation2] sm:$0x55 pattern:$0x73625140] %v359_v11  ;;  %1100 = vmatpush1.bf16.msra.mxu0 %v3048_v31  ;;  %1141 = vmatpush1.bf16.msra.mxu1 %v3053_v32  ;;  %v3409_v31 = vld [vmem:[#allocation5 + $0xa4] ss:$16 sps:$4 sm:$0xff]  }
 0x112   :  { %1399 = vmatprep.subr.bf16.mxu0 %v3344_v9  ;;  %1440 = vmatprep.subr.bf16.mxu1 %v3346_v10  ;;  %v3411_v32 = vld [vmem:[#allocation5 + $0xac] ss:$16 sps:$4 sm:$0xff]  }
 0x114   :  { %1118 = vmatmul.mubr.bf16.vlgmr.msra.gmra.mrb[28].mxu0 %v2541_v12  ;;  %1159 = vmatmul.mubr.bf16.vlgmr.msra.gmra.mrb[28].mxu1 %v2541_v12 }
 0x115   :  { %1400 = vmatpush1.bf16.msra.mxu0 %v3353_v13  ;;  %1441 = vmatpush1.bf16.msra.mxu1 %v3355_v14 }
 0x116   :  { %1401 = vmatprep.subr.bf16.mxu0 %v3359_v15  ;;  %1442 = vmatprep.subr.bf16.mxu1 %v3361_v16 }
 0x117   :  { %1431 = vmatprep.mubr.bf16.mxu0 %v2826_v0  ;;  %1472 = vmatprep.mubr.bf16.mxu1 %v2826_v0 }
 0x119   :  { %1402 = vmatpush1.bf16.msra.mxu0 %v3365_v17  ;;  %1443 = vmatpush1.bf16.msra.mxu1 %v3367_v18 }
 0x11a   :  { %1403 = vmatprep.subr.bf16.mxu0 %v3371_v19  ;;  %1444 = vmatprep.subr.bf16.mxu1 %v3373_v20 }
 0x11d   :  { %1404 = vmatpush1.bf16.msra.mxu0 %v3379_v21  ;;  %1445 = vmatpush1.bf16.msra.mxu1 %v3381_v22 }
 0x11e   :  { %1405 = vmatprep.subr.bf16.mxu0 %v3385_v23  ;;  %1446 = vmatprep.subr.bf16.mxu1 %v3387_v24 }
 0x121   :  { %1406 = vmatpush1.bf16.msra.mxu0 %v3391_v25  ;;  %1447 = vmatpush1.bf16.msra.mxu1 %v3393_v26 }
 0x122   :  { %1407 = vmatprep.subr.bf16.mxu0 %v3397_v27  ;;  %1448 = vmatprep.subr.bf16.mxu1 %v3399_v28 }
 0x125   :  { %1408 = vmatpush1.bf16.msra.mxu0 %v3403_v29  ;;  %1449 = vmatpush1.bf16.msra.mxu1 %v3405_v30 }
 0x126   :  { %1409 = vmatprep.subr.bf16.mxu0 %v3409_v31  ;;  %1450 = vmatprep.subr.bf16.mxu1 %v3411_v32 }
 0x127   :  { %v405_v37 = vpop.f32.mrb[4].mxu0  ;;  %v446_v38 = vpop.f32.mrb[4].mxu1 }
 0x128   :  { %v406_v39 = vadd.f32 %v405_v37, %v3315_v50  ;;  %v447_v40 = vadd.f32 %v446_v38, %v3317_v51  ;;  %v407_v41 = vpop.f32.mrb[5].mxu0  ;;  %v448_v43 = vpop.f32.mrb[5].mxu1 }
 0x129   :  { %v408_v44 = vadd.f32 %v407_v41, %v3321_v52  ;;  %v449_v45 = vadd.f32 %v448_v43, %v3323_v54  ;;  %v409_v46 = vpop.f32.mrb[6].mxu0  ;;  %v450_v47 = vpop.f32.mrb[6].mxu1  ;;  %1410 = vmatpush1.bf16.msra.mxu0 %v3415_v33  ;;  %1451 = vmatpush1.bf16.msra.mxu1 %v3417_v34 }
 0x12a   :  { %v410_v53 = vpop.f32.mrb[7].mxu0  ;;  %v451_v55 = vpop.f32.mrb[7].mxu1  ;;  %1411 = vmatprep.subr.bf16.mxu0 %v3421_v35  ;;  %1452 = vmatprep.subr.bf16.mxu1 %v3423_v36 }
 0x12b   :  { %v2518_v58 = vpack.c.bf16 %v408_v44, %v406_v39  ;;  %v2519_v59 = vpack.c.bf16 %v449_v45, %v447_v40 }
 0x12d   :  { %v469_v60 = vrot.slane %v2518_v58, %v3331_v62  ;;  %v476_v61 = vrot.slane %v2519_v59, %v3331_v62  ;;  %1412 = vmatpush1.bf16.msra.mxu0 %v3431_v48  ;;  %1453 = vmatpush1.bf16.msra.mxu1 %v3433_v49 }
 0x12e   :  { %1413 = vmatprep.subr.bf16.mxu0 %v3437_v56  ;;  %1454 = vmatprep.subr.bf16.mxu1 %v3439_v57 }
 0x12f   :  { %v477_v3 = vcombine.low %v469_v60, %v476_v61 }
 0x131   :  { %2520 = vst.sshfl [vmem:[#allocation2 + $0x4] sm:$0x55 pattern:$0x73625140] %v477_v3  ;;  %1414 = vmatpush1.bf16.msra.mxu0 %v3445_v63  ;;  %1455 = vmatpush1.bf16.msra.mxu1 %v3447_v1 }
 0x132   :  { %1533 = vmatprep.subr.bf16.mxu0 %v3344_v9  ;;  %1574 = vmatprep.subr.bf16.mxu1 %v3346_v10 }
 0x134   :  { %1432 = vmatmul.mubr.bf16.vlgmr.msra.gmra.mrb[32].mxu0 %v1238_v4  ;;  %1473 = vmatmul.mubr.bf16.vlgmr.msra.gmra.mrb[32].mxu1 %v1238_v4 }
 0x135   :  { %1534 = vmatpush1.bf16.msra.mxu0 %v3353_v13  ;;  %1575 = vmatpush1.bf16.msra.mxu1 %v3355_v14 }
 0x136   :  { %1535 = vmatprep.subr.bf16.mxu0 %v3359_v15  ;;  %1576 = vmatprep.subr.bf16.mxu1 %v3361_v16 }
 0x137   :  { %1565 = vmatprep.mubr.bf16.mxu0 %v2826_v0  ;;  %1606 = vmatprep.mubr.bf16.mxu1 %v2826_v0 }
 0x139   :  { %1536 = vmatpush1.bf16.msra.mxu0 %v3365_v17  ;;  %1577 = vmatpush1.bf16.msra.mxu1 %v3367_v18 }
 0x13a   :  { %1537 = vmatprep.subr.bf16.mxu0 %v3371_v19  ;;  %1578 = vmatprep.subr.bf16.mxu1 %v3373_v20 }
 0x13d   :  { %1538 = vmatpush1.bf16.msra.mxu0 %v3379_v21  ;;  %1579 = vmatpush1.bf16.msra.mxu1 %v3381_v22 }
 0x13e   :  { %1539 = vmatprep.subr.bf16.mxu0 %v3385_v23  ;;  %1580 = vmatprep.subr.bf16.mxu1 %v3387_v24 }
 0x141   :  { %1540 = vmatpush1.bf16.msra.mxu0 %v3391_v25  ;;  %1581 = vmatpush1.bf16.msra.mxu1 %v3393_v26 }
 0x142   :  { %1541 = vmatprep.subr.bf16.mxu0 %v3397_v27  ;;  %1582 = vmatprep.subr.bf16.mxu1 %v3399_v28 }
 0x145   :  { %1542 = vmatpush1.bf16.msra.mxu0 %v3403_v29  ;;  %1583 = vmatpush1.bf16.msra.mxu1 %v3405_v30 }
 0x146   :  { %1543 = vmatprep.subr.bf16.mxu0 %v3409_v31  ;;  %1584 = vmatprep.subr.bf16.mxu1 %v3411_v32 }
 0x147   :  { %v524_v5 = vpop.f32.mrb[8].mxu0  ;;  %v565_v6 = vpop.f32.mrb[8].mxu1 }
 0x148   :  { %v525_v7 = vadd.f32 %v524_v5, %v3315_v50  ;;  %v566_v8 = vadd.f32 %v565_v6, %v3317_v51  ;;  %v526_v11 = vpop.f32.mrb[9].mxu0  ;;  %v567_v12 = vpop.f32.mrb[9].mxu1 }
 0x149   :  { %v527_v37 = vadd.f32 %v526_v11, %v3321_v52  ;;  %v568_v38 = vadd.f32 %v567_v12, %v3323_v54  ;;  %v528_v39 = vpop.f32.mrb[10].mxu0  ;;  %v569_v40 = vpop.f32.mrb[10].mxu1  ;;  %1544 = vmatpush1.bf16.msra.mxu0 %v3415_v33  ;;  %1585 = vmatpush1.bf16.msra.mxu1 %v3417_v34 }
 0x14a   :  { %v529_v41 = vpop.f32.mrb[11].mxu0  ;;  %v570_v43 = vpop.f32.mrb[11].mxu1  ;;  %1545 = vmatprep.subr.bf16.mxu0 %v3421_v35  ;;  %1586 = vmatprep.subr.bf16.mxu1 %v3423_v36 }
 0x14b   :  { %v2522_v44 = vpack.c.bf16 %v527_v37, %v525_v7  ;;  %v2523_v45 = vpack.c.bf16 %v568_v38, %v566_v8 }
 0x14d   :  { %v588_v46 = vrot.slane %v2522_v44, %v3331_v62  ;;  %v595_v47 = vrot.slane %v2523_v45, %v3331_v62  ;;  %1546 = vmatpush1.bf16.msra.mxu0 %v3431_v48  ;;  %1587 = vmatpush1.bf16.msra.mxu1 %v3433_v49 }
 0x14e   :  { %1547 = vmatprep.subr.bf16.mxu0 %v3437_v56  ;;  %1588 = vmatprep.subr.bf16.mxu1 %v3439_v57 }
 0x14f   :  { %v596_v53 = vcombine.low %v588_v46, %v595_v47 }
 0x151   :  { %2524 = vst.sshfl [vmem:[#allocation2 + $0x8] sm:$0x55 pattern:$0x73625140] %v596_v53  ;;  %1548 = vmatpush1.bf16.msra.mxu0 %v3445_v63  ;;  %1589 = vmatpush1.bf16.msra.mxu1 %v3447_v1 }
 0x152   :  { %1668 = vmatprep.subr.bf16.mxu0 %v3344_v9  ;;  %1709 = vmatprep.subr.bf16.mxu1 %v3346_v10 }
 0x167   :  { %v643_v55 = vpop.f32.mrb[12].mxu0  ;;  %v684_v58 = vpop.f32.mrb[12].mxu1 }
 0x168   :  { %v644_v59 = vadd.f32 %v643_v55, %v3315_v50  ;;  %v685_v60 = vadd.f32 %v684_v58, %v3317_v51  ;;  %v645_v61 = vpop.f32.mrb[13].mxu0  ;;  %v686_v2 = vpop.f32.mrb[13].mxu1 }
 0x169   :  { %v646_v3 = vadd.f32 %v645_v61, %v3321_v52  ;;  %v687_v4 = vadd.f32 %v686_v2, %v3323_v54  ;;  %v647_v5 = vpop.f32.mrb[14].mxu0  ;;  %v688_v6 = vpop.f32.mrb[14].mxu1 }
 0x16a   :  { %v648_v7 = vpop.f32.mrb[15].mxu0  ;;  %v689_v8 = vpop.f32.mrb[15].mxu1 }
 0x16b   :  { %v2526_v11 = vpack.c.bf16 %v646_v3, %v644_v59  ;;  %v2527_v12 = vpack.c.bf16 %v687_v4, %v685_v60 }
 0x16d   :  { %v707_v37 = vrot.slane %v2526_v11, %v3331_v62  ;;  %v714_v38 = vrot.slane %v2527_v12, %v3331_v62 }
 0x16f   :  { %v715_v39 = vcombine.low %v707_v37, %v714_v38 }
 0x171   :  { %2528 = vst.sshfl [vmem:[#allocation2 + $0xc] sm:$0x55 pattern:$0x73625140] %v715_v39 }
 0x187   :  { %v762_v40 = vpop.f32.mrb[16].mxu0  ;;  %v803_v41 = vpop.f32.mrb[16].mxu1 }
 0x188   :  { %v763_v43 = vadd.f32 %v762_v40, %v3315_v50  ;;  %v804_v44 = vadd.f32 %v803_v41, %v3317_v51  ;;  %v764_v45 = vpop.f32.mrb[17].mxu0  ;;  %v805_v46 = vpop.f32.mrb[17].mxu1 }
 0x189   :  { %v765_v47 = vadd.f32 %v764_v45, %v3321_v52  ;;  %v806_v53 = vadd.f32 %v805_v46, %v3323_v54  ;;  %v766_v55 = vpop.f32.mrb[18].mxu0  ;;  %v807_v58 = vpop.f32.mrb[18].mxu1 }
 0x18a   :  { %v767_v59 = vpop.f32.mrb[19].mxu0  ;;  %v808_v60 = vpop.f32.mrb[19].mxu1 }
 0x18b   :  { %v2530_v61 = vpack.c.bf16 %v765_v47, %v763_v43  ;;  %v2531_v2 = vpack.c.bf16 %v806_v53, %v804_v44 }
 0x18d   :  { %v826_v3 = vrot.slane %v2530_v61, %v3331_v62  ;;  %v833_v4 = vrot.slane %v2531_v2, %v3331_v62 }
 0x18f   :  { %v834_v5 = vcombine.low %v826_v3, %v833_v4 }
 0x191   :  { %2532 = vst.sshfl [vmem:[#allocation2 + $0x10] sm:$0x55 pattern:$0x73625140] %v834_v5 }
 0x1a7   :  { %v881_v6 = vpop.f32.mrb[20].mxu0  ;;  %v922_v7 = vpop.f32.mrb[20].mxu1 }
 0x1a8   :  { %v882_v8 = vadd.f32 %v881_v6, %v3315_v50  ;;  %v923_v11 = vadd.f32 %v922_v7, %v3317_v51  ;;  %v883_v12 = vpop.f32.mrb[21].mxu0  ;;  %v924_v37 = vpop.f32.mrb[21].mxu1 }
 0x1a9   :  { %v884_v38 = vadd.f32 %v883_v12, %v3321_v52  ;;  %v925_v39 = vadd.f32 %v924_v37, %v3323_v54  ;;  %v885_v40 = vpop.f32.mrb[22].mxu0  ;;  %v926_v41 = vpop.f32.mrb[22].mxu1 }
 0x1aa   :  { %v886_v43 = vpop.f32.mrb[23].mxu0  ;;  %v927_v44 = vpop.f32.mrb[23].mxu1 }
 0x1ab   :  { %v2534_v45 = vpack.c.bf16 %v884_v38, %v882_v8  ;;  %v2535_v46 = vpack.c.bf16 %v925_v39, %v923_v11 }
 0x1ad   :  { %v945_v47 = vrot.slane %v2534_v45, %v3331_v62  ;;  %v952_v53 = vrot.slane %v2535_v46, %v3331_v62 }
 0x1af   :  { %v953_v55 = vcombine.low %v945_v47, %v952_v53 }
 0x1b1   :  { %2536 = vst.sshfl [vmem:[#allocation2 + $0x14] sm:$0x55 pattern:$0x73625140] %v953_v55 }
 0x1c7   :  { %v1000_v58 = vpop.f32.mrb[24].mxu0  ;;  %v1041_v59 = vpop.f32.mrb[24].mxu1 }
 0x1c8   :  { %v1001_v60 = vadd.f32 %v1000_v58, %v3315_v50  ;;  %v1042_v61 = vadd.f32 %v1041_v59, %v3317_v51  ;;  %v1002_v2 = vpop.f32.mrb[25].mxu0  ;;  %v1043_v3 = vpop.f32.mrb[25].mxu1 }
 0x1c9   :  { %v1003_v4 = vadd.f32 %v1002_v2, %v3321_v52  ;;  %v1044_v5 = vadd.f32 %v1043_v3, %v3323_v54  ;;  %v1004_v6 = vpop.f32.mrb[26].mxu0  ;;  %v1045_v7 = vpop.f32.mrb[26].mxu1 }
 0x1ca   :  { %v1005_v8 = vpop.f32.mrb[27].mxu0  ;;  %v1046_v11 = vpop.f32.mrb[27].mxu1 }
 0x1cb   :  { %v2538_v12 = vpack.c.bf16 %v1003_v4, %v1001_v60  ;;  %v2539_v37 = vpack.c.bf16 %v1044_v5, %v1042_v61 }
 0x1cd   :  { %v1064_v38 = vrot.slane %v2538_v12, %v3331_v62  ;;  %v1071_v39 = vrot.slane %v2539_v37, %v3331_v62 }
 0x1cf   :  { %v1072_v40 = vcombine.low %v1064_v38, %v1071_v39 }
 0x1d1   :  { %2540 = vst.sshfl [vmem:[#allocation2 + $0x18] sm:$0x55 pattern:$0x73625140] %v1072_v40 }
 0x1e7   :  { %v1119_v41 = vpop.f32.mrb[28].mxu0  ;;  %v1160_v43 = vpop.f32.mrb[28].mxu1 }
 0x1e8   :  { %v1120_v44 = vadd.f32 %v1119_v41, %v3315_v50  ;;  %v1161_v45 = vadd.f32 %v1160_v43, %v3317_v51  ;;  %v1121_v46 = vpop.f32.mrb[29].mxu0  ;;  %v1162_v47 = vpop.f32.mrb[29].mxu1  ;;  %v2829_v50 = vmov 1983009808   ;;  %v3528_v41 = vld [vmem:[#allocation2] sm:$0xff]  }
 0x1e9   :  { %v1122_v53 = vadd.f32 %v1121_v46, %v3321_v52  ;;  %v1163_v55 = vadd.f32 %v1162_v47, %v3323_v54  ;;  %v1123_v58 = vpop.f32.mrb[30].mxu0  ;;  %v1164_v59 = vpop.f32.mrb[30].mxu1  ;;  %v1488_v51 = vunpack.c.l.s4 %v2829_v50  ;;  %v1237_v46 = vunpack.c.l.bf16 %v3528_v41  ;;  %v1235_v50 = vld [vmem:[#allocation4] sm:$0x3] }
 0x1ea   :  { %v1124_v60 = vpop.f32.mrb[31].mxu0  ;;  %v1165_v61 = vpop.f32.mrb[31].mxu1 }
 0x1eb   :  { %v2542_v2 = vpack.c.bf16 %v1122_v53, %v1120_v44  ;;  %v2543_v3 = vpack.c.bf16 %v1163_v55, %v1161_v45  ;;  %v1489_v7 = vunpack.c.0.s8 %v1488_v51 }
 0x1ed   :  { %v1183_v4 = vrot.slane %v2542_v2, %v3331_v62  ;;  %v1190_v5 = vrot.slane %v2543_v3, %v3331_v62  ;;  %v3526_v52 = vsub.s32 %v1489_v7, %v3298_v42 }
 0x1ef   :  { %v1191_v6 = vcombine.low %v1183_v4, %v1190_v5 }
 0x1f1   :  { %2544 = vst.sshfl [vmem:[#allocation2 + $0x1c] sm:$0x55 pattern:$0x73625140] %v1191_v6 }
 0x207   :  { %v1433_v8 = vpop.f32.mrb[32].mxu0  ;;  %v1474_v11 = vpop.f32.mrb[32].mxu1 }
 0x208   :  { %v1435_v54 = vpop.f32.mrb[33].mxu0  ;;  %v1476_v12 = vpop.f32.mrb[33].mxu1 }
 0x209   :  { %v1485_v37 = vcombine.low %v1433_v8, %v1435_v54  ;;  %v1486_v38 = vcombine.low %v1474_v11, %v1476_v12  ;;  %v1437_v39 = vpop.f32.mrb[34].mxu0  ;;  %v1478_v40 = vpop.f32.mrb[34].mxu1 }
 0x20a   :  { %v1438_v43 = vpop.f32.mrb[35].mxu0  ;;  %v1479_v62 = vpop.f32.mrb[35].mxu1 }
 0x20b   :  { %v1493_v44 = vrot.slane %v1485_v37, %v3526_v52  ;;  %v1500_v45 = vrot.slane %v1486_v38, %v3526_v52 }
 0x20d   :  { %v1501_v47 = vcombine.low %v1493_v44, %v1500_v45 }
 0x20f   :  { %v1503_v53 = vadd.f32 %v1501_v47, %v1237_v46 }
 0x211   :  { %v1504_v42 = vmul.f32 0.5, %v1503_v53  ;;  %v1509_v55 = vrot.slane %v1503_v53, 2  ;;  %v1515_v59 = vrot.slane %v1503_v53, 4  ;;  %v1518_v60 = vrot.slane %v1503_v53, 6 }
 0x213   :  { %2687 = vtanh.f32 %v1504_v42  ;;  %v1511_v58 = vmul.f32 0.5, %v1509_v55  ;;  %v1520_v61 = vmul.f32 0.5, %v1518_v60 }
 0x215   :  { %2689 = vtanh.f32 %v1511_v58 }
 0x216   :  { %2691 = vtanh.f32 %v1515_v59 }
 0x217   :  { %2693 = vtanh.f32 %v1520_v61 }
 0x21d   :  { %v2688_v2 = vpop.eup %2687 }
 0x21e   :  { %v1506_v3 = vadd.f32 1.0, %v2688_v2  ;;  %v1531_v2 = vunpack.c.h.bf16 %v3528_v41 }
 0x21f   :  { %v2690_v4 = vpop.eup %2689 }
 0x220   :  { %v1507_v5 = vmul.f32 0.5, %v1506_v3  ;;  %v1513_v6 = vadd.f32 1.0, %v2690_v4  ;;  %v2692_v7 = vpop.eup %2691 }
 0x221   :  { %v2694_v12 = vpop.eup %2693 }
 0x222   :  { %v1514_v51 = vmul.f32 0.5, %v1513_v6  ;;  %v1525_v11 = vmul.f32 %v2692_v7, %v1507_v5  ;;  %v1522_v37 = vadd.f32 1.0, %v2694_v12 }
 0x224   :  { %v1524_v8 = vmul.f32 %v1514_v51, %v1235_v50  ;;  %v1523_v38 = vmul.f32 0.5, %v1522_v37 }
 0x226   :  { %v3533_v54 = vadd.f32 %v1525_v11, %v1524_v8 }
 0x228   :  { %2695 = vtanh.f32 %v3533_v54 }
 0x232   :  { %v2696_v39 = vpop.eup %2695 }
 0x233   :  { %v1528_v40 = vmul.f32 %v2696_v39, %v1523_v38 }
 0x235   :  { %1529 = vst [vmem:[%s3874_s4] sm:$0x3] %v1528_v40  ;;  %v1532_v43 = vpack.c.bf16 %v1528_v40, %v1528_v40 }
 0x237   :  { %1566 = vmatmul.mubr.bf16.vlgmr.msra.gmra.mrb[36].mxu0 %v1532_v43  ;;  %1607 = vmatmul.mubr.bf16.vlgmr.msra.gmra.mrb[36].mxu1 %v1532_v43 }
 0x238   :  { %1669 = vmatpush1.bf16.msra.mxu0 %v3353_v13  ;;  %1710 = vmatpush1.bf16.msra.mxu1 %v3355_v14 }
 0x239   :  { %1670 = vmatprep.subr.bf16.mxu0 %v3359_v15  ;;  %1711 = vmatprep.subr.bf16.mxu1 %v3361_v16 }
 0x23a   :  { %1700 = vmatprep.mubr.bf16.mxu0 %v2826_v0  ;;  %1741 = vmatprep.mubr.bf16.mxu1 %v2826_v0 }
 0x23c   :  { %1671 = vmatpush1.bf16.msra.mxu0 %v3365_v17  ;;  %1712 = vmatpush1.bf16.msra.mxu1 %v3367_v18 }
 0x23d   :  { %1672 = vmatprep.subr.bf16.mxu0 %v3371_v19  ;;  %1713 = vmatprep.subr.bf16.mxu1 %v3373_v20 }
 0x240   :  { %1673 = vmatpush1.bf16.msra.mxu0 %v3379_v21  ;;  %1714 = vmatpush1.bf16.msra.mxu1 %v3381_v22 }
 0x241   :  { %1674 = vmatprep.subr.bf16.mxu0 %v3385_v23  ;;  %1715 = vmatprep.subr.bf16.mxu1 %v3387_v24 }
 0x244   :  { %1675 = vmatpush1.bf16.msra.mxu0 %v3391_v25  ;;  %1716 = vmatpush1.bf16.msra.mxu1 %v3393_v26 }
 0x245   :  { %1676 = vmatprep.subr.bf16.mxu0 %v3397_v27  ;;  %1717 = vmatprep.subr.bf16.mxu1 %v3399_v28 }
 0x248   :  { %1677 = vmatpush1.bf16.msra.mxu0 %v3403_v29  ;;  %1718 = vmatpush1.bf16.msra.mxu1 %v3405_v30 }
 0x249   :  { %1678 = vmatprep.subr.bf16.mxu0 %v3409_v31  ;;  %1719 = vmatprep.subr.bf16.mxu1 %v3411_v32 }
 0x24c   :  { %1679 = vmatpush1.bf16.msra.mxu0 %v3415_v33  ;;  %1720 = vmatpush1.bf16.msra.mxu1 %v3417_v34 }
 0x24d   :  { %1680 = vmatprep.subr.bf16.mxu0 %v3421_v35  ;;  %1721 = vmatprep.subr.bf16.mxu1 %v3423_v36 }
 0x250   :  { %1681 = vmatpush1.bf16.msra.mxu0 %v3431_v48  ;;  %1722 = vmatpush1.bf16.msra.mxu1 %v3433_v49 }
 0x251   :  { %1682 = vmatprep.subr.bf16.mxu0 %v3437_v56  ;;  %1723 = vmatprep.subr.bf16.mxu1 %v3439_v57 }
 0x254   :  { %1683 = vmatpush1.bf16.msra.mxu0 %v3445_v63  ;;  %1724 = vmatpush1.bf16.msra.mxu1 %v3447_v1 }
 0x255   :  { %1803 = vmatprep.subr.bf16.mxu0 %v3344_v9  ;;  %1844 = vmatprep.subr.bf16.mxu1 %v3346_v10 }
 0x30a   :  { %v1567_v62 = vpop.f32.mrb[36].mxu0  ;;  %v1608_v44 = vpop.f32.mrb[36].mxu1 }
 0x30b   :  { %v1569_v45 = vpop.f32.mrb[37].mxu0  ;;  %v1610_v46 = vpop.f32.mrb[37].mxu1 }
 0x30c   :  { %v1619_v47 = vcombine.low %v1567_v62, %v1569_v45  ;;  %v1620_v53 = vcombine.low %v1608_v44, %v1610_v46  ;;  %v1571_v42 = vpop.f32.mrb[38].mxu0  ;;  %v1612_v55 = vpop.f32.mrb[38].mxu1 }
 0x30d   :  { %v1572_v58 = vpop.f32.mrb[39].mxu0  ;;  %v1613_v59 = vpop.f32.mrb[39].mxu1 }
 0x30e   :  { %v1627_v60 = vrot.slane %v1619_v47, %v3526_v52  ;;  %v1634_v61 = vrot.slane %v1620_v53, %v3526_v52 }
 0x310   :  { %v1635_v3 = vcombine.low %v1627_v60, %v1634_v61 }
 0x312   :  { %v1637_v4 = vadd.f32 %v1635_v3, %v1531_v2 }
 0x314   :  { %v1638_v5 = vmul.f32 0.5, %v1637_v4  ;;  %v1643_v6 = vrot.slane %v1637_v4, 2  ;;  %v1649_v51 = vrot.slane %v1637_v4, 4  ;;  %v1652_v7 = vrot.slane %v1637_v4, 6 }
 0x316   :  { %2697 = vtanh.f32 %v1638_v5  ;;  %v1645_v50 = vmul.f32 0.5, %v1643_v6  ;;  %v1654_v8 = vmul.f32 0.5, %v1652_v7  ;;  %v3617_v5 = vld [vmem:[#allocation2 + $0x8] sm:$0xff]  }
 0x318   :  { %2699 = vtanh.f32 %v1645_v50 }
 0x319   :  { %2701 = vtanh.f32 %v1649_v51 }
 0x31a   :  { %2703 = vtanh.f32 %v1654_v8  ;;  %v1666_v8 = vunpack.c.l.bf16 %v3617_v5 }
 0x320   :  { %v2698_v11 = vpop.eup %2697 }
 0x321   :  { %v1640_v12 = vadd.f32 1.0, %v2698_v11 }
 0x322   :  { %v2700_v37 = vpop.eup %2699 }
 0x323   :  { %v1641_v38 = vmul.f32 0.5, %v1640_v12  ;;  %v1647_v39 = vadd.f32 1.0, %v2700_v37  ;;  %v2702_v43 = vpop.eup %2701 }
 0x324   :  { %v2704_v45 = vpop.eup %2703 }
 0x325   :  { %v1648_v40 = vmul.f32 0.5, %v1647_v39  ;;  %v1659_v62 = vmul.f32 %v2702_v43, %v1641_v38  ;;  %v1656_v46 = vadd.f32 1.0, %v2704_v45 }
 0x327   :  { %v1658_v41 = vmul.f32 %v1648_v40, %v3533_v54  ;;  %v1657_v47 = vmul.f32 0.5, %v1656_v46 }
 0x329   :  { %v3577_v44 = vadd.f32 %v1659_v62, %v1658_v41 }
 0x32b   :  { %2705 = vtanh.f32 %v3577_v44 }
 0x335   :  { %v2706_v53 = vpop.eup %2705 }
 0x336   :  { %v1662_v42 = vmul.f32 %v2706_v53, %v1657_v47 }
 0x338   :  { %2577 = vst [vmem:[%s3874_s4 + $0x2] sm:$0x3] %v1662_v42  ;;  %v1667_v55 = vpack.c.bf16 %v1662_v42, %v1662_v42 }
 0x33a   :  { %1701 = vmatmul.mubr.bf16.vlgmr.msra.gmra.mrb[40].mxu0 %v1667_v55  ;;  %1742 = vmatmul.mubr.bf16.vlgmr.msra.gmra.mrb[40].mxu1 %v1667_v55 }
 0x33b   :  { %1804 = vmatpush1.bf16.msra.mxu0 %v3353_v13  ;;  %1845 = vmatpush1.bf16.msra.mxu1 %v3355_v14 }
 0x33c   :  { %1805 = vmatprep.subr.bf16.mxu0 %v3359_v15  ;;  %1846 = vmatprep.subr.bf16.mxu1 %v3361_v16 }
 0x33d   :  { %1835 = vmatprep.mubr.bf16.mxu0 %v2826_v0  ;;  %1876 = vmatprep.mubr.bf16.mxu1 %v2826_v0 }
 0x33f   :  { %1806 = vmatpush1.bf16.msra.mxu0 %v3365_v17  ;;  %1847 = vmatpush1.bf16.msra.mxu1 %v3367_v18 }
 0x340   :  { %1807 = vmatprep.subr.bf16.mxu0 %v3371_v19  ;;  %1848 = vmatprep.subr.bf16.mxu1 %v3373_v20 }
 0x343   :  { %1808 = vmatpush1.bf16.msra.mxu0 %v3379_v21  ;;  %1849 = vmatpush1.bf16.msra.mxu1 %v3381_v22 }
 0x344   :  { %1809 = vmatprep.subr.bf16.mxu0 %v3385_v23  ;;  %1850 = vmatprep.subr.bf16.mxu1 %v3387_v24 }
 0x347   :  { %1810 = vmatpush1.bf16.msra.mxu0 %v3391_v25  ;;  %1851 = vmatpush1.bf16.msra.mxu1 %v3393_v26 }
 0x348   :  { %1811 = vmatprep.subr.bf16.mxu0 %v3397_v27  ;;  %1852 = vmatprep.subr.bf16.mxu1 %v3399_v28 }
 0x34b   :  { %1812 = vmatpush1.bf16.msra.mxu0 %v3403_v29  ;;  %1853 = vmatpush1.bf16.msra.mxu1 %v3405_v30 }
 0x34c   :  { %1813 = vmatprep.subr.bf16.mxu0 %v3409_v31  ;;  %1854 = vmatprep.subr.bf16.mxu1 %v3411_v32 }
 0x34f   :  { %1814 = vmatpush1.bf16.msra.mxu0 %v3415_v33  ;;  %1855 = vmatpush1.bf16.msra.mxu1 %v3417_v34 }
 0x350   :  { %1815 = vmatprep.subr.bf16.mxu0 %v3421_v35  ;;  %1856 = vmatprep.subr.bf16.mxu1 %v3423_v36 }
 0x353   :  { %1816 = vmatpush1.bf16.msra.mxu0 %v3431_v48  ;;  %1857 = vmatpush1.bf16.msra.mxu1 %v3433_v49 }
 0x354   :  { %1817 = vmatprep.subr.bf16.mxu0 %v3437_v56  ;;  %1858 = vmatprep.subr.bf16.mxu1 %v3439_v57 }
 0x357   :  { %1818 = vmatpush1.bf16.msra.mxu0 %v3445_v63  ;;  %1859 = vmatpush1.bf16.msra.mxu1 %v3447_v1 }
 0x358   :  { %1938 = vmatprep.subr.bf16.mxu0 %v3344_v9  ;;  %1979 = vmatprep.subr.bf16.mxu1 %v3346_v10 }
 0x40d   :  { %v1702_v54 = vpop.f32.mrb[40].mxu0  ;;  %v1743_v58 = vpop.f32.mrb[40].mxu1 }
 0x40e   :  { %v1704_v59 = vpop.f32.mrb[41].mxu0  ;;  %v1745_v60 = vpop.f32.mrb[41].mxu1 }
 0x40f   :  { %v1754_v61 = vcombine.low %v1702_v54, %v1704_v59  ;;  %v1755_v2 = vcombine.low %v1743_v58, %v1745_v60  ;;  %v1706_v3 = vpop.f32.mrb[42].mxu0  ;;  %v1747_v4 = vpop.f32.mrb[42].mxu1 }
 0x410   :  { %v1707_v6 = vpop.f32.mrb[43].mxu0  ;;  %v1748_v50 = vpop.f32.mrb[43].mxu1 }
 0x411   :  { %v1762_v51 = vrot.slane %v1754_v61, %v3526_v52  ;;  %v1769_v7 = vrot.slane %v1755_v2, %v3526_v52 }
 0x413   :  { %v1770_v11 = vcombine.low %v1762_v51, %v1769_v7 }
 0x415   :  { %v1772_v12 = vadd.f32 %v1770_v11, %v1666_v8  ;;  %v1801_v8 = vunpack.c.h.bf16 %v3617_v5 }
 0x417   :  { %v1773_v37 = vmul.f32 0.5, %v1772_v12  ;;  %v1778_v38 = vrot.slane %v1772_v12, 2  ;;  %v1784_v40 = vrot.slane %v1772_v12, 4  ;;  %v1787_v43 = vrot.slane %v1772_v12, 6 }
 0x419   :  { %2707 = vtanh.f32 %v1773_v37  ;;  %v1780_v39 = vmul.f32 0.5, %v1778_v38  ;;  %v1789_v41 = vmul.f32 0.5, %v1787_v43 }
 0x41b   :  { %2709 = vtanh.f32 %v1780_v39 }
 0x41c   :  { %2711 = vtanh.f32 %v1784_v40 }
 0x41d   :  { %2713 = vtanh.f32 %v1789_v41 }
 0x423   :  { %v2708_v62 = vpop.eup %2707 }
 0x424   :  { %v1775_v45 = vadd.f32 1.0, %v2708_v62 }
 0x425   :  { %v2710_v46 = vpop.eup %2709 }
 0x426   :  { %v1776_v47 = vmul.f32 0.5, %v1775_v45  ;;  %v1782_v53 = vadd.f32 1.0, %v2710_v46  ;;  %v2712_v55 = vpop.eup %2711 }
 0x427   :  { %v2714_v60 = vpop.eup %2713 }
 0x428   :  { %v1783_v42 = vmul.f32 0.5, %v1782_v53  ;;  %v1794_v58 = vmul.f32 %v2712_v55, %v1776_v47  ;;  %v1791_v61 = vadd.f32 1.0, %v2714_v60 }
 0x42a   :  { %v1793_v54 = vmul.f32 %v1783_v42, %v3577_v44  ;;  %v1792_v2 = vmul.f32 0.5, %v1791_v61 }
 0x42c   :  { %v3623_v59 = vadd.f32 %v1794_v58, %v1793_v54 }
 0x42e   :  { %2715 = vtanh.f32 %v3623_v59 }
 0x438   :  { %v2716_v3 = vpop.eup %2715 }
 0x439   :  { %v1797_v4 = vmul.f32 %v2716_v3, %v1792_v2 }
 0x43b   :  { %2578 = vst [vmem:[%s3874_s4 + $0x4] sm:$0x3] %v1797_v4  ;;  %v1802_v6 = vpack.c.bf16 %v1797_v4, %v1797_v4  ;;  %v3673_v4 = vld [vmem:[#allocation5] ss:$16 sps:$4 sm:$0xff]  }
 0x43d   :  { %1836 = vmatmul.mubr.bf16.vlgmr.msra.gmra.mrb[44].mxu0 %v1802_v6  ;;  %1877 = vmatmul.mubr.bf16.vlgmr.msra.gmra.mrb[44].mxu1 %v1802_v6  ;;  %v3679_v6 = vld [vmem:[#allocation5 + $0x24] ss:$16 sps:$4 sm:$0xff]  }
 0x43e   :  { %1939 = vmatpush1.bf16.msra.mxu0 %v3353_v13  ;;  %1980 = vmatpush1.bf16.msra.mxu1 %v3355_v14 }
 0x43f   :  { %1940 = vmatprep.subr.bf16.mxu0 %v3359_v15  ;;  %1981 = vmatprep.subr.bf16.mxu1 %v3361_v16 }
 0x440   :  { %1970 = vmatprep.mubr.bf16.mxu0 %v2826_v0  ;;  %2011 = vmatprep.mubr.bf16.mxu1 %v2826_v0 }
 0x442   :  { %1941 = vmatpush1.bf16.msra.mxu0 %v3365_v17  ;;  %1982 = vmatpush1.bf16.msra.mxu1 %v3367_v18 }
 0x443   :  { %1942 = vmatprep.subr.bf16.mxu0 %v3371_v19  ;;  %1983 = vmatprep.subr.bf16.mxu1 %v3373_v20 }
 0x446   :  { %1943 = vmatpush1.bf16.msra.mxu0 %v3379_v21  ;;  %1984 = vmatpush1.bf16.msra.mxu1 %v3381_v22 }
 0x447   :  { %1944 = vmatprep.subr.bf16.mxu0 %v3385_v23  ;;  %1985 = vmatprep.subr.bf16.mxu1 %v3387_v24 }
 0x44a   :  { %1945 = vmatpush1.bf16.msra.mxu0 %v3391_v25  ;;  %1986 = vmatpush1.bf16.msra.mxu1 %v3393_v26 }
 0x44b   :  { %1946 = vmatprep.subr.bf16.mxu0 %v3397_v27  ;;  %1987 = vmatprep.subr.bf16.mxu1 %v3399_v28 }
 0x44e   :  { %1947 = vmatpush1.bf16.msra.mxu0 %v3403_v29  ;;  %1988 = vmatpush1.bf16.msra.mxu1 %v3405_v30 }
 0x44f   :  { %1948 = vmatprep.subr.bf16.mxu0 %v3409_v31  ;;  %1989 = vmatprep.subr.bf16.mxu1 %v3411_v32 }
 0x452   :  { %1949 = vmatpush1.bf16.msra.mxu0 %v3415_v33  ;;  %1990 = vmatpush1.bf16.msra.mxu1 %v3417_v34 }
 0x453   :  { %1950 = vmatprep.subr.bf16.mxu0 %v3421_v35  ;;  %1991 = vmatprep.subr.bf16.mxu1 %v3423_v36 }
 0x456   :  { %1951 = vmatpush1.bf16.msra.mxu0 %v3431_v48  ;;  %1992 = vmatpush1.bf16.msra.mxu1 %v3433_v49 }
 0x457   :  { %1952 = vmatprep.subr.bf16.mxu0 %v3437_v56  ;;  %1993 = vmatprep.subr.bf16.mxu1 %v3439_v57 }
 0x45a   :  { %1953 = vmatpush1.bf16.msra.mxu0 %v3445_v63  ;;  %1994 = vmatpush1.bf16.msra.mxu1 %v3447_v1 }
 0x45b   :  { %2073 = vmatprep.subr.bf16.mxu0 %v3344_v9  ;;  %2114 = vmatprep.subr.bf16.mxu1 %v3346_v10 }
 0x510   :  { %v1837_v13 = vpop.f32.mrb[44].mxu0  ;;  %v1878_v14 = vpop.f32.mrb[44].mxu1 }
 0x511   :  { %v1839_v15 = vpop.f32.mrb[45].mxu0  ;;  %v1880_v16 = vpop.f32.mrb[45].mxu1 }
 0x512   :  { %v1889_v17 = vcombine.low %v1837_v13, %v1839_v15  ;;  %v1890_v18 = vcombine.low %v1878_v14, %v1880_v16  ;;  %v1841_v19 = vpop.f32.mrb[46].mxu0  ;;  %v1882_v20 = vpop.f32.mrb[46].mxu1  ;;  %v3682_v13 = vld [vmem:[#allocation5 + $0x2c] ss:$16 sps:$4 sm:$0xff]   ;;  %v3687_v14 = vld [vmem:[#allocation5 + $0x20] ss:$16 sps:$4 sm:$0xff]  }
 0x513   :  { %v1842_v44 = vpop.f32.mrb[47].mxu0  ;;  %v1883_v50 = vpop.f32.mrb[47].mxu1  ;;  %v3690_v15 = vld [vmem:[#allocation5 + $0x28] ss:$16 sps:$4 sm:$0xff]   ;;  %v3693_v16 = vld [vmem:[#allocation5 + $0x44] ss:$16 sps:$4 sm:$0xff]  }
 0x514   :  { %v1897_v51 = vrot.slane %v1889_v17, %v3526_v52  ;;  %v1904_v7 = vrot.slane %v1890_v18, %v3526_v52  ;;  %v3696_v17 = vld [vmem:[#allocation5 + $0x4c] ss:$16 sps:$4 sm:$0xff]  }
 0x516   :  { %v1905_v11 = vcombine.low %v1897_v51, %v1904_v7 }
 0x518   :  { %v1907_v9 = vadd.f32 %v1905_v11, %v1801_v8 }
 0x51a   :  { %v1908_v12 = vmul.f32 0.5, %v1907_v9  ;;  %v1913_v10 = vrot.slane %v1907_v9, 2  ;;  %v1919_v38 = vrot.slane %v1907_v9, 4  ;;  %v1922_v39 = vrot.slane %v1907_v9, 6 }
 0x51c   :  { %2717 = vtanh.f32 %v1908_v12  ;;  %v1915_v37 = vmul.f32 0.5, %v1913_v10  ;;  %v1924_v40 = vmul.f32 0.5, %v1922_v39 }
 0x51e   :  { %2719 = vtanh.f32 %v1915_v37 }
 0x51f   :  { %2721 = vtanh.f32 %v1919_v38 }
 0x520   :  { %2723 = vtanh.f32 %v1924_v40 }
 0x526   :  { %v2718_v43 = vpop.eup %2717 }
 0x527   :  { %v1910_v41 = vadd.f32 1.0, %v2718_v43 }
 0x528   :  { %v2720_v62 = vpop.eup %2719 }
 0x529   :  { %v1911_v45 = vmul.f32 0.5, %v1910_v41  ;;  %v1917_v46 = vadd.f32 1.0, %v2720_v62  ;;  %v2722_v53 = vpop.eup %2721  ;;  %v3749_v62 = vld [vmem:[#allocation5 + $0x40] ss:$16 sps:$4 sm:$0xff]  }
 0x52a   :  { %v2724_v54 = vpop.eup %2723 }
 0x52b   :  { %v1918_v47 = vmul.f32 0.5, %v1917_v46  ;;  %v1929_v42 = vmul.f32 %v2722_v53, %v1911_v45  ;;  %v1926_v58 = vadd.f32 1.0, %v2724_v54  ;;  %v3752_v45 = vld [vmem:[#allocation5 + $0x48] ss:$16 sps:$4 sm:$0xff]   ;;  %v3755_v46 = vld [vmem:[#allocation5 + $0x64] ss:$16 sps:$4 sm:$0xff]  }
 0x52c   :  { %v3761_v53 = vld [vmem:[#allocation5 + $0x60] ss:$16 sps:$4 sm:$0xff]  }
 0x52d   :  { %v1928_v5 = vmul.f32 %v1918_v47, %v3623_v59  ;;  %v1927_v60 = vmul.f32 0.5, %v1926_v58  ;;  %v3676_v59 = vld [vmem:[#allocation5 + $0x8] ss:$16 sps:$4 sm:$0xff]   ;;  %v3758_v47 = vld [vmem:[#allocation5 + $0x6c] ss:$16 sps:$4 sm:$0xff]  }
 0x52e   :  { %v3773_v54 = vld [vmem:[#allocation5 + $0x80] ss:$16 sps:$4 sm:$0xff]   ;;  %v3776_v58 = vld [vmem:[#allocation5 + $0x88] ss:$16 sps:$4 sm:$0xff]  }
 0x52f   :  { %v3667_v55 = vadd.f32 %v1929_v42, %v1928_v5  ;;  %v3764_v5 = vld [vmem:[#allocation5 + $0x68] ss:$16 sps:$4 sm:$0xff]   ;;  %v3767_v42 = vld [vmem:[#allocation5 + $0x84] ss:$16 sps:$4 sm:$0xff]  }
 0x531   :  { %2725 = vtanh.f32 %v3667_v55 }
 0x53b   :  { %v2726_v61 = vpop.eup %2725 }
 0x53c   :  { %v1932_v2 = vmul.f32 %v2726_v61, %v1927_v60  ;;  %v3779_v60 = vld [vmem:[#allocation5 + $0xa4] ss:$16 sps:$4 sm:$0xff]   ;;  %v3782_v61 = vld [vmem:[#allocation5 + $0xac] ss:$16 sps:$4 sm:$0xff]  }
 0x53e   :  { %2579 = vst [vmem:[%s3874_s4 + $0x6] sm:$0x3] %v1932_v2  ;;  %v1937_v3 = vpack.c.bf16 %v1932_v2, %v1932_v2  ;;  %v3785_v2 = vld [vmem:[#allocation5 + $0xa0] ss:$16 sps:$4 sm:$0xff]  }
 0x540   :  { %1971 = vmatmul.mubr.bf16.vlgmr.msra.gmra.mrb[48].mxu0 %v1937_v3  ;;  %2012 = vmatmul.mubr.bf16.vlgmr.msra.gmra.mrb[48].mxu1 %v1937_v3  ;;  %v3788_v3 = vld [vmem:[#allocation5 + $0xa8] ss:$16 sps:$4 sm:$0xff]  }
 0x541   :  { %2074 = vmatpush1.bf16.msra.mxu0 %v3673_v4  ;;  %2115 = vmatpush1.bf16.msra.mxu1 %v3676_v59 }
 0x542   :  { %2075 = vmatprep.subr.bf16.mxu0 %v3679_v6  ;;  %2116 = vmatprep.subr.bf16.mxu1 %v3682_v13 }
 0x543   :  { %2105 = vmatprep.mubr.bf16.mxu0 %v2826_v0  ;;  %2146 = vmatprep.mubr.bf16.mxu1 %v2826_v0 }
 0x545   :  { %2076 = vmatpush1.bf16.msra.mxu0 %v3687_v14  ;;  %2117 = vmatpush1.bf16.msra.mxu1 %v3690_v15 }
 0x546   :  { %2077 = vmatprep.subr.bf16.mxu0 %v3693_v16  ;;  %2118 = vmatprep.subr.bf16.mxu1 %v3696_v17 }
 0x549   :  { %2078 = vmatpush1.bf16.msra.mxu0 %v3379_v21  ;;  %2119 = vmatpush1.bf16.msra.mxu1 %v3381_v22  ;;  %v3721_v21 = vld [vmem:[#allocation5 + $0x4] ss:$16 sps:$4 sm:$0xff]   ;;  %v3724_v22 = vld [vmem:[#allocation5 + $0xc] ss:$16 sps:$4 sm:$0xff]  }
 0x54a   :  { %2079 = vmatprep.subr.bf16.mxu0 %v3385_v23  ;;  %2120 = vmatprep.subr.bf16.mxu1 %v3387_v24 }
 0x54d   :  { %2080 = vmatpush1.bf16.msra.mxu0 %v3391_v25  ;;  %2121 = vmatpush1.bf16.msra.mxu1 %v3393_v26 }
 0x54e   :  { %2081 = vmatprep.subr.bf16.mxu0 %v3397_v27  ;;  %2122 = vmatprep.subr.bf16.mxu1 %v3399_v28 }
 0x551   :  { %2082 = vmatpush1.bf16.msra.mxu0 %v3403_v29  ;;  %2123 = vmatpush1.bf16.msra.mxu1 %v3405_v30 }
 0x552   :  { %2083 = vmatprep.subr.bf16.mxu0 %v3409_v31  ;;  %2124 = vmatprep.subr.bf16.mxu1 %v3411_v32  ;;  %v3727_v31 = vld [vmem:[#allocation2 + $0x10] sm:$0xff]  }
 0x555   :  { %2084 = vmatpush1.bf16.msra.mxu0 %v3415_v33  ;;  %2125 = vmatpush1.bf16.msra.mxu1 %v3417_v34 }
 0x556   :  { %2085 = vmatprep.subr.bf16.mxu0 %v3421_v35  ;;  %2126 = vmatprep.subr.bf16.mxu1 %v3423_v36  ;;  %v1936_v36 = vunpack.c.l.bf16 %v3727_v31 }
 0x559   :  { %2086 = vmatpush1.bf16.msra.mxu0 %v3431_v48  ;;  %2127 = vmatpush1.bf16.msra.mxu1 %v3433_v49 }
 0x55a   :  { %2087 = vmatprep.subr.bf16.mxu0 %v3437_v56  ;;  %2128 = vmatprep.subr.bf16.mxu1 %v3439_v57 }
 0x55d   :  { %2088 = vmatpush1.bf16.msra.mxu0 %v3445_v63  ;;  %2129 = vmatpush1.bf16.msra.mxu1 %v3447_v1 }
 0x55e   :  { %2208 = vmatprep.subr.bf16.mxu0 %v3721_v21  ;;  %2249 = vmatprep.subr.bf16.mxu1 %v3724_v22 }
 0x613   :  { %v1972_v23 = vpop.f32.mrb[48].mxu0  ;;  %v2013_v24 = vpop.f32.mrb[48].mxu1 }
 0x614   :  { %v1974_v25 = vpop.f32.mrb[49].mxu0  ;;  %v2015_v26 = vpop.f32.mrb[49].mxu1 }
 0x615   :  { %v2024_v27 = vcombine.low %v1972_v23, %v1974_v25  ;;  %v2025_v28 = vcombine.low %v2013_v24, %v2015_v26  ;;  %v1976_v29 = vpop.f32.mrb[50].mxu0  ;;  %v2017_v30 = vpop.f32.mrb[50].mxu1  ;;  %v3791_v23 = vld [vmem:[#allocation5 + $0xc4] ss:$16 sps:$4 sm:$0xff]   ;;  %v3794_v24 = vld [vmem:[#allocation5 + $0xcc] ss:$16 sps:$4 sm:$0xff]  }
 0x616   :  { %v1977_v32 = vpop.f32.mrb[51].mxu0  ;;  %v2018_v33 = vpop.f32.mrb[51].mxu1  ;;  %v3797_v25 = vld [vmem:[#allocation5 + $0xc0] ss:$16 sps:$4 sm:$0xff]   ;;  %v3800_v26 = vld [vmem:[#allocation5 + $0xc8] ss:$16 sps:$4 sm:$0xff]  }
 0x617   :  { %v2032_v34 = vrot.slane %v2024_v27, %v3526_v52  ;;  %v2039_v35 = vrot.slane %v2025_v28, %v3526_v52  ;;  %v3803_v27 = vld [vmem:[#allocation5 + $0xe4] ss:$16 sps:$4 sm:$0xff]   ;;  %v3806_v28 = vld [vmem:[#allocation5 + $0xec] ss:$16 sps:$4 sm:$0xff]   ;;  %v3809_v29 = vld [vmem:[#allocation5 + $0xe0] ss:$16 sps:$4 sm:$0xff]  }
 0x618   :  { %v3812_v30 = vld [vmem:[#allocation5 + $0xe8] ss:$16 sps:$4 sm:$0xff]  }
 0x619   :  { %v2040_v48 = vcombine.low %v2032_v34, %v2039_v35 }
 0x61b   :  { %v2042_v49 = vadd.f32 %v2040_v48, %v1936_v36 }
 0x61d   :  { %v2043_v56 = vmul.f32 0.5, %v2042_v49  ;;  %v2048_v57 = vrot.slane %v2042_v49, 2  ;;  %v2054_v1 = vrot.slane %v2042_v49, 4  ;;  %v2057_v18 = vrot.slane %v2042_v49, 6 }
 0x61f   :  { %2727 = vtanh.f32 %v2043_v56  ;;  %v2050_v63 = vmul.f32 0.5, %v2048_v57  ;;  %v2059_v19 = vmul.f32 0.5, %v2057_v18 }
 0x621   :  { %2729 = vtanh.f32 %v2050_v63 }
 0x622   :  { %2731 = vtanh.f32 %v2054_v1 }
 0x623   :  { %2733 = vtanh.f32 %v2059_v19  ;;  %v2071_v19 = vunpack.c.h.bf16 %v3727_v31 }
 0x629   :  { %v2728_v20 = vpop.eup %2727 }
 0x62a   :  { %v2045_v44 = vadd.f32 1.0, %v2728_v20 }
 0x62b   :  { %v2730_v50 = vpop.eup %2729 }
 0x62c   :  { %v2046_v51 = vmul.f32 0.5, %v2045_v44  ;;  %v2052_v7 = vadd.f32 1.0, %v2730_v50  ;;  %v2732_v11 = vpop.eup %2731 }
 0x62d   :  { %v2734_v37 = vpop.eup %2733 }
 0x62e   :  { %v2053_v8 = vmul.f32 0.5, %v2052_v7  ;;  %v2064_v12 = vmul.f32 %v2732_v11, %v2046_v51  ;;  %v2061_v38 = vadd.f32 1.0, %v2734_v37 }
 0x630   :  { %v2063_v9 = vmul.f32 %v2053_v8, %v3667_v55  ;;  %v2062_v39 = vmul.f32 0.5, %v2061_v38  ;;  %v3770_v55 = vld [vmem:[#allocation5 + $0x8c] ss:$16 sps:$4 sm:$0xff]  }
 0x632   :  { %v3733_v10 = vadd.f32 %v2064_v12, %v2063_v9 }
 0x634   :  { %2735 = vtanh.f32 %v3733_v10 }
 0x63e   :  { %v2736_v40 = vpop.eup %2735 }
 0x63f   :  { %v2067_v43 = vmul.f32 %v2736_v40, %v2062_v39 }
 0x641   :  { %2580 = vst [vmem:[%s3874_s4 + $0x8] sm:$0x3] %v2067_v43  ;;  %v2072_v41 = vpack.c.bf16 %v2067_v43, %v2067_v43 }
 0x643   :  { %2106 = vmatmul.mubr.bf16.vlgmr.msra.gmra.mrb[52].mxu0 %v2072_v41  ;;  %2147 = vmatmul.mubr.bf16.vlgmr.msra.gmra.mrb[52].mxu1 %v2072_v41 }
 0x644   :  { %2209 = vmatpush1.bf16.msra.mxu0 %v3673_v4  ;;  %2250 = vmatpush1.bf16.msra.mxu1 %v3676_v59 }
 0x645   :  { %2210 = vmatprep.subr.bf16.mxu0 %v3679_v6  ;;  %2251 = vmatprep.subr.bf16.mxu1 %v3682_v13 }
 0x646   :  { %2240 = vmatprep.mubr.bf16.mxu0 %v2826_v0  ;;  %2281 = vmatprep.mubr.bf16.mxu1 %v2826_v0 }
 0x648   :  { %2211 = vmatpush1.bf16.msra.mxu0 %v3687_v14  ;;  %2252 = vmatpush1.bf16.msra.mxu1 %v3690_v15 }
 0x649   :  { %2212 = vmatprep.subr.bf16.mxu0 %v3693_v16  ;;  %2253 = vmatprep.subr.bf16.mxu1 %v3696_v17 }
 0x64c   :  { %2213 = vmatpush1.bf16.msra.mxu0 %v3749_v62  ;;  %2254 = vmatpush1.bf16.msra.mxu1 %v3752_v45 }
 0x64d   :  { %2214 = vmatprep.subr.bf16.mxu0 %v3755_v46  ;;  %2255 = vmatprep.subr.bf16.mxu1 %v3758_v47 }
 0x650   :  { %2215 = vmatpush1.bf16.msra.mxu0 %v3761_v53  ;;  %2256 = vmatpush1.bf16.msra.mxu1 %v3764_v5 }
 0x651   :  { %2216 = vmatprep.subr.bf16.mxu0 %v3767_v42  ;;  %2257 = vmatprep.subr.bf16.mxu1 %v3770_v55 }
 0x654   :  { %2217 = vmatpush1.bf16.msra.mxu0 %v3773_v54  ;;  %2258 = vmatpush1.bf16.msra.mxu1 %v3776_v58 }
 0x655   :  { %2218 = vmatprep.subr.bf16.mxu0 %v3779_v60  ;;  %2259 = vmatprep.subr.bf16.mxu1 %v3782_v61 }
 0x658   :  { %2219 = vmatpush1.bf16.msra.mxu0 %v3785_v2  ;;  %2260 = vmatpush1.bf16.msra.mxu1 %v3788_v3 }
 0x659   :  { %2220 = vmatprep.subr.bf16.mxu0 %v3791_v23  ;;  %2261 = vmatprep.subr.bf16.mxu1 %v3794_v24 }
 0x65c   :  { %2221 = vmatpush1.bf16.msra.mxu0 %v3797_v25  ;;  %2262 = vmatpush1.bf16.msra.mxu1 %v3800_v26 }
 0x65d   :  { %2222 = vmatprep.subr.bf16.mxu0 %v3803_v27  ;;  %2263 = vmatprep.subr.bf16.mxu1 %v3806_v28 }
 0x660   :  { %2223 = vmatpush1.bf16.msra.mxu0 %v3809_v29  ;;  %2264 = vmatpush1.bf16.msra.mxu1 %v3812_v30 }
 0x661   :  { %2343 = vmatprep.subr.bf16.mxu0 %v3721_v21  ;;  %2384 = vmatprep.subr.bf16.mxu1 %v3724_v22 }
 0x716   :  { %v2107_v32 = vpop.f32.mrb[52].mxu0  ;;  %v2148_v33 = vpop.f32.mrb[52].mxu1 }
 0x717   :  { %v2109_v34 = vpop.f32.mrb[53].mxu0  ;;  %v2150_v35 = vpop.f32.mrb[53].mxu1 }
 0x718   :  { %v2159_v36 = vcombine.low %v2107_v32, %v2109_v34  ;;  %v2160_v48 = vcombine.low %v2148_v33, %v2150_v35  ;;  %v2111_v49 = vpop.f32.mrb[54].mxu0  ;;  %v2152_v56 = vpop.f32.mrb[54].mxu1 }
 0x719   :  { %v2112_v57 = vpop.f32.mrb[55].mxu0  ;;  %v2153_v63 = vpop.f32.mrb[55].mxu1 }
 0x71a   :  { %v2167_v1 = vrot.slane %v2159_v36, %v3526_v52  ;;  %v2174_v18 = vrot.slane %v2160_v48, %v3526_v52 }
 0x71c   :  { %v2175_v20 = vcombine.low %v2167_v1, %v2174_v18 }
 0x71e   :  { %v2177_v21 = vadd.f32 %v2175_v20, %v2071_v19 }
 0x720   :  { %v2178_v44 = vmul.f32 0.5, %v2177_v21  ;;  %v2183_v22 = vrot.slane %v2177_v21, 2  ;;  %v2189_v51 = vrot.slane %v2177_v21, 4  ;;  %v2192_v7 = vrot.slane %v2177_v21, 6 }
 0x722   :  { %2737 = vtanh.f32 %v2178_v44  ;;  %v2185_v50 = vmul.f32 0.5, %v2183_v22  ;;  %v2194_v8 = vmul.f32 0.5, %v2192_v7 }
 0x724   :  { %2739 = vtanh.f32 %v2185_v50 }
 0x725   :  { %2741 = vtanh.f32 %v2189_v51 }
 0x726   :  { %2743 = vtanh.f32 %v2194_v8 }
 0x72c   :  { %v2738_v11 = vpop.eup %2737 }
 0x72d   :  { %v2180_v9 = vadd.f32 1.0, %v2738_v11 }
 0x72e   :  { %v2740_v12 = vpop.eup %2739 }
 0x72f   :  { %v2181_v37 = vmul.f32 0.5, %v2180_v9  ;;  %v2187_v38 = vadd.f32 1.0, %v2740_v12  ;;  %v2742_v40 = vpop.eup %2741 }
 0x730   :  { %v2744_v32 = vpop.eup %2743 }
 0x731   :  { %v2188_v39 = vmul.f32 0.5, %v2187_v38  ;;  %v2199_v43 = vmul.f32 %v2742_v40, %v2181_v37  ;;  %v2196_v33 = vadd.f32 1.0, %v2744_v32 }
 0x733   :  { %v2198_v31 = vmul.f32 %v2188_v39, %v3733_v10  ;;  %v2197_v34 = vmul.f32 0.5, %v2196_v33 }
 0x735   :  { %v3821_v41 = vadd.f32 %v2199_v43, %v2198_v31 }
 0x737   :  { %2745 = vtanh.f32 %v3821_v41 }
 0x741   :  { %v2746_v35 = vpop.eup %2745 }
 0x742   :  { %v2202_v36 = vmul.f32 %v2746_v35, %v2197_v34 }
 0x744   :  { %2581 = vst [vmem:[%s3874_s4 + $0xa] sm:$0x3] %v2202_v36  ;;  %v2207_v48 = vpack.c.bf16 %v2202_v36, %v2202_v36 }
 0x746   :  { %2241 = vmatmul.mubr.bf16.vlgmr.msra.gmra.mrb[56].mxu0 %v2207_v48  ;;  %2282 = vmatmul.mubr.bf16.vlgmr.msra.gmra.mrb[56].mxu1 %v2207_v48 }
 0x747   :  { %2344 = vmatpush1.bf16.msra.mxu0 %v3673_v4  ;;  %2385 = vmatpush1.bf16.msra.mxu1 %v3676_v59 }
 0x748   :  { %2345 = vmatprep.subr.bf16.mxu0 %v3679_v6  ;;  %2386 = vmatprep.subr.bf16.mxu1 %v3682_v13 }
 0x749   :  { %2375 = vmatprep.mubr.bf16.mxu0 %v2826_v0  ;;  %2416 = vmatprep.mubr.bf16.mxu1 %v2826_v0 }
 0x74b   :  { %2346 = vmatpush1.bf16.msra.mxu0 %v3687_v14  ;;  %2387 = vmatpush1.bf16.msra.mxu1 %v3690_v15 }
 0x74c   :  { %2347 = vmatprep.subr.bf16.mxu0 %v3693_v16  ;;  %2388 = vmatprep.subr.bf16.mxu1 %v3696_v17  ;;  %v2205_v17 = vld [vmem:[#allocation2 + $0x18] sm:$0xff]  }
 0x74d   :  { %v2341_v37 = vunpack.c.h.bf16 %v2205_v17 }
 0x74f   :  { %2348 = vmatpush1.bf16.msra.mxu0 %v3749_v62  ;;  %2389 = vmatpush1.bf16.msra.mxu1 %v3752_v45 }
 0x750   :  { %2349 = vmatprep.subr.bf16.mxu0 %v3755_v46  ;;  %2390 = vmatprep.subr.bf16.mxu1 %v3758_v47  ;;  %v2206_v47 = vunpack.c.l.bf16 %v2205_v17 }
 0x753   :  { %2350 = vmatpush1.bf16.msra.mxu0 %v3761_v53  ;;  %2391 = vmatpush1.bf16.msra.mxu1 %v3764_v5 }
 0x754   :  { %2351 = vmatprep.subr.bf16.mxu0 %v3767_v42  ;;  %2392 = vmatprep.subr.bf16.mxu1 %v3770_v55 }
 0x757   :  { %2352 = vmatpush1.bf16.msra.mxu0 %v3773_v54  ;;  %2393 = vmatpush1.bf16.msra.mxu1 %v3776_v58 }
 0x758   :  { %2353 = vmatprep.subr.bf16.mxu0 %v3779_v60  ;;  %2394 = vmatprep.subr.bf16.mxu1 %v3782_v61 }
 0x75b   :  { %2354 = vmatpush1.bf16.msra.mxu0 %v3785_v2  ;;  %2395 = vmatpush1.bf16.msra.mxu1 %v3788_v3 }
 0x75c   :  { %2355 = vmatprep.subr.bf16.mxu0 %v3791_v23  ;;  %2396 = vmatprep.subr.bf16.mxu1 %v3794_v24 }
 0x75f   :  { %2356 = vmatpush1.bf16.msra.mxu0 %v3797_v25  ;;  %2397 = vmatpush1.bf16.msra.mxu1 %v3800_v26 }
 0x760   :  { %2357 = vmatprep.subr.bf16.mxu0 %v3803_v27  ;;  %2398 = vmatprep.subr.bf16.mxu1 %v3806_v28 }
 0x763   :  { %2358 = vmatpush1.bf16.msra.mxu0 %v3809_v29  ;;  %2399 = vmatpush1.bf16.msra.mxu1 %v3812_v30 }
 0x819   :  { %v2242_v0 = vpop.f32.mrb[56].mxu0  ;;  %v2283_v4 = vpop.f32.mrb[56].mxu1 }
 0x81a   :  { %v2244_v59 = vpop.f32.mrb[57].mxu0  ;;  %v2285_v6 = vpop.f32.mrb[57].mxu1 }
 0x81b   :  { %v2294_v13 = vcombine.low %v2242_v0, %v2244_v59  ;;  %v2295_v14 = vcombine.low %v2283_v4, %v2285_v6  ;;  %v2246_v15 = vpop.f32.mrb[58].mxu0  ;;  %v2287_v16 = vpop.f32.mrb[58].mxu1 }
 0x81c   :  { %v2247_v10 = vpop.f32.mrb[59].mxu0  ;;  %v2288_v62 = vpop.f32.mrb[59].mxu1 }
 0x81d   :  { %v2302_v45 = vrot.slane %v2294_v13, %v3526_v52  ;;  %v2309_v46 = vrot.slane %v2295_v14, %v3526_v52 }
 0x81f   :  { %v2310_v53 = vcombine.low %v2302_v45, %v2309_v46 }
 0x821   :  { %v2312_v5 = vadd.f32 %v2310_v53, %v2206_v47 }
 0x823   :  { %v2313_v42 = vmul.f32 0.5, %v2312_v5  ;;  %v2318_v55 = vrot.slane %v2312_v5, 2  ;;  %v2324_v58 = vrot.slane %v2312_v5, 4  ;;  %v2327_v60 = vrot.slane %v2312_v5, 6 }
 0x825   :  { %2747 = vtanh.f32 %v2313_v42  ;;  %v2320_v54 = vmul.f32 0.5, %v2318_v55  ;;  %v2329_v61 = vmul.f32 0.5, %v2327_v60 }
 0x827   :  { %2749 = vtanh.f32 %v2320_v54 }
 0x828   :  { %2751 = vtanh.f32 %v2324_v58 }
 0x829   :  { %2753 = vtanh.f32 %v2329_v61 }
 0x82f   :  { %v2748_v2 = vpop.eup %2747 }
 0x830   :  { %v2315_v3 = vadd.f32 1.0, %v2748_v2 }
 0x831   :  { %v2750_v23 = vpop.eup %2749 }
 0x832   :  { %v2316_v24 = vmul.f32 0.5, %v2315_v3  ;;  %v2322_v25 = vadd.f32 1.0, %v2750_v23  ;;  %v2752_v27 = vpop.eup %2751 }
 0x833   :  { %v2754_v49 = vpop.eup %2753 }
 0x834   :  { %v2323_v26 = vmul.f32 0.5, %v2322_v25  ;;  %v2334_v29 = vmul.f32 %v2752_v27, %v2316_v24  ;;  %v2331_v56 = vadd.f32 1.0, %v2754_v49 }
 0x836   :  { %v2333_v28 = vmul.f32 %v2323_v26, %v3821_v41  ;;  %v2332_v57 = vmul.f32 0.5, %v2331_v56 }
 0x838   :  { %v2335_v30 = vadd.f32 %v2334_v29, %v2333_v28 }
 0x83a   :  { %2755 = vtanh.f32 %v2335_v30 }
 0x844   :  { %v2756_v63 = vpop.eup %2755 }
 0x845   :  { %v2337_v1 = vmul.f32 %v2756_v63, %v2332_v57 }
 0x847   :  { %2582 = vst [vmem:[%s3874_s4 + $0xc] sm:$0x3] %v2337_v1  ;;  %v2342_v18 = vpack.c.bf16 %v2337_v1, %v2337_v1 }
 0x849   :  { %2376 = vmatmul.mubr.bf16.vlgmr.msra.gmra.mrb[60].mxu0 %v2342_v18  ;;  %2417 = vmatmul.mubr.bf16.vlgmr.msra.gmra.mrb[60].mxu1 %v2342_v18 }
 0x91c   :  { %v2377_v19 = vpop.f32.mrb[60].mxu0  ;;  %v2418_v20 = vpop.f32.mrb[60].mxu1 }
 0x91d   :  { %v2379_v21 = vpop.f32.mrb[61].mxu0  ;;  %v2420_v44 = vpop.f32.mrb[61].mxu1 }
 0x91e   :  { %v2429_v22 = vcombine.low %v2377_v19, %v2379_v21  ;;  %v2430_v50 = vcombine.low %v2418_v20, %v2420_v44  ;;  %v2381_v51 = vpop.f32.mrb[62].mxu0  ;;  %v2422_v7 = vpop.f32.mrb[62].mxu1 }
 0x91f   :  { %v2382_v8 = vpop.f32.mrb[63].mxu0  ;;  %v2423_v11 = vpop.f32.mrb[63].mxu1 }
 0x920   :  { %v2437_v9 = vrot.slane %v2429_v22, %v3526_v52  ;;  %v2444_v12 = vrot.slane %v2430_v50, %v3526_v52 }
 0x922   :  { %v2445_v38 = vcombine.low %v2437_v9, %v2444_v12 }
 0x924   :  { %v2447_v39 = vadd.f32 %v2445_v38, %v2341_v37 }
 0x926   :  { %v2448_v40 = vmul.f32 0.5, %v2447_v39  ;;  %v2453_v31 = vrot.slane %v2447_v39, 2  ;;  %v2459_v41 = vrot.slane %v2447_v39, 4  ;;  %v2462_v32 = vrot.slane %v2447_v39, 6 }
 0x928   :  { %2757 = vtanh.f32 %v2448_v40  ;;  %v2455_v43 = vmul.f32 0.5, %v2453_v31  ;;  %v2464_v33 = vmul.f32 0.5, %v2462_v32 }
 0x92a   :  { %2759 = vtanh.f32 %v2455_v43 }
 0x92b   :  { %2761 = vtanh.f32 %v2459_v41 }
 0x92c   :  { %2763 = vtanh.f32 %v2464_v33 }
 0x932   :  { %v2758_v34 = vpop.eup %2757 }
 0x933   :  { %v2450_v35 = vadd.f32 1.0, %v2758_v34 }
 0x934   :  { %v2760_v36 = vpop.eup %2759 }
 0x935   :  { %v2451_v48 = vmul.f32 0.5, %v2450_v35  ;;  %v2457_v0 = vadd.f32 1.0, %v2760_v36  ;;  %v2762_v52 = vpop.eup %2761 }
 0x936   :  { %v2764_v14 = vpop.eup %2763 }
 0x937   :  { %v2458_v4 = vmul.f32 0.5, %v2457_v0  ;;  %v2469_v6 = vmul.f32 %v2762_v52, %v2451_v48  ;;  %v2466_v15 = vadd.f32 1.0, %v2764_v14 }
 0x939   :  { %v2468_v59 = vmul.f32 %v2458_v4, %v2335_v30  ;;  %v2467_v16 = vmul.f32 0.5, %v2466_v15 }
 0x93b   :  { %v2470_v13 = vadd.f32 %v2469_v6, %v2468_v59 }
 0x93d   :  { %2765 = vtanh.f32 %v2470_v13  ;;  %2476 = vst [vmem:[#allocation4] sm:$0x3] %v2470_v13 }
 0x947   :  { %v2766_v17 = vpop.eup %2765 }
 0x948   :  { %v2472_v10 = vmul.f32 %v2766_v17, %v2467_v16 }
 0x94a   :  { %2583 = vst [vmem:[%s3874_s4 + $0xe] sm:$0x3] %v2472_v10  ;;  %2475 = vst [vmem:[#allocation3] sm:$0x3] %v2472_v10 }
 0x94b   :  { %2481 = vsyncpa [#allocation6], 1 }

// kernel: encoder_forward.2
= control target key start
LH: loop header
LB: loop body
LE: loop exit
PB: predicated region body
PF: predicated region fallthrough
CT: control target
= control target key end

     0   :  { %9 = vsyncpa [#allocation6], 0  ;;  %s3398_s0 = inlined_call_operand.vmem [shape: bf16[8,2,16], index: 0, kind: input, shape index: {}]   ;;  %s3399_s1 = inlined_call_operand.hbm [shape: bf16[16,512], index: 1, kind: input, shape index: {}]   ;;  %s3400_s2 = inlined_call_operand.hbm [shape: bf16[128,512], index: 2, kind: input, shape index: {}]   ;;  %s3401_s3 = inlined_call_operand.hbm [shape: f32[1,512], index: 3, kind: input, shape index: {}]   ;;  %s3402_s4 = inlined_call_operand.vmem [shape: bf16[8,2,128], index: 4, kind: output, shape index: {}]  }
   0x1   :  { %10 = vsyncpa [#allocation8], 0  ;;  %s2701_s15 = smov [#allocation7]   ;;  %s2702_s17 = smov [#allocation5]  }
   0x2   :  { %s30_s16 = sshll.u32 %s2701_s15, 4  ;;  %s18_s18 = sshll.u32 %s2702_s17, 4  ;;  %s31_s16 = int_to_ptr.vmem [resolvable:$true] %s30_s16  ;;  %s2735_s18 = int_to_ptr.vmem [resolvable:$true] %s18_s18 }
   0x3   :  { %s2631_s21 = scalar_lea.hbm %s3400_s2, 4096 }
   0x4   :  { %p2632_p0 = scmp.ne.s32.totalorder %s3400_s2, %s2631_s21  ;;  %p2635_p1 = scmp.lt.u32.totalorder %s2631_s21, %s3400_s2 }
   0x6   :  { %p2637_p2 = pnand %p2635_p1, %p2632_p0 }
   0x8   :  { %2640 = shalt.err (!%p2637_p2)
}
   0x9   :  { %s2641_s26 = scalar_lea.vmem %s31_s16, 4096  ;;  %p2646_p4 = scmp.lt.s32.totalorder %s31_s16, %s31_s16 }
   0xa   :  { %p2642_p3 = scmp.ne.s32.totalorder %s31_s16, %s2641_s26  ;;  %p2647_p5 = scmp.lt.s32.totalorder %s2641_s26, %s2641_s26 }
   0xc   :  { %p2648_p6 = por %p2647_p5, %p2646_p4 }
   0xe   :  { %p2649_p7 = pnand %p2648_p6, %p2642_p3 }
  0x10   :  { %2652 = shalt.err (!%p2649_p7)
}
  0x11   :  { %s2703_s27 = smov 256   ;;  %s2704_s28 = smov 16  }
  0x12   :  { %36 = dma.hbm_to_vmem [thread:$0]  %s3400_s2, 4096, %s31_s16, [#allocation8], %s2703_s27, %s2703_s27, %s2704_s28  }
  0x13   :  { %s2653_s7 = scalar_lea.hbm %s3399_s1, 512 }
  0x14   :  { %p2654_p8 = scmp.ne.s32.totalorder %s3399_s1, %s2653_s7  ;;  %p2657_p9 = scmp.lt.u32.totalorder %s2653_s7, %s3399_s1 }
  0x16   :  { %p2659_p10 = pnand %p2657_p9, %p2654_p8 }
  0x18   :  { %2662 = shalt.err (!%p2659_p10)
}
  0x19   :  { %s2663_s12 = scalar_lea.vmem %s2735_s18, 512  ;;  %p2668_p12 = scmp.lt.s32.totalorder %s2735_s18, %s2735_s18 }
  0x1a   :  { %p2664_p11 = scmp.ne.s32.totalorder %s2735_s18, %s2663_s12  ;;  %p2669_p13 = scmp.lt.s32.totalorder %s2663_s12, %s2663_s12 }
  0x1c   :  { %p2670_p0 = por %p2669_p13, %p2668_p12 }
  0x1e   :  { %p2671_p1 = pnand %p2670_p0, %p2664_p11 }
  0x20   :  { %2674 = shalt.err (!%p2671_p1)
}
  0x21   :  { %24 = dma.hbm_to_vmem [thread:$0]  %s3399_s1, 512, %s2735_s18, [#allocation6], %s2703_s27, %s2703_s27, %s2704_s28  }
  0x22   :  { %s2705_s14 = smov [#allocation9]   ;;  %s2675_s19 = scalar_lea.hbm %s3401_s3, 64 }
  0x23   :  { %s43_s15 = sshll.u32 %s2705_s14, 4  ;;  %p2676_p2 = scmp.ne.s32.totalorder %s3401_s3, %s2675_s19  ;;  %s44_s15 = int_to_ptr.vmem [resolvable:$true] %s43_s15 }
  0x24   :  { %p2679_p3 = scmp.lt.u32.totalorder %s2675_s19, %s3401_s3 }
  0x26   :  { %p2681_p4 = pnand %p2679_p3, %p2676_p2 }
  0x28   :  { %2684 = shalt.err (!%p2681_p4)
}
  0x29   :  { %s2685_s24 = scalar_lea.vmem %s44_s15, 64  ;;  %p2690_p6 = scmp.lt.s32.totalorder %s44_s15, %s44_s15 }
  0x2a   :  { %p2686_p5 = scmp.ne.s32.totalorder %s44_s15, %s2685_s24  ;;  %p2691_p7 = scmp.lt.s32.totalorder %s2685_s24, %s2685_s24 }
  0x2c   :  { %p2692_p8 = por %p2691_p7, %p2690_p6 }
  0x2e   :  { %p2693_p9 = pnand %p2692_p8, %p2686_p5 }
  0x30   :  { %2696 = shalt.err (!%p2693_p9)
}
  0x31   :  { %46 = dma.hbm_to_vmem [thread:$0]  %s3401_s3, 64, %s44_s15, [#allocation8]  }
  0x32   :  { %2697 = dma.done.wait [#allocation6], 512  }
  0x33   :  { %2698 = vsyncadd [#allocation6], 4294966784 }
  0x34   :  { %2699 = dma.done.wait [#allocation8], 4160  }
  0x35   :  { %2700 = vsyncadd [#allocation8], 4294963136  ;;  %v2706_v0 = vmov 0   ;;  %v2707_v1 = vmov 0.0   ;;  %v2465_v2 = vld [vmem:[#allocation5 + $0x4] ss:$16 sps:$4 sm:$0xff]   ;;  %v69_v48 = vlaneseq }
  0x36   :  { %146 = vmatprep.mubr.bf16.mxu0 %v2706_v0  ;;  %187 = vmatprep.mubr.bf16.mxu1 %v2706_v0  ;;  %61 = vst [vmem:[#allocation3] sm:$0x3] %v2707_v1  ;;  %62 = vst [vmem:[#allocation4] sm:$0x3] %v2707_v1  ;;  %v2467_v3 = vld [vmem:[#allocation5 + $0xc] ss:$16 sps:$4 sm:$0xff]  }
  0x37   :  { %114 = vmatprep.subr.bf16.mxu0 %v2465_v2  ;;  %v2780_v4 = vld [vmem:[#allocation5] ss:$16 sps:$4 sm:$0xff]   ;;  %v2782_v5 = vld [vmem:[#allocation5 + $0x8] ss:$16 sps:$4 sm:$0xff]   ;;  %155 = vmatprep.subr.bf16.mxu1 %v2467_v3  ;;  %v89_v6 = vld [vmem:[%s3398_s0] sm:$0x1] }
  0x38   :  { %115 = vmatpush1.bf16.msra.mxu0 %v2780_v4  ;;  %156 = vmatpush1.bf16.msra.mxu1 %v2782_v5  ;;  %vm110_vm0 = vcmask 130048   ;;  %v2375_v7 = vld [vmem:[%s3398_s0 + $0x1] sm:$0x1]  ;;  %v2381_v8 = vld [vmem:[%s3398_s0 + $0x2] sm:$0x1]  ;;  %v2988_v49 = vshrl.u32 %v69_v48, 7 }
  0x39   :  { %235 = vmatprep.subr.bf16.mxu0 %v2465_v2  ;;  %276 = vmatprep.subr.bf16.mxu1 %v2467_v3  ;;  %v2387_v9 = vld [vmem:[%s3398_s0 + $0x3] sm:$0x1]  ;;  %v2393_v10 = vld [vmem:[%s3398_s0 + $0x4] sm:$0x1]  ;;  %v2399_v11 = vld [vmem:[%s3398_s0 + $0x5] sm:$0x1] }
  0x3a   :  { %v2405_v12 = vld [vmem:[%s3398_s0 + $0x6] sm:$0x1]  ;;  %v2843_v13 = vld [vmem:[#allocation7 + $0x4] ss:$16 sps:$4 sm:$0xff]   ;;  %v2845_v14 = vld [vmem:[#allocation7 + $0xc] ss:$16 sps:$4 sm:$0xff]  }
  0x3b   :  { %2370 = vmatmul.mubr.msk.bf16.vlgmr.msra.gmra.mrb[0].mxu0 %vm110_vm0, %v89_v6  ;;  %2371 = vmatmul.mubr.msk.bf16.vlgmr.msra.gmra.mrb[0].mxu1 %vm110_vm0, %v89_v6  ;;  %v2411_v15 = vld [vmem:[%s3398_s0 + $0x7] sm:$0x1]  ;;  %v2860_v17 = vld [vmem:[#allocation7 + $0x8] ss:$16 sps:$4 sm:$0xff]   ;;  %v2862_v18 = vld [vmem:[#allocation7 + $0x24] ss:$16 sps:$4 sm:$0xff]  }
  0x3c   :  { %236 = vmatpush1.bf16.msra.mxu0 %v2780_v4  ;;  %277 = vmatpush1.bf16.msra.mxu1 %v2782_v5  ;;  %v2858_v16 = vld [vmem:[#allocation7] ss:$16 sps:$4 sm:$0xff]   ;;  %v2864_v19 = vld [vmem:[#allocation7 + $0x2c] ss:$16 sps:$4 sm:$0xff]   ;;  %v2872_v21 = vld [vmem:[#allocation7 + $0x28] ss:$16 sps:$4 sm:$0xff]  }
  0x3d   :  { %267 = vmatprep.mubr.bf16.mxu0 %v2706_v0  ;;  %308 = vmatprep.mubr.bf16.mxu1 %v2706_v0  ;;  %v2870_v20 = vld [vmem:[#allocation7 + $0x20] ss:$16 sps:$4 sm:$0xff]   ;;  %v2876_v22 = vld [vmem:[#allocation7 + $0x44] ss:$16 sps:$4 sm:$0xff]   ;;  %v2878_v23 = vld [vmem:[#allocation7 + $0x4c] ss:$16 sps:$4 sm:$0xff]  }
  0x3e   :  { %357 = vmatprep.subr.bf16.mxu0 %v2465_v2  ;;  %398 = vmatprep.subr.bf16.mxu1 %v2467_v3  ;;  %v2884_v24 = vld [vmem:[#allocation7 + $0x40] ss:$16 sps:$4 sm:$0xff]   ;;  %v2886_v25 = vld [vmem:[#allocation7 + $0x48] ss:$16 sps:$4 sm:$0xff]   ;;  %v2890_v26 = vld [vmem:[#allocation7 + $0x64] ss:$16 sps:$4 sm:$0xff]  }
  0x3f   :  { %v2892_v27 = vld [vmem:[#allocation7 + $0x6c] ss:$16 sps:$4 sm:$0xff]   ;;  %v2896_v28 = vld [vmem:[#allocation7 + $0x60] ss:$16 sps:$4 sm:$0xff]   ;;  %v2898_v29 = vld [vmem:[#allocation7 + $0x68] ss:$16 sps:$4 sm:$0xff]  }
  0x40   :  { %v2902_v30 = vld [vmem:[#allocation7 + $0x84] ss:$16 sps:$4 sm:$0xff]   ;;  %v2904_v31 = vld [vmem:[#allocation7 + $0x8c] ss:$16 sps:$4 sm:$0xff]   ;;  %v2908_v32 = vld [vmem:[#allocation7 + $0x80] ss:$16 sps:$4 sm:$0xff]  }
  0x41   :  { %v2910_v33 = vld [vmem:[#allocation7 + $0x88] ss:$16 sps:$4 sm:$0xff]   ;;  %v2914_v34 = vld [vmem:[#allocation7 + $0xa4] ss:$16 sps:$4 sm:$0xff]   ;;  %v2916_v35 = vld [vmem:[#allocation7 + $0xac] ss:$16 sps:$4 sm:$0xff]  }
  0x42   :  { %v2920_v36 = vld [vmem:[#allocation7 + $0xa0] ss:$16 sps:$4 sm:$0xff]   ;;  %v2922_v37 = vld [vmem:[#allocation7 + $0xa8] ss:$16 sps:$4 sm:$0xff]   ;;  %v2926_v38 = vld [vmem:[#allocation7 + $0xc4] ss:$16 sps:$4 sm:$0xff]  }
  0x43   :  { %2376 = vmatmul.mubr.msk.bf16.vlgmr.msra.gmra.mrb[4].mxu0 %vm110_vm0, %v2375_v7  ;;  %2377 = vmatmul.mubr.msk.bf16.vlgmr.msra.gmra.mrb[4].mxu1 %vm110_vm0, %v2375_v7  ;;  %v2928_v39 = vld [vmem:[#allocation7 + $0xcc] ss:$16 sps:$4 sm:$0xff]   ;;  %v2932_v40 = vld [vmem:[#allocation7 + $0xc0] ss:$16 sps:$4 sm:$0xff]   ;;  %v2934_v41 = vld [vmem:[#allocation7 + $0xc8] ss:$16 sps:$4 sm:$0xff]  }
  0x44   :  { %358 = vmatpush1.bf16.msra.mxu0 %v2780_v4  ;;  %399 = vmatpush1.bf16.msra.mxu1 %v2782_v5  ;;  %v2938_v42 = vld [vmem:[#allocation7 + $0xe4] ss:$16 sps:$4 sm:$0xff]   ;;  %v2940_v43 = vld [vmem:[#allocation7 + $0xec] ss:$16 sps:$4 sm:$0xff]   ;;  %v2944_v44 = vld [vmem:[#allocation7 + $0xe0] ss:$16 sps:$4 sm:$0xff]  }
  0x45   :  { %389 = vmatprep.mubr.bf16.mxu0 %v2706_v0  ;;  %430 = vmatprep.mubr.bf16.mxu1 %v2706_v0  ;;  %v2946_v45 = vld [vmem:[#allocation7 + $0xe8] ss:$16 sps:$4 sm:$0xff]   ;;  %v1116_v46 = vld [vmem:[#allocation3] sm:$0x3]  ;;  %v71_v50 = vsub.s32 0, %v2988_v49  ;;  %v79_v51 = vsub.s32 2, %v2988_v49 }
  0x46   :  { %479 = vmatprep.subr.bf16.mxu0 %v2465_v2  ;;  %520 = vmatprep.subr.bf16.mxu1 %v2467_v3  ;;  %v1120_v47 = vpack.c.bf16 %v1116_v46, %v1116_v46  ;;  %v67_v52 = vld [vmem:[#allocation9] sm:$0xf]  ;;  %v75_v53 = vsub.s32 1, %v2988_v49  ;;  %v2708_v54 = vmov 1966171168   ;;  %v83_v56 = vsub.s32 3, %v2988_v49 }
  0x47   :  { %v207_v55 = vunpack.c.l.s4 %v2708_v54  ;;  %v2994_v57 = vrot.slane %v67_v52, %v71_v50  ;;  %v2996_v58 = vrot.slane %v67_v52, %v79_v51 }
  0x48   :  { %v2998_v59 = vrot.slane %v67_v52, %v75_v53  ;;  %v3000_v61 = vrot.slane %v67_v52, %v83_v56 }
  0x49   :  { %v208_v60 = vunpack.c.0.s8 %v207_v55 }
  0x4b   :  { %2382 = vmatmul.mubr.msk.bf16.vlgmr.msra.gmra.mrb[8].mxu0 %vm110_vm0, %v2381_v8  ;;  %2383 = vmatmul.mubr.msk.bf16.vlgmr.msra.gmra.mrb[8].mxu1 %vm110_vm0, %v2381_v8  ;;  %v3006_v6 = vsub.s32 %v208_v60, %v2988_v49 }
  0x4c   :  { %480 = vmatpush1.bf16.msra.mxu0 %v2780_v4  ;;  %521 = vmatpush1.bf16.msra.mxu1 %v2782_v5 }
  0x4d   :  { %511 = vmatprep.mubr.bf16.mxu0 %v2706_v0  ;;  %552 = vmatprep.mubr.bf16.mxu1 %v2706_v0 }
  0x4e   :  { %601 = vmatprep.subr.bf16.mxu0 %v2465_v2  ;;  %642 = vmatprep.subr.bf16.mxu1 %v2467_v3 }
  0x53   :  { %2388 = vmatmul.mubr.msk.bf16.vlgmr.msra.gmra.mrb[12].mxu0 %vm110_vm0, %v2387_v9  ;;  %2389 = vmatmul.mubr.msk.bf16.vlgmr.msra.gmra.mrb[12].mxu1 %vm110_vm0, %v2387_v9 }
  0x54   :  { %602 = vmatpush1.bf16.msra.mxu0 %v2780_v4  ;;  %643 = vmatpush1.bf16.msra.mxu1 %v2782_v5 }
  0x55   :  { %633 = vmatprep.mubr.bf16.mxu0 %v2706_v0  ;;  %674 = vmatprep.mubr.bf16.mxu1 %v2706_v0 }
  0x56   :  { %723 = vmatprep.subr.bf16.mxu0 %v2465_v2  ;;  %764 = vmatprep.subr.bf16.mxu1 %v2467_v3 }
  0x5b   :  { %2394 = vmatmul.mubr.msk.bf16.vlgmr.msra.gmra.mrb[16].mxu0 %vm110_vm0, %v2393_v10  ;;  %2395 = vmatmul.mubr.msk.bf16.vlgmr.msra.gmra.mrb[16].mxu1 %vm110_vm0, %v2393_v10 }
  0x5c   :  { %724 = vmatpush1.bf16.msra.mxu0 %v2780_v4  ;;  %765 = vmatpush1.bf16.msra.mxu1 %v2782_v5 }
  0x5d   :  { %755 = vmatprep.mubr.bf16.mxu0 %v2706_v0  ;;  %796 = vmatprep.mubr.bf16.mxu1 %v2706_v0 }
  0x5e   :  { %845 = vmatprep.subr.bf16.mxu0 %v2465_v2  ;;  %886 = vmatprep.subr.bf16.mxu1 %v2467_v3 }
  0x63   :  { %2400 = vmatmul.mubr.msk.bf16.vlgmr.msra.gmra.mrb[20].mxu0 %vm110_vm0, %v2399_v11  ;;  %2401 = vmatmul.mubr.msk.bf16.vlgmr.msra.gmra.mrb[20].mxu1 %vm110_vm0, %v2399_v11 }
  0x64   :  { %846 = vmatpush1.bf16.msra.mxu0 %v2780_v4  ;;  %887 = vmatpush1.bf16.msra.mxu1 %v2782_v5 }
  0x65   :  { %877 = vmatprep.mubr.bf16.mxu0 %v2706_v0  ;;  %918 = vmatprep.mubr.bf16.mxu1 %v2706_v0 }
  0x66   :  { %967 = vmatprep.subr.bf16.mxu0 %v2465_v2  ;;  %1008 = vmatprep.subr.bf16.mxu1 %v2467_v3 }
  0x6b   :  { %2406 = vmatmul.mubr.msk.bf16.vlgmr.msra.gmra.mrb[24].mxu0 %vm110_vm0, %v2405_v12  ;;  %2407 = vmatmul.mubr.msk.bf16.vlgmr.msra.gmra.mrb[24].mxu1 %vm110_vm0, %v2405_v12 }
  0x6c   :  { %968 = vmatpush1.bf16.msra.mxu0 %v2780_v4  ;;  %1009 = vmatpush1.bf16.msra.mxu1 %v2782_v5 }
  0x6d   :  { %999 = vmatprep.mubr.bf16.mxu0 %v2706_v0  ;;  %1040 = vmatprep.mubr.bf16.mxu1 %v2706_v0 }
  0x6e   :  { %1281 = vmatprep.subr.bf16.mxu0 %v2843_v13  ;;  %1322 = vmatprep.subr.bf16.mxu1 %v2845_v14 }
  0x73   :  { %2412 = vmatmul.mubr.msk.bf16.vlgmr.msra.gmra.mrb[28].mxu0 %vm110_vm0, %v2411_v15  ;;  %2413 = vmatmul.mubr.msk.bf16.vlgmr.msra.gmra.mrb[28].mxu1 %vm110_vm0, %v2411_v15 }
  0x74   :  { %1282 = vmatpush1.bf16.msra.mxu0 %v2858_v16  ;;  %1323 = vmatpush1.bf16.msra.mxu1 %v2860_v17 }
  0x75   :  { %1283 = vmatprep.subr.bf16.mxu0 %v2862_v18  ;;  %1324 = vmatprep.subr.bf16.mxu1 %v2864_v19 }
  0x76   :  { %1313 = vmatprep.mubr.bf16.mxu0 %v2706_v0  ;;  %1354 = vmatprep.mubr.bf16.mxu1 %v2706_v0 }
  0x78   :  { %1284 = vmatpush1.bf16.msra.mxu0 %v2870_v20  ;;  %1325 = vmatpush1.bf16.msra.mxu1 %v2872_v21 }
  0x79   :  { %1285 = vmatprep.subr.bf16.mxu0 %v2876_v22  ;;  %1326 = vmatprep.subr.bf16.mxu1 %v2878_v23 }
  0x7c   :  { %1286 = vmatpush1.bf16.msra.mxu0 %v2884_v24  ;;  %1327 = vmatpush1.bf16.msra.mxu1 %v2886_v25 }
  0x7d   :  { %1287 = vmatprep.subr.bf16.mxu0 %v2890_v26  ;;  %1328 = vmatprep.subr.bf16.mxu1 %v2892_v27 }
  0x80   :  { %1288 = vmatpush1.bf16.msra.mxu0 %v2896_v28  ;;  %1329 = vmatpush1.bf16.msra.mxu1 %v2898_v29 }
  0x81   :  { %1289 = vmatprep.subr.bf16.mxu0 %v2902_v30  ;;  %1330 = vmatprep.subr.bf16.mxu1 %v2904_v31 }
  0x84   :  { %1290 = vmatpush1.bf16.msra.mxu0 %v2908_v32  ;;  %1331 = vmatpush1.bf16.msra.mxu1 %v2910_v33 }
  0x85   :  { %1291 = vmatprep.subr.bf16.mxu0 %v2914_v34  ;;  %1332 = vmatprep.subr.bf16.mxu1 %v2916_v35 }
  0x88   :  { %1292 = vmatpush1.bf16.msra.mxu0 %v2920_v36  ;;  %1333 = vmatpush1.bf16.msra.mxu1 %v2922_v37 }
  0x89   :  { %1293 = vmatprep.subr.bf16.mxu0 %v2926_v38  ;;  %1334 = vmatprep.subr.bf16.mxu1 %v2928_v39 }
  0x8c   :  { %1294 = vmatpush1.bf16.msra.mxu0 %v2932_v40  ;;  %1335 = vmatpush1.bf16.msra.mxu1 %v2934_v41 }
  0x8d   :  { %1295 = vmatprep.subr.bf16.mxu0 %v2938_v42  ;;  %1336 = vmatprep.subr.bf16.mxu1 %v2940_v43 }
  0x90   :  { %1296 = vmatpush1.bf16.msra.mxu0 %v2944_v44  ;;  %1337 = vmatpush1.bf16.msra.mxu1 %v2946_v45 }
  0x91   :  { %1415 = vmatprep.subr.bf16.mxu0 %v2843_v13  ;;  %1456 = vmatprep.subr.bf16.mxu1 %v2845_v14 }
  0x93   :  { %1314 = vmatmul.mubr.bf16.vlgmr.msra.gmra.mrb[32].mxu0 %v1120_v47  ;;  %1355 = vmatmul.mubr.bf16.vlgmr.msra.gmra.mrb[32].mxu1 %v1120_v47 }
  0x94   :  { %1416 = vmatpush1.bf16.msra.mxu0 %v2858_v16  ;;  %1457 = vmatpush1.bf16.msra.mxu1 %v2860_v17 }
  0x95   :  { %1417 = vmatprep.subr.bf16.mxu0 %v2862_v18  ;;  %1458 = vmatprep.subr.bf16.mxu1 %v2864_v19 }
  0x96   :  { %1447 = vmatprep.mubr.bf16.mxu0 %v2706_v0  ;;  %1488 = vmatprep.mubr.bf16.mxu1 %v2706_v0 }
  0x98   :  { %1418 = vmatpush1.bf16.msra.mxu0 %v2870_v20  ;;  %1459 = vmatpush1.bf16.msra.mxu1 %v2872_v21 }
  0x99   :  { %1419 = vmatprep.subr.bf16.mxu0 %v2876_v22  ;;  %1460 = vmatprep.subr.bf16.mxu1 %v2878_v23 }
  0x9c   :  { %1420 = vmatpush1.bf16.msra.mxu0 %v2884_v24  ;;  %1461 = vmatpush1.bf16.msra.mxu1 %v2886_v25 }
  0x9d   :  { %1421 = vmatprep.subr.bf16.mxu0 %v2890_v26  ;;  %1462 = vmatprep.subr.bf16.mxu1 %v2892_v27 }
  0xa0   :  { %1422 = vmatpush1.bf16.msra.mxu0 %v2896_v28  ;;  %1463 = vmatpush1.bf16.msra.mxu1 %v2898_v29 }
  0xa1   :  { %1423 = vmatprep.subr.bf16.mxu0 %v2902_v30  ;;  %1464 = vmatprep.subr.bf16.mxu1 %v2904_v31 }
  0xa4   :  { %1424 = vmatpush1.bf16.msra.mxu0 %v2908_v32  ;;  %1465 = vmatpush1.bf16.msra.mxu1 %v2910_v33 }
  0xa5   :  { %1425 = vmatprep.subr.bf16.mxu0 %v2914_v34  ;;  %1466 = vmatprep.subr.bf16.mxu1 %v2916_v35 }
  0xa8   :  { %1426 = vmatpush1.bf16.msra.mxu0 %v2920_v36  ;;  %1467 = vmatpush1.bf16.msra.mxu1 %v2922_v37 }
  0xa9   :  { %1427 = vmatprep.subr.bf16.mxu0 %v2926_v38  ;;  %1468 = vmatprep.subr.bf16.mxu1 %v2928_v39 }
  0xac   :  { %1428 = vmatpush1.bf16.msra.mxu0 %v2932_v40  ;;  %1469 = vmatpush1.bf16.msra.mxu1 %v2934_v41 }
  0xad   :  { %1429 = vmatprep.subr.bf16.mxu0 %v2938_v42  ;;  %1470 = vmatprep.subr.bf16.mxu1 %v2940_v43 }
  0xb0   :  { %1430 = vmatpush1.bf16.msra.mxu0 %v2944_v44  ;;  %1471 = vmatpush1.bf16.msra.mxu1 %v2946_v45 }
  0xb1   :  { %1550 = vmatprep.subr.bf16.mxu0 %v2843_v13  ;;  %1591 = vmatprep.subr.bf16.mxu1 %v2845_v14 }
 0x10e   :  { %v148_v62 = vpop.f32.mrb[0].mxu0  ;;  %v189_v63 = vpop.f32.mrb[0].mxu1 }
 0x10f   :  { %v149_v1 = vadd.f32 %v148_v62, %v2994_v57  ;;  %v190_v2 = vadd.f32 %v189_v63, %v2996_v58  ;;  %v150_v3 = vpop.f32.mrb[1].mxu0  ;;  %v191_v4 = vpop.f32.mrb[1].mxu1 }
 0x110   :  { %v151_v5 = vadd.f32 %v150_v3, %v2998_v59  ;;  %v192_v7 = vadd.f32 %v191_v4, %v3000_v61  ;;  %v152_v8 = vpop.f32.mrb[2].mxu0  ;;  %v193_v9 = vpop.f32.mrb[2].mxu1 }
 0x111   :  { %v153_v10 = vpop.f32.mrb[3].mxu0  ;;  %v194_v11 = vpop.f32.mrb[3].mxu1 }
 0x112   :  { %v2372_v12 = vpack.c.bf16 %v151_v5, %v149_v1  ;;  %v2373_v15 = vpack.c.bf16 %v192_v7, %v190_v2 }
 0x114   :  { %v212_v46 = vrot.slane %v2372_v12, %v3006_v6  ;;  %v219_v47 = vrot.slane %v2373_v15, %v3006_v6 }
 0x116   :  { %v220_v48 = vcombine.low %v212_v46, %v219_v47  ;;  %v269_v50 = vpop.f32.mrb[4].mxu0  ;;  %v310_v51 = vpop.f32.mrb[4].mxu1 }
 0x117   :  { %v270_v52 = vadd.f32 %v269_v50, %v2994_v57  ;;  %v311_v53 = vadd.f32 %v310_v51, %v2996_v58  ;;  %v271_v54 = vpop.f32.mrb[5].mxu0  ;;  %v312_v55 = vpop.f32.mrb[5].mxu1 }
 0x118   :  { %2374 = vst.sshfl [vmem:[#allocation2] sm:$0x55 pattern:$0x73625140] %v220_v48  ;;  %v272_v56 = vadd.f32 %v271_v54, %v2998_v59  ;;  %v313_v60 = vadd.f32 %v312_v55, %v3000_v61  ;;  %v273_v62 = vpop.f32.mrb[6].mxu0  ;;  %v314_v63 = vpop.f32.mrb[6].mxu1 }
 0x119   :  { %v274_v1 = vpop.f32.mrb[7].mxu0  ;;  %v315_v2 = vpop.f32.mrb[7].mxu1 }
 0x11a   :  { %v2378_v3 = vpack.c.bf16 %v272_v56, %v270_v52  ;;  %v2379_v4 = vpack.c.bf16 %v313_v60, %v311_v53 }
 0x11c   :  { %v333_v5 = vrot.slane %v2378_v3, %v3006_v6  ;;  %v340_v7 = vrot.slane %v2379_v4, %v3006_v6 }
 0x11e   :  { %v341_v8 = vcombine.low %v333_v5, %v340_v7  ;;  %v391_v9 = vpop.f32.mrb[8].mxu0  ;;  %v432_v10 = vpop.f32.mrb[8].mxu1 }
 0x11f   :  { %v392_v11 = vadd.f32 %v391_v9, %v2994_v57  ;;  %v433_v12 = vadd.f32 %v432_v10, %v2996_v58  ;;  %v393_v15 = vpop.f32.mrb[9].mxu0  ;;  %v434_v46 = vpop.f32.mrb[9].mxu1 }
 0x120   :  { %2380 = vst.sshfl [vmem:[#allocation2 + $0x4] sm:$0x55 pattern:$0x73625140] %v341_v8  ;;  %v394_v47 = vadd.f32 %v393_v15, %v2998_v59  ;;  %v435_v48 = vadd.f32 %v434_v46, %v3000_v61  ;;  %v395_v50 = vpop.f32.mrb[10].mxu0  ;;  %v436_v51 = vpop.f32.mrb[10].mxu1 }
 0x121   :  { %v396_v52 = vpop.f32.mrb[11].mxu0  ;;  %v437_v53 = vpop.f32.mrb[11].mxu1 }
 0x122   :  { %v2384_v54 = vpack.c.bf16 %v394_v47, %v392_v11  ;;  %v2385_v55 = vpack.c.bf16 %v435_v48, %v433_v12 }
 0x124   :  { %v455_v56 = vrot.slane %v2384_v54, %v3006_v6  ;;  %v462_v60 = vrot.slane %v2385_v55, %v3006_v6 }
 0x126   :  { %v463_v62 = vcombine.low %v455_v56, %v462_v60  ;;  %v513_v63 = vpop.f32.mrb[12].mxu0  ;;  %v554_v1 = vpop.f32.mrb[12].mxu1 }
 0x127   :  { %v514_v2 = vadd.f32 %v513_v63, %v2994_v57  ;;  %v555_v3 = vadd.f32 %v554_v1, %v2996_v58  ;;  %v515_v4 = vpop.f32.mrb[13].mxu0  ;;  %v556_v5 = vpop.f32.mrb[13].mxu1 }
 0x128   :  { %2386 = vst.sshfl [vmem:[#allocation2 + $0x8] sm:$0x55 pattern:$0x73625140] %v463_v62  ;;  %v516_v7 = vadd.f32 %v515_v4, %v2998_v59  ;;  %v557_v8 = vadd.f32 %v556_v5, %v3000_v61  ;;  %v517_v9 = vpop.f32.mrb[14].mxu0  ;;  %v558_v10 = vpop.f32.mrb[14].mxu1 }
 0x129   :  { %v518_v11 = vpop.f32.mrb[15].mxu0  ;;  %v559_v12 = vpop.f32.mrb[15].mxu1 }
 0x12a   :  { %v2390_v15 = vpack.c.bf16 %v516_v7, %v514_v2  ;;  %v2391_v46 = vpack.c.bf16 %v557_v8, %v555_v3 }
 0x12c   :  { %v577_v47 = vrot.slane %v2390_v15, %v3006_v6  ;;  %v584_v48 = vrot.slane %v2391_v46, %v3006_v6 }
 0x12e   :  { %v585_v50 = vcombine.low %v577_v47, %v584_v48  ;;  %v635_v51 = vpop.f32.mrb[16].mxu0  ;;  %v676_v52 = vpop.f32.mrb[16].mxu1 }
 0x12f   :  { %v636_v53 = vadd.f32 %v635_v51, %v2994_v57  ;;  %v677_v54 = vadd.f32 %v676_v52, %v2996_v58  ;;  %v637_v55 = vpop.f32.mrb[17].mxu0  ;;  %v678_v56 = vpop.f32.mrb[17].mxu1 }
 0x130   :  { %2392 = vst.sshfl [vmem:[#allocation2 + $0xc] sm:$0x55 pattern:$0x73625140] %v585_v50  ;;  %v638_v60 = vadd.f32 %v637_v55, %v2998_v59  ;;  %v679_v62 = vadd.f32 %v678_v56, %v3000_v61  ;;  %v639_v63 = vpop.f32.mrb[18].mxu0  ;;  %v680_v1 = vpop.f32.mrb[18].mxu1 }
 0x131   :  { %v640_v2 = vpop.f32.mrb[19].mxu0  ;;  %v681_v3 = vpop.f32.mrb[19].mxu1 }
 0x132   :  { %v2396_v4 = vpack.c.bf16 %v638_v60, %v636_v53  ;;  %v2397_v5 = vpack.c.bf16 %v679_v62, %v677_v54 }
 0x134   :  { %v699_v7 = vrot.slane %v2396_v4, %v3006_v6  ;;  %v706_v8 = vrot.slane %v2397_v5, %v3006_v6 }
 0x136   :  { %v707_v9 = vcombine.low %v699_v7, %v706_v8  ;;  %v757_v10 = vpop.f32.mrb[20].mxu0  ;;  %v798_v11 = vpop.f32.mrb[20].mxu1 }
 0x137   :  { %v758_v12 = vadd.f32 %v757_v10, %v2994_v57  ;;  %v799_v15 = vadd.f32 %v798_v11, %v2996_v58  ;;  %v759_v46 = vpop.f32.mrb[21].mxu0  ;;  %v800_v47 = vpop.f32.mrb[21].mxu1 }
 0x138   :  { %2398 = vst.sshfl [vmem:[#allocation2 + $0x10] sm:$0x55 pattern:$0x73625140] %v707_v9  ;;  %v760_v48 = vadd.f32 %v759_v46, %v2998_v59  ;;  %v801_v50 = vadd.f32 %v800_v47, %v3000_v61  ;;  %v761_v51 = vpop.f32.mrb[22].mxu0  ;;  %v802_v52 = vpop.f32.mrb[22].mxu1 }
 0x139   :  { %v762_v53 = vpop.f32.mrb[23].mxu0  ;;  %v803_v54 = vpop.f32.mrb[23].mxu1 }
 0x13a   :  { %v2402_v55 = vpack.c.bf16 %v760_v48, %v758_v12  ;;  %v2403_v56 = vpack.c.bf16 %v801_v50, %v799_v15 }
 0x13c   :  { %v821_v60 = vrot.slane %v2402_v55, %v3006_v6  ;;  %v828_v62 = vrot.slane %v2403_v56, %v3006_v6 }
 0x13e   :  { %v829_v63 = vcombine.low %v821_v60, %v828_v62  ;;  %v879_v1 = vpop.f32.mrb[24].mxu0  ;;  %v920_v2 = vpop.f32.mrb[24].mxu1 }
 0x13f   :  { %v880_v3 = vadd.f32 %v879_v1, %v2994_v57  ;;  %v921_v4 = vadd.f32 %v920_v2, %v2996_v58  ;;  %v881_v5 = vpop.f32.mrb[25].mxu0  ;;  %v922_v7 = vpop.f32.mrb[25].mxu1 }
 0x140   :  { %2404 = vst.sshfl [vmem:[#allocation2 + $0x14] sm:$0x55 pattern:$0x73625140] %v829_v63  ;;  %v882_v8 = vadd.f32 %v881_v5, %v2998_v59  ;;  %v923_v9 = vadd.f32 %v922_v7, %v3000_v61  ;;  %v883_v10 = vpop.f32.mrb[26].mxu0  ;;  %v924_v11 = vpop.f32.mrb[26].mxu1 }
 0x141   :  { %v884_v12 = vpop.f32.mrb[27].mxu0  ;;  %v925_v15 = vpop.f32.mrb[27].mxu1 }
 0x142   :  { %v2408_v46 = vpack.c.bf16 %v882_v8, %v880_v3  ;;  %v2409_v47 = vpack.c.bf16 %v923_v9, %v921_v4 }
 0x144   :  { %v943_v48 = vrot.slane %v2408_v46, %v3006_v6  ;;  %v950_v50 = vrot.slane %v2409_v47, %v3006_v6 }
 0x146   :  { %v951_v51 = vcombine.low %v943_v48, %v950_v50  ;;  %v1001_v52 = vpop.f32.mrb[28].mxu0  ;;  %v1042_v53 = vpop.f32.mrb[28].mxu1 }
 0x147   :  { %v1002_v54 = vadd.f32 %v1001_v52, %v2994_v57  ;;  %v1043_v55 = vadd.f32 %v1042_v53, %v2996_v58  ;;  %v1003_v56 = vpop.f32.mrb[29].mxu0  ;;  %v1044_v60 = vpop.f32.mrb[29].mxu1  ;;  %v2709_v58 = vmov 1983009808   ;;  %v3056_v52 = vld [vmem:[#allocation2] sm:$0xff]  }
 0x148   :  { %2410 = vst.sshfl [vmem:[#allocation2 + $0x18] sm:$0x55 pattern:$0x73625140] %v951_v51  ;;  %v1004_v62 = vadd.f32 %v1003_v56, %v2998_v59  ;;  %v1045_v63 = vadd.f32 %v1044_v60, %v3000_v61  ;;  %v1005_v1 = vpop.f32.mrb[30].mxu0  ;;  %v1046_v2 = vpop.f32.mrb[30].mxu1  ;;  %v1370_v10 = vunpack.c.l.s4 %v2709_v58  ;;  %v1119_v56 = vunpack.c.l.bf16 %v3056_v52 }
 0x149   :  { %v1006_v3 = vpop.f32.mrb[31].mxu0  ;;  %v1047_v4 = vpop.f32.mrb[31].mxu1  ;;  %v1117_v58 = vld [vmem:[#allocation4] sm:$0x3] }
 0x14a   :  { %v2414_v5 = vpack.c.bf16 %v1004_v62, %v1002_v54  ;;  %v2415_v7 = vpack.c.bf16 %v1045_v63, %v1043_v55  ;;  %v1371_v11 = vunpack.c.0.s8 %v1370_v10 }
 0x14c   :  { %v1065_v8 = vrot.slane %v2414_v5, %v3006_v6  ;;  %v1072_v9 = vrot.slane %v2415_v7, %v3006_v6  ;;  %v3054_v59 = vsub.s32 %v1371_v11, %v2988_v49 }
 0x14e   :  { %v1073_v57 = vcombine.low %v1065_v8, %v1072_v9 }
 0x150   :  { %2416 = vst.sshfl [vmem:[#allocation2 + $0x1c] sm:$0x55 pattern:$0x73625140] %v1073_v57 }
 0x166   :  { %v1315_v12 = vpop.f32.mrb[32].mxu0  ;;  %v1356_v15 = vpop.f32.mrb[32].mxu1 }
 0x167   :  { %v1317_v61 = vpop.f32.mrb[33].mxu0  ;;  %v1358_v46 = vpop.f32.mrb[33].mxu1 }
 0x168   :  { %v1367_v47 = vcombine.low %v1315_v12, %v1317_v61  ;;  %v1368_v48 = vcombine.low %v1356_v15, %v1358_v46  ;;  %v1319_v50 = vpop.f32.mrb[34].mxu0  ;;  %v1360_v51 = vpop.f32.mrb[34].mxu1 }
 0x169   :  { %v1320_v53 = vpop.f32.mrb[35].mxu0  ;;  %v1361_v6 = vpop.f32.mrb[35].mxu1 }
 0x16a   :  { %v1375_v54 = vrot.slane %v1367_v47, %v3054_v59  ;;  %v1382_v55 = vrot.slane %v1368_v48, %v3054_v59 }
 0x16c   :  { %v1383_v60 = vcombine.low %v1375_v54, %v1382_v55 }
 0x16e   :  { %v1385_v62 = vadd.f32 %v1383_v60, %v1119_v56 }
 0x170   :  { %v1386_v49 = vmul.f32 0.5, %v1385_v62  ;;  %v1391_v63 = vrot.slane %v1385_v62, 2  ;;  %v1397_v2 = vrot.slane %v1385_v62, 4  ;;  %v1400_v3 = vrot.slane %v1385_v62, 6 }
 0x172   :  { %2519 = vtanh.f32 %v1386_v49  ;;  %v1393_v1 = vmul.f32 0.5, %v1391_v63  ;;  %v1402_v4 = vmul.f32 0.5, %v1400_v3 }
 0x174   :  { %2521 = vtanh.f32 %v1393_v1 }
 0x175   :  { %2523 = vtanh.f32 %v1397_v2 }
 0x176   :  { %2525 = vtanh.f32 %v1402_v4 }
 0x17c   :  { %v2520_v5 = vpop.eup %2519 }
 0x17d   :  { %v1388_v7 = vadd.f32 1.0, %v2520_v5  ;;  %v1414_v5 = vunpack.c.h.bf16 %v3056_v52 }
 0x17e   :  { %v2522_v8 = vpop.eup %2521 }
 0x17f   :  { %v1389_v9 = vmul.f32 0.5, %v1388_v7  ;;  %v1395_v57 = vadd.f32 1.0, %v2522_v8  ;;  %v2524_v11 = vpop.eup %2523 }
 0x180   :  { %v2526_v46 = vpop.eup %2525 }
 0x181   :  { %v1396_v10 = vmul.f32 0.5, %v1395_v57  ;;  %v1407_v15 = vmul.f32 %v2524_v11, %v1389_v9  ;;  %v1404_v47 = vadd.f32 1.0, %v2526_v46 }
 0x183   :  { %v1406_v12 = vmul.f32 %v1396_v10, %v1117_v58  ;;  %v1405_v48 = vmul.f32 0.5, %v1404_v47 }
 0x185   :  { %v3061_v61 = vadd.f32 %v1407_v15, %v1406_v12 }
 0x187   :  { %2527 = vtanh.f32 %v3061_v61 }
 0x191   :  { %v2528_v50 = vpop.eup %2527 }
 0x192   :  { %v1410_v51 = vmul.f32 %v2528_v50, %v1405_v48 }
 0x194   :  { %v1411_v53 = vpack.c.bf16 %v1410_v51, %v1410_v51 }
 0x196   :  { %1412 = vst [vmem:[%s3402_s4] sm:$0x1] %v1411_v53  ;;  %1448 = vmatmul.mubr.bf16.vlgmr.msra.gmra.mrb[36].mxu0 %v1411_v53  ;;  %1489 = vmatmul.mubr.bf16.vlgmr.msra.gmra.mrb[36].mxu1 %v1411_v53 }
 0x197   :  { %1551 = vmatpush1.bf16.msra.mxu0 %v2858_v16  ;;  %1592 = vmatpush1.bf16.msra.mxu1 %v2860_v17 }
 0x198   :  { %1552 = vmatprep.subr.bf16.mxu0 %v2862_v18  ;;  %1593 = vmatprep.subr.bf16.mxu1 %v2864_v19 }
 0x199   :  { %1582 = vmatprep.mubr.bf16.mxu0 %v2706_v0  ;;  %1623 = vmatprep.mubr.bf16.mxu1 %v2706_v0 }
 0x19b   :  { %1553 = vmatpush1.bf16.msra.mxu0 %v2870_v20  ;;  %1594 = vmatpush1.bf16.msra.mxu1 %v2872_v21 }
 0x19c   :  { %1554 = vmatprep.subr.bf16.mxu0 %v2876_v22  ;;  %1595 = vmatprep.subr.bf16.mxu1 %v2878_v23 }
 0x19f   :  { %1555 = vmatpush1.bf16.msra.mxu0 %v2884_v24  ;;  %1596 = vmatpush1.bf16.msra.mxu1 %v2886_v25 }
 0x1a0   :  { %1556 = vmatprep.subr.bf16.mxu0 %v2890_v26  ;;  %1597 = vmatprep.subr.bf16.mxu1 %v2892_v27 }
 0x1a3   :  { %1557 = vmatpush1.bf16.msra.mxu0 %v2896_v28  ;;  %1598 = vmatpush1.bf16.msra.mxu1 %v2898_v29 }
 0x1a4   :  { %1558 = vmatprep.subr.bf16.mxu0 %v2902_v30  ;;  %1599 = vmatprep.subr.bf16.mxu1 %v2904_v31 }
 0x1a7   :  { %1559 = vmatpush1.bf16.msra.mxu0 %v2908_v32  ;;  %1600 = vmatpush1.bf16.msra.mxu1 %v2910_v33 }
 0x1a8   :  { %1560 = vmatprep.subr.bf16.mxu0 %v2914_v34  ;;  %1601 = vmatprep.subr.bf16.mxu1 %v2916_v35 }
 0x1ab   :  { %1561 = vmatpush1.bf16.msra.mxu0 %v2920_v36  ;;  %1602 = vmatpush1.bf16.msra.mxu1 %v2922_v37 }
 0x1ac   :  { %1562 = vmatprep.subr.bf16.mxu0 %v2926_v38  ;;  %1603 = vmatprep.subr.bf16.mxu1 %v2928_v39 }
 0x1af   :  { %1563 = vmatpush1.bf16.msra.mxu0 %v2932_v40  ;;  %1604 = vmatpush1.bf16.msra.mxu1 %v2934_v41 }
 0x1b0   :  { %1564 = vmatprep.subr.bf16.mxu0 %v2938_v42  ;;  %1605 = vmatprep.subr.bf16.mxu1 %v2940_v43 }
 0x1b3   :  { %1565 = vmatpush1.bf16.msra.mxu0 %v2944_v44  ;;  %1606 = vmatpush1.bf16.msra.mxu1 %v2946_v45 }
 0x1b4   :  { %1685 = vmatprep.subr.bf16.mxu0 %v2843_v13  ;;  %1726 = vmatprep.subr.bf16.mxu1 %v2845_v14 }
 0x269   :  { %v1449_v6 = vpop.f32.mrb[36].mxu0  ;;  %v1490_v54 = vpop.f32.mrb[36].mxu1 }
 0x26a   :  { %v1451_v55 = vpop.f32.mrb[37].mxu0  ;;  %v1492_v56 = vpop.f32.mrb[37].mxu1 }
 0x26b   :  { %v1501_v60 = vcombine.low %v1449_v6, %v1451_v55  ;;  %v1502_v62 = vcombine.low %v1490_v54, %v1492_v56  ;;  %v1453_v49 = vpop.f32.mrb[38].mxu0  ;;  %v1494_v63 = vpop.f32.mrb[38].mxu1 }
 0x26c   :  { %v1454_v1 = vpop.f32.mrb[39].mxu0  ;;  %v1495_v2 = vpop.f32.mrb[39].mxu1 }
 0x26d   :  { %v1509_v3 = vrot.slane %v1501_v60, %v3054_v59  ;;  %v1516_v4 = vrot.slane %v1502_v62, %v3054_v59 }
 0x26f   :  { %v1517_v7 = vcombine.low %v1509_v3, %v1516_v4 }
 0x271   :  { %v1519_v8 = vadd.f32 %v1517_v7, %v1414_v5 }
 0x273   :  { %v1520_v9 = vmul.f32 0.5, %v1519_v8  ;;  %v1525_v57 = vrot.slane %v1519_v8, 2  ;;  %v1531_v10 = vrot.slane %v1519_v8, 4  ;;  %v1534_v11 = vrot.slane %v1519_v8, 6 }
 0x275   :  { %2529 = vtanh.f32 %v1520_v9  ;;  %v1527_v58 = vmul.f32 0.5, %v1525_v57  ;;  %v1536_v12 = vmul.f32 0.5, %v1534_v11  ;;  %v3145_v9 = vld [vmem:[#allocation2 + $0x8] sm:$0xff]  }
 0x277   :  { %2531 = vtanh.f32 %v1527_v58 }
 0x278   :  { %2533 = vtanh.f32 %v1531_v10 }
 0x279   :  { %2535 = vtanh.f32 %v1536_v12 }
 0x27f   :  { %v2530_v15 = vpop.eup %2529 }
 0x280   :  { %v1522_v46 = vadd.f32 1.0, %v2530_v15 }
 0x281   :  { %v2532_v47 = vpop.eup %2531 }
 0x282   :  { %v1523_v48 = vmul.f32 0.5, %v1522_v46  ;;  %v1529_v50 = vadd.f32 1.0, %v2532_v47  ;;  %v2534_v53 = vpop.eup %2533 }
 0x283   :  { %v2536_v55 = vpop.eup %2535 }
 0x284   :  { %v1530_v51 = vmul.f32 0.5, %v1529_v50  ;;  %v1541_v6 = vmul.f32 %v2534_v53, %v1523_v48  ;;  %v1538_v56 = vadd.f32 1.0, %v2536_v55 }
 0x286   :  { %v1540_v52 = vmul.f32 %v1530_v51, %v3061_v61  ;;  %v1539_v60 = vmul.f32 0.5, %v1538_v56 }
 0x288   :  { %v3105_v54 = vadd.f32 %v1541_v6, %v1540_v52 }
 0x28a   :  { %2537 = vtanh.f32 %v3105_v54 }
 0x294   :  { %v2538_v62 = vpop.eup %2537 }
 0x295   :  { %v1544_v49 = vmul.f32 %v2538_v62, %v1539_v60 }
 0x297   :  { %v1545_v63 = vpack.c.bf16 %v1544_v49, %v1544_v49 }
 0x299   :  { %2449 = vst [vmem:[%s3402_s4 + $0x1] sm:$0x1] %v1545_v63  ;;  %1583 = vmatmul.mubr.bf16.vlgmr.msra.gmra.mrb[40].mxu0 %v1545_v63  ;;  %1624 = vmatmul.mubr.bf16.vlgmr.msra.gmra.mrb[40].mxu1 %v1545_v63 }
 0x29a   :  { %1686 = vmatpush1.bf16.msra.mxu0 %v2858_v16  ;;  %1727 = vmatpush1.bf16.msra.mxu1 %v2860_v17 }
 0x29b   :  { %1687 = vmatprep.subr.bf16.mxu0 %v2862_v18  ;;  %1728 = vmatprep.subr.bf16.mxu1 %v2864_v19 }
 0x29c   :  { %1717 = vmatprep.mubr.bf16.mxu0 %v2706_v0  ;;  %1758 = vmatprep.mubr.bf16.mxu1 %v2706_v0 }
 0x29e   :  { %1688 = vmatpush1.bf16.msra.mxu0 %v2870_v20  ;;  %1729 = vmatpush1.bf16.msra.mxu1 %v2872_v21 }
 0x29f   :  { %1689 = vmatprep.subr.bf16.mxu0 %v2876_v22  ;;  %1730 = vmatprep.subr.bf16.mxu1 %v2878_v23 }
 0x2a2   :  { %1690 = vmatpush1.bf16.msra.mxu0 %v2884_v24  ;;  %1731 = vmatpush1.bf16.msra.mxu1 %v2886_v25 }
 0x2a3   :  { %1691 = vmatprep.subr.bf16.mxu0 %v2890_v26  ;;  %1732 = vmatprep.subr.bf16.mxu1 %v2892_v27 }
 0x2a6   :  { %1692 = vmatpush1.bf16.msra.mxu0 %v2896_v28  ;;  %1733 = vmatpush1.bf16.msra.mxu1 %v2898_v29 }
 0x2a7   :  { %1693 = vmatprep.subr.bf16.mxu0 %v2902_v30  ;;  %1734 = vmatprep.subr.bf16.mxu1 %v2904_v31 }
 0x2aa   :  { %1694 = vmatpush1.bf16.msra.mxu0 %v2908_v32  ;;  %1735 = vmatpush1.bf16.msra.mxu1 %v2910_v33 }
 0x2ab   :  { %1695 = vmatprep.subr.bf16.mxu0 %v2914_v34  ;;  %1736 = vmatprep.subr.bf16.mxu1 %v2916_v35 }
 0x2ae   :  { %1696 = vmatpush1.bf16.msra.mxu0 %v2920_v36  ;;  %1737 = vmatpush1.bf16.msra.mxu1 %v2922_v37 }
 0x2af   :  { %1697 = vmatprep.subr.bf16.mxu0 %v2926_v38  ;;  %1738 = vmatprep.subr.bf16.mxu1 %v2928_v39 }
 0x2b2   :  { %1698 = vmatpush1.bf16.msra.mxu0 %v2932_v40  ;;  %1739 = vmatpush1.bf16.msra.mxu1 %v2934_v41 }
 0x2b3   :  { %1699 = vmatprep.subr.bf16.mxu0 %v2938_v42  ;;  %1740 = vmatprep.subr.bf16.mxu1 %v2940_v43 }
 0x2b6   :  { %1700 = vmatpush1.bf16.msra.mxu0 %v2944_v44  ;;  %1741 = vmatpush1.bf16.msra.mxu1 %v2946_v45 }
 0x2b7   :  { %1820 = vmatprep.subr.bf16.mxu0 %v2843_v13  ;;  %1861 = vmatprep.subr.bf16.mxu1 %v2845_v14  ;;  %v1549_v13 = vunpack.c.l.bf16 %v3145_v9 }
 0x36c   :  { %v1584_v61 = vpop.f32.mrb[40].mxu0  ;;  %v1625_v1 = vpop.f32.mrb[40].mxu1 }
 0x36d   :  { %v1586_v2 = vpop.f32.mrb[41].mxu0  ;;  %v1627_v3 = vpop.f32.mrb[41].mxu1 }
 0x36e   :  { %v1636_v4 = vcombine.low %v1584_v61, %v1586_v2  ;;  %v1637_v5 = vcombine.low %v1625_v1, %v1627_v3  ;;  %v1588_v7 = vpop.f32.mrb[42].mxu0  ;;  %v1629_v8 = vpop.f32.mrb[42].mxu1 }
 0x36f   :  { %v1589_v57 = vpop.f32.mrb[43].mxu0  ;;  %v1630_v58 = vpop.f32.mrb[43].mxu1 }
 0x370   :  { %v1644_v10 = vrot.slane %v1636_v4, %v3054_v59  ;;  %v1651_v11 = vrot.slane %v1637_v5, %v3054_v59 }
 0x372   :  { %v1652_v12 = vcombine.low %v1644_v10, %v1651_v11 }
 0x374   :  { %v1654_v14 = vadd.f32 %v1652_v12, %v1549_v13 }
 0x376   :  { %v1655_v15 = vmul.f32 0.5, %v1654_v14  ;;  %v1660_v46 = vrot.slane %v1654_v14, 2  ;;  %v1666_v48 = vrot.slane %v1654_v14, 4  ;;  %v1669_v50 = vrot.slane %v1654_v14, 6  ;;  %v3205_v14 = vld [vmem:[#allocation7] ss:$16 sps:$4 sm:$0xff]  }
 0x378   :  { %2539 = vtanh.f32 %v1655_v15  ;;  %v1662_v47 = vmul.f32 0.5, %v1660_v46  ;;  %v1671_v51 = vmul.f32 0.5, %v1669_v50  ;;  %v3208_v15 = vld [vmem:[#allocation7 + $0x8] ss:$16 sps:$4 sm:$0xff]   ;;  %v3211_v46 = vld [vmem:[#allocation7 + $0x24] ss:$16 sps:$4 sm:$0xff]  }
 0x379   :  { %v3222_v50 = vld [vmem:[#allocation7 + $0x28] ss:$16 sps:$4 sm:$0xff]  }
 0x37a   :  { %2541 = vtanh.f32 %v1662_v47  ;;  %v3214_v47 = vld [vmem:[#allocation7 + $0x2c] ss:$16 sps:$4 sm:$0xff]  }
 0x37b   :  { %2543 = vtanh.f32 %v1666_v48  ;;  %v3219_v48 = vld [vmem:[#allocation7 + $0x20] ss:$16 sps:$4 sm:$0xff]  }
 0x37c   :  { %2545 = vtanh.f32 %v1671_v51  ;;  %v3225_v51 = vld [vmem:[#allocation7 + $0x44] ss:$16 sps:$4 sm:$0xff]  }
 0x382   :  { %v2540_v53 = vpop.eup %2539 }
 0x383   :  { %v1657_v52 = vadd.f32 1.0, %v2540_v53  ;;  %v3228_v53 = vld [vmem:[#allocation7 + $0x4c] ss:$16 sps:$4 sm:$0xff]  }
 0x384   :  { %v2542_v6 = vpop.eup %2541 }
 0x385   :  { %v1658_v55 = vmul.f32 0.5, %v1657_v52  ;;  %v1664_v56 = vadd.f32 1.0, %v2542_v6  ;;  %v2544_v62 = vpop.eup %2543  ;;  %v3231_v52 = vld [vmem:[#allocation7 + $0x40] ss:$16 sps:$4 sm:$0xff]   ;;  %v3234_v6 = vld [vmem:[#allocation7 + $0x48] ss:$16 sps:$4 sm:$0xff]  }
 0x386   :  { %v2546_v1 = vpop.eup %2545 }
 0x387   :  { %v1665_v60 = vmul.f32 0.5, %v1664_v56  ;;  %v1676_v63 = vmul.f32 %v2544_v62, %v1658_v55  ;;  %v1673_v2 = vadd.f32 1.0, %v2546_v1  ;;  %v3237_v55 = vld [vmem:[#allocation7 + $0x64] ss:$16 sps:$4 sm:$0xff]   ;;  %v3240_v56 = vld [vmem:[#allocation7 + $0x6c] ss:$16 sps:$4 sm:$0xff]  }
 0x388   :  { %v3246_v62 = vld [vmem:[#allocation7 + $0x68] ss:$16 sps:$4 sm:$0xff]  }
 0x389   :  { %v1675_v49 = vmul.f32 %v1665_v60, %v3105_v54  ;;  %v1674_v3 = vmul.f32 0.5, %v1673_v2  ;;  %v3243_v60 = vld [vmem:[#allocation7 + $0x60] ss:$16 sps:$4 sm:$0xff]   ;;  %v3258_v1 = vld [vmem:[#allocation7 + $0x88] ss:$16 sps:$4 sm:$0xff]  }
 0x38a   :  { %v3261_v2 = vld [vmem:[#allocation7 + $0xa4] ss:$16 sps:$4 sm:$0xff]  }
 0x38b   :  { %v3151_v61 = vadd.f32 %v1676_v63, %v1675_v49  ;;  %v3249_v49 = vld [vmem:[#allocation7 + $0x84] ss:$16 sps:$4 sm:$0xff]   ;;  %v3252_v63 = vld [vmem:[#allocation7 + $0x8c] ss:$16 sps:$4 sm:$0xff]  }
 0x38d   :  { %2547 = vtanh.f32 %v3151_v61 }
 0x397   :  { %v2548_v4 = vpop.eup %2547 }
 0x398   :  { %v1679_v5 = vmul.f32 %v2548_v4, %v1674_v3  ;;  %v3264_v3 = vld [vmem:[#allocation7 + $0xac] ss:$16 sps:$4 sm:$0xff]   ;;  %v3267_v4 = vld [vmem:[#allocation7 + $0xa0] ss:$16 sps:$4 sm:$0xff]  }
 0x39a   :  { %v1680_v7 = vpack.c.bf16 %v1679_v5, %v1679_v5  ;;  %v3270_v5 = vld [vmem:[#allocation7 + $0xa8] ss:$16 sps:$4 sm:$0xff]  }
 0x39c   :  { %2450 = vst [vmem:[%s3402_s4 + $0x2] sm:$0x1] %v1680_v7  ;;  %1718 = vmatmul.mubr.bf16.vlgmr.msra.gmra.mrb[44].mxu0 %v1680_v7  ;;  %1759 = vmatmul.mubr.bf16.vlgmr.msra.gmra.mrb[44].mxu1 %v1680_v7  ;;  %v3273_v7 = vld [vmem:[#allocation7 + $0xc4] ss:$16 sps:$4 sm:$0xff]  }
 0x39d   :  { %1821 = vmatpush1.bf16.msra.mxu0 %v2858_v16  ;;  %1862 = vmatpush1.bf16.msra.mxu1 %v2860_v17  ;;  %v3189_v16 = vld [vmem:[#allocation7 + $0x4] ss:$16 sps:$4 sm:$0xff]   ;;  %v3192_v17 = vld [vmem:[#allocation7 + $0xc] ss:$16 sps:$4 sm:$0xff]  }
 0x39e   :  { %1822 = vmatprep.subr.bf16.mxu0 %v2862_v18  ;;  %1863 = vmatprep.subr.bf16.mxu1 %v2864_v19 }
 0x39f   :  { %1852 = vmatprep.mubr.bf16.mxu0 %v2706_v0  ;;  %1893 = vmatprep.mubr.bf16.mxu1 %v2706_v0 }
 0x3a1   :  { %1823 = vmatpush1.bf16.msra.mxu0 %v2870_v20  ;;  %1864 = vmatpush1.bf16.msra.mxu1 %v2872_v21 }
 0x3a2   :  { %1824 = vmatprep.subr.bf16.mxu0 %v2876_v22  ;;  %1865 = vmatprep.subr.bf16.mxu1 %v2878_v23 }
 0x3a5   :  { %1825 = vmatpush1.bf16.msra.mxu0 %v2884_v24  ;;  %1866 = vmatpush1.bf16.msra.mxu1 %v2886_v25 }
 0x3a6   :  { %1826 = vmatprep.subr.bf16.mxu0 %v2890_v26  ;;  %1867 = vmatprep.subr.bf16.mxu1 %v2892_v27 }
 0x3a9   :  { %1827 = vmatpush1.bf16.msra.mxu0 %v2896_v28  ;;  %1868 = vmatpush1.bf16.msra.mxu1 %v2898_v29 }
 0x3aa   :  { %1828 = vmatprep.subr.bf16.mxu0 %v2902_v30  ;;  %1869 = vmatprep.subr.bf16.mxu1 %v2904_v31  ;;  %v1684_v30 = vunpack.c.h.bf16 %v3145_v9 }
 0x3ad   :  { %1829 = vmatpush1.bf16.msra.mxu0 %v2908_v32  ;;  %1870 = vmatpush1.bf16.msra.mxu1 %v2910_v33 }
 0x3ae   :  { %1830 = vmatprep.subr.bf16.mxu0 %v2914_v34  ;;  %1871 = vmatprep.subr.bf16.mxu1 %v2916_v35 }
 0x3b1   :  { %1831 = vmatpush1.bf16.msra.mxu0 %v2920_v36  ;;  %1872 = vmatpush1.bf16.msra.mxu1 %v2922_v37 }
 0x3b2   :  { %1832 = vmatprep.subr.bf16.mxu0 %v2926_v38  ;;  %1873 = vmatprep.subr.bf16.mxu1 %v2928_v39 }
 0x3b5   :  { %1833 = vmatpush1.bf16.msra.mxu0 %v2932_v40  ;;  %1874 = vmatpush1.bf16.msra.mxu1 %v2934_v41 }
 0x3b6   :  { %1834 = vmatprep.subr.bf16.mxu0 %v2938_v42  ;;  %1875 = vmatprep.subr.bf16.mxu1 %v2940_v43 }
 0x3b9   :  { %1835 = vmatpush1.bf16.msra.mxu0 %v2944_v44  ;;  %1876 = vmatpush1.bf16.msra.mxu1 %v2946_v45 }
 0x3ba   :  { %1955 = vmatprep.subr.bf16.mxu0 %v3189_v16  ;;  %1996 = vmatprep.subr.bf16.mxu1 %v3192_v17 }
 0x46f   :  { %v1719_v18 = vpop.f32.mrb[44].mxu0  ;;  %v1760_v19 = vpop.f32.mrb[44].mxu1 }
 0x470   :  { %v1721_v20 = vpop.f32.mrb[45].mxu0  ;;  %v1762_v21 = vpop.f32.mrb[45].mxu1 }
 0x471   :  { %v1771_v22 = vcombine.low %v1719_v18, %v1721_v20  ;;  %v1772_v23 = vcombine.low %v1760_v19, %v1762_v21  ;;  %v1723_v24 = vpop.f32.mrb[46].mxu0  ;;  %v1764_v25 = vpop.f32.mrb[46].mxu1  ;;  %v3276_v18 = vld [vmem:[#allocation7 + $0xcc] ss:$16 sps:$4 sm:$0xff]   ;;  %v3279_v19 = vld [vmem:[#allocation7 + $0xc0] ss:$16 sps:$4 sm:$0xff]  }
 0x472   :  { %v1724_v26 = vpop.f32.mrb[47].mxu0  ;;  %v1765_v27 = vpop.f32.mrb[47].mxu1  ;;  %v3282_v20 = vld [vmem:[#allocation7 + $0xc8] ss:$16 sps:$4 sm:$0xff]   ;;  %v3285_v21 = vld [vmem:[#allocation7 + $0xe4] ss:$16 sps:$4 sm:$0xff]  }
 0x473   :  { %v1779_v28 = vrot.slane %v1771_v22, %v3054_v59  ;;  %v1786_v29 = vrot.slane %v1772_v23, %v3054_v59  ;;  %v3288_v22 = vld [vmem:[#allocation7 + $0xec] ss:$16 sps:$4 sm:$0xff]   ;;  %v3291_v23 = vld [vmem:[#allocation7 + $0xe0] ss:$16 sps:$4 sm:$0xff]   ;;  %v3294_v24 = vld [vmem:[#allocation7 + $0xe8] ss:$16 sps:$4 sm:$0xff]  }
 0x475   :  { %v1787_v31 = vcombine.low %v1779_v28, %v1786_v29 }
 0x477   :  { %v1789_v32 = vadd.f32 %v1787_v31, %v1684_v30 }
 0x479   :  { %v1790_v33 = vmul.f32 0.5, %v1789_v32  ;;  %v1795_v34 = vrot.slane %v1789_v32, 2  ;;  %v1801_v36 = vrot.slane %v1789_v32, 4  ;;  %v1804_v37 = vrot.slane %v1789_v32, 6 }
 0x47b   :  { %2549 = vtanh.f32 %v1790_v33  ;;  %v1797_v35 = vmul.f32 0.5, %v1795_v34  ;;  %v1806_v38 = vmul.f32 0.5, %v1804_v37  ;;  %v3299_v33 = vld [vmem:[#allocation2 + $0x10] sm:$0xff]  }
 0x47d   :  { %2551 = vtanh.f32 %v1797_v35 }
 0x47e   :  { %2553 = vtanh.f32 %v1801_v36 }
 0x47f   :  { %2555 = vtanh.f32 %v1806_v38  ;;  %v1819_v38 = vunpack.c.l.bf16 %v3299_v33 }
 0x485   :  { %v2550_v39 = vpop.eup %2549 }
 0x486   :  { %v1792_v40 = vadd.f32 1.0, %v2550_v39 }
 0x487   :  { %v2552_v41 = vpop.eup %2551 }
 0x488   :  { %v1793_v42 = vmul.f32 0.5, %v1792_v40  ;;  %v1799_v43 = vadd.f32 1.0, %v2552_v41  ;;  %v2554_v45 = vpop.eup %2553 }
 0x489   :  { %v2556_v57 = vpop.eup %2555 }
 0x48a   :  { %v1800_v44 = vmul.f32 0.5, %v1799_v43  ;;  %v1811_v8 = vmul.f32 %v2554_v45, %v1793_v42  ;;  %v1808_v58 = vadd.f32 1.0, %v2556_v57 }
 0x48c   :  { %v1810_v54 = vmul.f32 %v1800_v44, %v3151_v61  ;;  %v1809_v10 = vmul.f32 0.5, %v1808_v58  ;;  %v3255_v61 = vld [vmem:[#allocation7 + $0x80] ss:$16 sps:$4 sm:$0xff]  }
 0x48e   :  { %v3199_v9 = vadd.f32 %v1811_v8, %v1810_v54 }
 0x490   :  { %2557 = vtanh.f32 %v3199_v9 }
 0x49a   :  { %v2558_v11 = vpop.eup %2557 }
 0x49b   :  { %v1814_v13 = vmul.f32 %v2558_v11, %v1809_v10 }
 0x49d   :  { %v1815_v12 = vpack.c.bf16 %v1814_v13, %v1814_v13 }
 0x49f   :  { %2451 = vst [vmem:[%s3402_s4 + $0x3] sm:$0x1] %v1815_v12  ;;  %1853 = vmatmul.mubr.bf16.vlgmr.msra.gmra.mrb[48].mxu0 %v1815_v12  ;;  %1894 = vmatmul.mubr.bf16.vlgmr.msra.gmra.mrb[48].mxu1 %v1815_v12 }
 0x4a0   :  { %1956 = vmatpush1.bf16.msra.mxu0 %v3205_v14  ;;  %1997 = vmatpush1.bf16.msra.mxu1 %v3208_v15 }
 0x4a1   :  { %1957 = vmatprep.subr.bf16.mxu0 %v3211_v46  ;;  %1998 = vmatprep.subr.bf16.mxu1 %v3214_v47 }
 0x4a2   :  { %1987 = vmatprep.mubr.bf16.mxu0 %v2706_v0  ;;  %2028 = vmatprep.mubr.bf16.mxu1 %v2706_v0 }
 0x4a4   :  { %1958 = vmatpush1.bf16.msra.mxu0 %v3219_v48  ;;  %1999 = vmatpush1.bf16.msra.mxu1 %v3222_v50 }
 0x4a5   :  { %1959 = vmatprep.subr.bf16.mxu0 %v3225_v51  ;;  %2000 = vmatprep.subr.bf16.mxu1 %v3228_v53 }
 0x4a8   :  { %1960 = vmatpush1.bf16.msra.mxu0 %v3231_v52  ;;  %2001 = vmatpush1.bf16.msra.mxu1 %v3234_v6 }
 0x4a9   :  { %1961 = vmatprep.subr.bf16.mxu0 %v3237_v55  ;;  %2002 = vmatprep.subr.bf16.mxu1 %v3240_v56 }
 0x4ac   :  { %1962 = vmatpush1.bf16.msra.mxu0 %v3243_v60  ;;  %2003 = vmatpush1.bf16.msra.mxu1 %v3246_v62 }
 0x4ad   :  { %1963 = vmatprep.subr.bf16.mxu0 %v3249_v49  ;;  %2004 = vmatprep.subr.bf16.mxu1 %v3252_v63 }
 0x4b0   :  { %1964 = vmatpush1.bf16.msra.mxu0 %v3255_v61  ;;  %2005 = vmatpush1.bf16.msra.mxu1 %v3258_v1 }
 0x4b1   :  { %1965 = vmatprep.subr.bf16.mxu0 %v3261_v2  ;;  %2006 = vmatprep.subr.bf16.mxu1 %v3264_v3 }
 0x4b4   :  { %1966 = vmatpush1.bf16.msra.mxu0 %v3267_v4  ;;  %2007 = vmatpush1.bf16.msra.mxu1 %v3270_v5 }
 0x4b5   :  { %1967 = vmatprep.subr.bf16.mxu0 %v3273_v7  ;;  %2008 = vmatprep.subr.bf16.mxu1 %v3276_v18 }
 0x4b8   :  { %1968 = vmatpush1.bf16.msra.mxu0 %v3279_v19  ;;  %2009 = vmatpush1.bf16.msra.mxu1 %v3282_v20 }
 0x4b9   :  { %1969 = vmatprep.subr.bf16.mxu0 %v3285_v21  ;;  %2010 = vmatprep.subr.bf16.mxu1 %v3288_v22 }
 0x4bc   :  { %1970 = vmatpush1.bf16.msra.mxu0 %v3291_v23  ;;  %2011 = vmatpush1.bf16.msra.mxu1 %v3294_v24 }
 0x4bd   :  { %2090 = vmatprep.subr.bf16.mxu0 %v3189_v16  ;;  %2131 = vmatprep.subr.bf16.mxu1 %v3192_v17 }
 0x572   :  { %v1854_v25 = vpop.f32.mrb[48].mxu0  ;;  %v1895_v26 = vpop.f32.mrb[48].mxu1 }
 0x573   :  { %v1856_v27 = vpop.f32.mrb[49].mxu0  ;;  %v1897_v28 = vpop.f32.mrb[49].mxu1 }
 0x574   :  { %v1906_v29 = vcombine.low %v1854_v25, %v1856_v27  ;;  %v1907_v30 = vcombine.low %v1895_v26, %v1897_v28  ;;  %v1858_v31 = vpop.f32.mrb[50].mxu0  ;;  %v1899_v32 = vpop.f32.mrb[50].mxu1 }
 0x575   :  { %v1859_v34 = vpop.f32.mrb[51].mxu0  ;;  %v1900_v35 = vpop.f32.mrb[51].mxu1 }
 0x576   :  { %v1914_v36 = vrot.slane %v1906_v29, %v3054_v59  ;;  %v1921_v37 = vrot.slane %v1907_v30, %v3054_v59 }
 0x578   :  { %v1922_v39 = vcombine.low %v1914_v36, %v1921_v37 }
 0x57a   :  { %v1924_v40 = vadd.f32 %v1922_v39, %v1819_v38 }
 0x57c   :  { %v1925_v41 = vmul.f32 0.5, %v1924_v40  ;;  %v1930_v42 = vrot.slane %v1924_v40, 2  ;;  %v1936_v44 = vrot.slane %v1924_v40, 4  ;;  %v1939_v45 = vrot.slane %v1924_v40, 6 }
 0x57e   :  { %2559 = vtanh.f32 %v1925_v41  ;;  %v1932_v43 = vmul.f32 0.5, %v1930_v42  ;;  %v1941_v54 = vmul.f32 0.5, %v1939_v45 }
 0x580   :  { %2561 = vtanh.f32 %v1932_v43 }
 0x581   :  { %2563 = vtanh.f32 %v1936_v44 }
 0x582   :  { %2565 = vtanh.f32 %v1941_v54  ;;  %v1954_v54 = vunpack.c.h.bf16 %v3299_v33 }
 0x588   :  { %v2560_v8 = vpop.eup %2559 }
 0x589   :  { %v1927_v57 = vadd.f32 1.0, %v2560_v8 }
 0x58a   :  { %v2562_v58 = vpop.eup %2561 }
 0x58b   :  { %v1928_v10 = vmul.f32 0.5, %v1927_v57  ;;  %v1934_v11 = vadd.f32 1.0, %v2562_v58  ;;  %v2564_v12 = vpop.eup %2563 }
 0x58c   :  { %v2566_v28 = vpop.eup %2565 }
 0x58d   :  { %v1935_v13 = vmul.f32 0.5, %v1934_v11  ;;  %v1946_v26 = vmul.f32 %v2564_v12, %v1928_v10  ;;  %v1943_v29 = vadd.f32 1.0, %v2566_v28 }
 0x58f   :  { %v1945_v25 = vmul.f32 %v1935_v13, %v3199_v9  ;;  %v1944_v30 = vmul.f32 0.5, %v1943_v29 }
 0x591   :  { %v3305_v27 = vadd.f32 %v1946_v26, %v1945_v25 }
 0x593   :  { %2567 = vtanh.f32 %v3305_v27 }
 0x59d   :  { %v2568_v31 = vpop.eup %2567 }
 0x59e   :  { %v1949_v32 = vmul.f32 %v2568_v31, %v1944_v30 }
 0x5a0   :  { %v1950_v34 = vpack.c.bf16 %v1949_v32, %v1949_v32 }
 0x5a2   :  { %2452 = vst [vmem:[%s3402_s4 + $0x4] sm:$0x1] %v1950_v34  ;;  %1988 = vmatmul.mubr.bf16.vlgmr.msra.gmra.mrb[52].mxu0 %v1950_v34  ;;  %2029 = vmatmul.mubr.bf16.vlgmr.msra.gmra.mrb[52].mxu1 %v1950_v34 }
 0x5a3   :  { %2091 = vmatpush1.bf16.msra.mxu0 %v3205_v14  ;;  %2132 = vmatpush1.bf16.msra.mxu1 %v3208_v15 }
 0x5a4   :  { %2092 = vmatprep.subr.bf16.mxu0 %v3211_v46  ;;  %2133 = vmatprep.subr.bf16.mxu1 %v3214_v47 }
 0x5a5   :  { %2122 = vmatprep.mubr.bf16.mxu0 %v2706_v0  ;;  %2163 = vmatprep.mubr.bf16.mxu1 %v2706_v0 }
 0x5a7   :  { %2093 = vmatpush1.bf16.msra.mxu0 %v3219_v48  ;;  %2134 = vmatpush1.bf16.msra.mxu1 %v3222_v50 }
 0x5a8   :  { %2094 = vmatprep.subr.bf16.mxu0 %v3225_v51  ;;  %2135 = vmatprep.subr.bf16.mxu1 %v3228_v53 }
 0x5ab   :  { %2095 = vmatpush1.bf16.msra.mxu0 %v3231_v52  ;;  %2136 = vmatpush1.bf16.msra.mxu1 %v3234_v6 }
 0x5ac   :  { %2096 = vmatprep.subr.bf16.mxu0 %v3237_v55  ;;  %2137 = vmatprep.subr.bf16.mxu1 %v3240_v56 }
 0x5af   :  { %2097 = vmatpush1.bf16.msra.mxu0 %v3243_v60  ;;  %2138 = vmatpush1.bf16.msra.mxu1 %v3246_v62 }
 0x5b0   :  { %2098 = vmatprep.subr.bf16.mxu0 %v3249_v49  ;;  %2139 = vmatprep.subr.bf16.mxu1 %v3252_v63 }
 0x5b3   :  { %2099 = vmatpush1.bf16.msra.mxu0 %v3255_v61  ;;  %2140 = vmatpush1.bf16.msra.mxu1 %v3258_v1 }
 0x5b4   :  { %2100 = vmatprep.subr.bf16.mxu0 %v3261_v2  ;;  %2141 = vmatprep.subr.bf16.mxu1 %v3264_v3 }
 0x5b7   :  { %2101 = vmatpush1.bf16.msra.mxu0 %v3267_v4  ;;  %2142 = vmatpush1.bf16.msra.mxu1 %v3270_v5 }
 0x5b8   :  { %2102 = vmatprep.subr.bf16.mxu0 %v3273_v7  ;;  %2143 = vmatprep.subr.bf16.mxu1 %v3276_v18 }
 0x5bb   :  { %2103 = vmatpush1.bf16.msra.mxu0 %v3279_v19  ;;  %2144 = vmatpush1.bf16.msra.mxu1 %v3282_v20 }
 0x5bc   :  { %2104 = vmatprep.subr.bf16.mxu0 %v3285_v21  ;;  %2145 = vmatprep.subr.bf16.mxu1 %v3288_v22 }
 0x5bf   :  { %2105 = vmatpush1.bf16.msra.mxu0 %v3291_v23  ;;  %2146 = vmatpush1.bf16.msra.mxu1 %v3294_v24 }
 0x5c0   :  { %2225 = vmatprep.subr.bf16.mxu0 %v3189_v16  ;;  %2266 = vmatprep.subr.bf16.mxu1 %v3192_v17 }
 0x675   :  { %v1989_v9 = vpop.f32.mrb[52].mxu0  ;;  %v2030_v35 = vpop.f32.mrb[52].mxu1 }
 0x676   :  { %v1991_v36 = vpop.f32.mrb[53].mxu0  ;;  %v2032_v37 = vpop.f32.mrb[53].mxu1 }
 0x677   :  { %v2041_v38 = vcombine.low %v1989_v9, %v1991_v36  ;;  %v2042_v39 = vcombine.low %v2030_v35, %v2032_v37  ;;  %v1993_v40 = vpop.f32.mrb[54].mxu0  ;;  %v2034_v41 = vpop.f32.mrb[54].mxu1 }
 0x678   :  { %v1994_v42 = vpop.f32.mrb[55].mxu0  ;;  %v2035_v43 = vpop.f32.mrb[55].mxu1 }
 0x679   :  { %v2049_v44 = vrot.slane %v2041_v38, %v3054_v59  ;;  %v2056_v45 = vrot.slane %v2042_v39, %v3054_v59 }
 0x67b   :  { %v2057_v8 = vcombine.low %v2049_v44, %v2056_v45 }
 0x67d   :  { %v2059_v16 = vadd.f32 %v2057_v8, %v1954_v54 }
 0x67f   :  { %v2060_v57 = vmul.f32 0.5, %v2059_v16  ;;  %v2065_v17 = vrot.slane %v2059_v16, 2  ;;  %v2071_v10 = vrot.slane %v2059_v16, 4  ;;  %v2074_v11 = vrot.slane %v2059_v16, 6 }
 0x681   :  { %2569 = vtanh.f32 %v2060_v57  ;;  %v2067_v58 = vmul.f32 0.5, %v2065_v17  ;;  %v2076_v13 = vmul.f32 0.5, %v2074_v11 }
 0x683   :  { %2571 = vtanh.f32 %v2067_v58 }
 0x684   :  { %2573 = vtanh.f32 %v2071_v10 }
 0x685   :  { %2575 = vtanh.f32 %v2076_v13 }
 0x68b   :  { %v2570_v12 = vpop.eup %2569 }
 0x68c   :  { %v2062_v25 = vadd.f32 1.0, %v2570_v12 }
 0x68d   :  { %v2572_v26 = vpop.eup %2571 }
 0x68e   :  { %v2063_v28 = vmul.f32 0.5, %v2062_v25  ;;  %v2069_v29 = vadd.f32 1.0, %v2572_v26  ;;  %v2574_v31 = vpop.eup %2573 }
 0x68f   :  { %v2576_v9 = vpop.eup %2575 }
 0x690   :  { %v2070_v30 = vmul.f32 0.5, %v2069_v29  ;;  %v2081_v32 = vmul.f32 %v2574_v31, %v2063_v28  ;;  %v2078_v35 = vadd.f32 1.0, %v2576_v9 }
 0x692   :  { %v2080_v33 = vmul.f32 %v2070_v30, %v3305_v27  ;;  %v2079_v36 = vmul.f32 0.5, %v2078_v35 }
 0x694   :  { %v3349_v34 = vadd.f32 %v2081_v32, %v2080_v33 }
 0x696   :  { %2577 = vtanh.f32 %v3349_v34 }
 0x6a0   :  { %v2578_v37 = vpop.eup %2577 }
 0x6a1   :  { %v2084_v38 = vmul.f32 %v2578_v37, %v2079_v36 }
 0x6a3   :  { %v2085_v39 = vpack.c.bf16 %v2084_v38, %v2084_v38 }
 0x6a5   :  { %2453 = vst [vmem:[%s3402_s4 + $0x5] sm:$0x1] %v2085_v39  ;;  %2123 = vmatmul.mubr.bf16.vlgmr.msra.gmra.mrb[56].mxu0 %v2085_v39  ;;  %2164 = vmatmul.mubr.bf16.vlgmr.msra.gmra.mrb[56].mxu1 %v2085_v39 }
 0x6a6   :  { %2226 = vmatpush1.bf16.msra.mxu0 %v3205_v14  ;;  %2267 = vmatpush1.bf16.msra.mxu1 %v3208_v15 }
 0x6a7   :  { %2227 = vmatprep.subr.bf16.mxu0 %v3211_v46  ;;  %2268 = vmatprep.subr.bf16.mxu1 %v3214_v47 }
 0x6a8   :  { %2257 = vmatprep.mubr.bf16.mxu0 %v2706_v0  ;;  %2298 = vmatprep.mubr.bf16.mxu1 %v2706_v0 }
 0x6aa   :  { %2228 = vmatpush1.bf16.msra.mxu0 %v3219_v48  ;;  %2269 = vmatpush1.bf16.msra.mxu1 %v3222_v50 }
 0x6ab   :  { %2229 = vmatprep.subr.bf16.mxu0 %v3225_v51  ;;  %2270 = vmatprep.subr.bf16.mxu1 %v3228_v53  ;;  %v2088_v53 = vld [vmem:[#allocation2 + $0x18] sm:$0xff]  }
 0x6ac   :  { %v2224_v28 = vunpack.c.h.bf16 %v2088_v53 }
 0x6ae   :  { %2230 = vmatpush1.bf16.msra.mxu0 %v3231_v52  ;;  %2271 = vmatpush1.bf16.msra.mxu1 %v3234_v6 }
 0x6af   :  { %2231 = vmatprep.subr.bf16.mxu0 %v3237_v55  ;;  %2272 = vmatprep.subr.bf16.mxu1 %v3240_v56 }
 0x6b2   :  { %2232 = vmatpush1.bf16.msra.mxu0 %v3243_v60  ;;  %2273 = vmatpush1.bf16.msra.mxu1 %v3246_v62  ;;  %v2089_v60 = vunpack.c.l.bf16 %v2088_v53 }
 0x6b3   :  { %2233 = vmatprep.subr.bf16.mxu0 %v3249_v49  ;;  %2274 = vmatprep.subr.bf16.mxu1 %v3252_v63 }
 0x6b6   :  { %2234 = vmatpush1.bf16.msra.mxu0 %v3255_v61  ;;  %2275 = vmatpush1.bf16.msra.mxu1 %v3258_v1 }
 0x6b7   :  { %2235 = vmatprep.subr.bf16.mxu0 %v3261_v2  ;;  %2276 = vmatprep.subr.bf16.mxu1 %v3264_v3 }
 0x6ba   :  { %2236 = vmatpush1.bf16.msra.mxu0 %v3267_v4  ;;  %2277 = vmatpush1.bf16.msra.mxu1 %v3270_v5 }
 0x6bb   :  { %2237 = vmatprep.subr.bf16.mxu0 %v3273_v7  ;;  %2278 = vmatprep.subr.bf16.mxu1 %v3276_v18 }
 0x6be   :  { %2238 = vmatpush1.bf16.msra.mxu0 %v3279_v19  ;;  %2279 = vmatpush1.bf16.msra.mxu1 %v3282_v20 }
 0x6bf   :  { %2239 = vmatprep.subr.bf16.mxu0 %v3285_v21  ;;  %2280 = vmatprep.subr.bf16.mxu1 %v3288_v22 }
 0x6c2   :  { %2240 = vmatpush1.bf16.msra.mxu0 %v3291_v23  ;;  %2281 = vmatpush1.bf16.msra.mxu1 %v3294_v24 }
 0x778   :  { %v2124_v0 = vpop.f32.mrb[56].mxu0  ;;  %v2165_v14 = vpop.f32.mrb[56].mxu1 }
 0x779   :  { %v2126_v15 = vpop.f32.mrb[57].mxu0  ;;  %v2167_v46 = vpop.f32.mrb[57].mxu1 }
 0x77a   :  { %v2176_v47 = vcombine.low %v2124_v0, %v2126_v15  ;;  %v2177_v48 = vcombine.low %v2165_v14, %v2167_v46  ;;  %v2128_v50 = vpop.f32.mrb[58].mxu0  ;;  %v2169_v51 = vpop.f32.mrb[58].mxu1 }
 0x77b   :  { %v2129_v52 = vpop.f32.mrb[59].mxu0  ;;  %v2170_v6 = vpop.f32.mrb[59].mxu1 }
 0x77c   :  { %v2184_v55 = vrot.slane %v2176_v47, %v3054_v59  ;;  %v2191_v56 = vrot.slane %v2177_v48, %v3054_v59 }
 0x77e   :  { %v2192_v62 = vcombine.low %v2184_v55, %v2191_v56 }
 0x780   :  { %v2194_v49 = vadd.f32 %v2192_v62, %v2089_v60 }
 0x782   :  { %v2195_v63 = vmul.f32 0.5, %v2194_v49  ;;  %v2200_v61 = vrot.slane %v2194_v49, 2  ;;  %v2206_v2 = vrot.slane %v2194_v49, 4  ;;  %v2209_v3 = vrot.slane %v2194_v49, 6 }
 0x784   :  { %2579 = vtanh.f32 %v2195_v63  ;;  %v2202_v1 = vmul.f32 0.5, %v2200_v61  ;;  %v2211_v4 = vmul.f32 0.5, %v2209_v3 }
 0x786   :  { %2581 = vtanh.f32 %v2202_v1 }
 0x787   :  { %2583 = vtanh.f32 %v2206_v2 }
 0x788   :  { %2585 = vtanh.f32 %v2211_v4 }
 0x78e   :  { %v2580_v5 = vpop.eup %2579 }
 0x78f   :  { %v2197_v7 = vadd.f32 1.0, %v2580_v5 }
 0x790   :  { %v2582_v18 = vpop.eup %2581 }
 0x791   :  { %v2198_v19 = vmul.f32 0.5, %v2197_v7  ;;  %v2204_v20 = vadd.f32 1.0, %v2582_v18  ;;  %v2584_v22 = vpop.eup %2583 }
 0x792   :  { %v2586_v40 = vpop.eup %2585 }
 0x793   :  { %v2205_v21 = vmul.f32 0.5, %v2204_v20  ;;  %v2216_v24 = vmul.f32 %v2584_v22, %v2198_v19  ;;  %v2213_v41 = vadd.f32 1.0, %v2586_v40 }
 0x795   :  { %v2215_v23 = vmul.f32 %v2205_v21, %v3349_v34  ;;  %v2214_v42 = vmul.f32 0.5, %v2213_v41 }
 0x797   :  { %v2217_v27 = vadd.f32 %v2216_v24, %v2215_v23 }
 0x799   :  { %2587 = vtanh.f32 %v2217_v27 }
 0x7a3   :  { %v2588_v43 = vpop.eup %2587 }
 0x7a4   :  { %v2219_v44 = vmul.f32 %v2588_v43, %v2214_v42 }
 0x7a6   :  { %v2220_v45 = vpack.c.bf16 %v2219_v44, %v2219_v44 }
 0x7a8   :  { %2454 = vst [vmem:[%s3402_s4 + $0x6] sm:$0x1] %v2220_v45  ;;  %2258 = vmatmul.mubr.bf16.vlgmr.msra.gmra.mrb[60].mxu0 %v2220_v45  ;;  %2299 = vmatmul.mubr.bf16.vlgmr.msra.gmra.mrb[60].mxu1 %v2220_v45 }
 0x87b   :  { %v2259_v54 = vpop.f32.mrb[60].mxu0  ;;  %v2300_v8 = vpop.f32.mrb[60].mxu1 }
 0x87c   :  { %v2261_v16 = vpop.f32.mrb[61].mxu0  ;;  %v2302_v57 = vpop.f32.mrb[61].mxu1 }
 0x87d   :  { %v2311_v17 = vcombine.low %v2259_v54, %v2261_v16  ;;  %v2312_v58 = vcombine.low %v2300_v8, %v2302_v57  ;;  %v2263_v10 = vpop.f32.mrb[62].mxu0  ;;  %v2304_v11 = vpop.f32.mrb[62].mxu1 }
 0x87e   :  { %v2264_v13 = vpop.f32.mrb[63].mxu0  ;;  %v2305_v12 = vpop.f32.mrb[63].mxu1 }
 0x87f   :  { %v2319_v25 = vrot.slane %v2311_v17, %v3054_v59  ;;  %v2326_v26 = vrot.slane %v2312_v58, %v3054_v59 }
 0x881   :  { %v2327_v29 = vcombine.low %v2319_v25, %v2326_v26 }
 0x883   :  { %v2329_v30 = vadd.f32 %v2327_v29, %v2224_v28 }
 0x885   :  { %v2330_v31 = vmul.f32 0.5, %v2329_v30  ;;  %v2335_v33 = vrot.slane %v2329_v30, 2  ;;  %v2341_v34 = vrot.slane %v2329_v30, 4  ;;  %v2344_v9 = vrot.slane %v2329_v30, 6 }
 0x887   :  { %2589 = vtanh.f32 %v2330_v31  ;;  %v2337_v32 = vmul.f32 0.5, %v2335_v33  ;;  %v2346_v35 = vmul.f32 0.5, %v2344_v9 }
 0x889   :  { %2591 = vtanh.f32 %v2337_v32 }
 0x88a   :  { %2593 = vtanh.f32 %v2341_v34 }
 0x88b   :  { %2595 = vtanh.f32 %v2346_v35 }
 0x891   :  { %v2590_v36 = vpop.eup %2589 }
 0x892   :  { %v2332_v37 = vadd.f32 1.0, %v2590_v36 }
 0x893   :  { %v2592_v38 = vpop.eup %2591 }
 0x894   :  { %v2333_v39 = vmul.f32 0.5, %v2332_v37  ;;  %v2339_v0 = vadd.f32 1.0, %v2592_v38  ;;  %v2594_v59 = vpop.eup %2593 }
 0x895   :  { %v2596_v48 = vpop.eup %2595 }
 0x896   :  { %v2340_v14 = vmul.f32 0.5, %v2339_v0  ;;  %v2351_v46 = vmul.f32 %v2594_v59, %v2333_v39  ;;  %v2348_v50 = vadd.f32 1.0, %v2596_v48 }
 0x898   :  { %v2350_v15 = vmul.f32 %v2340_v14, %v2217_v27  ;;  %v2349_v51 = vmul.f32 0.5, %v2348_v50 }
 0x89a   :  { %v2352_v47 = vadd.f32 %v2351_v46, %v2350_v15 }
 0x89c   :  { %2597 = vtanh.f32 %v2352_v47  ;;  %2359 = vst [vmem:[#allocation4] sm:$0x3] %v2352_v47 }
 0x8a6   :  { %v2598_v53 = vpop.eup %2597 }
 0x8a7   :  { %v2354_v52 = vmul.f32 %v2598_v53, %v2349_v51 }
 0x8a9   :  { %v2355_v6 = vpack.c.bf16 %v2354_v52, %v2354_v52  ;;  %2358 = vst [vmem:[#allocation3] sm:$0x3] %v2354_v52 }
 0x8ab   :  { %2455 = vst [vmem:[%s3402_s4 + $0x7] sm:$0x1] %v2355_v6 }
 0x8ac   :  { %2364 = vsyncpa [#allocation6], 1 }
 0x8ad   :  { %2365 = vsyncpa [#allocation8], 1 }

</bundles_post_ra>
